<compile_context>
chip_gen: v5e
topology: v5e:2x2
jax: 0.10.0
libtpu: 0.0.40
codegen_flags: <defaults>
</compile_context>

<pallas_src>
import jax
import jax.numpy as jnp
from jax.experimental import pallas as pl
from jax.experimental.pallas import tpu as pltpu

N = 28
N_PIX = N * N        # 784  (== full last dim -> legal, lane-masked only on last 16 lanes)
H = 512
Z = 32
ZCAT = 2 * Z         # fused mu | logvar width
ZPAD = 128           # mulv slab padded to a full 128-lane tile (mu | logvar | zeros)


def _cdiv(a, b):
    return (a + b - 1) // b


def _round_up(x, m):
    return _cdiv(x, m) * m


def _choose_tiling(B, *, max_batch_tile=512):
    """Pick (TB, num_tiles): minimal batch padding, >=2 tiles when B >= 16 (v7x megacore)."""
    num_tiles = _cdiv(B, max_batch_tile)
    if num_tiles == 1 and B >= 16:
        num_tiles = 2                      # let dimension_semantics=("parallel",) use both TCs
    TB = _round_up(_cdiv(B, num_tiles), 8)  # sublane-aligned; padding waste <= 7 + (tiles-1) rows
    num_tiles = _cdiv(B, TB)
    return TB, num_tiles


def vae_kernel(x_ref, eps_ref,
               w1_ref, b1_ref,
               w2_ref, b2_ref,
               w3_ref, b3_ref,
               w4_ref, b4_ref,
               recon_ref, mulv_ref):
    # encoder: h1 = relu(x @ W1 + b1)        (bf16 MXU inputs, f32 accumulation)
    h1 = jnp.dot(x_ref[...], w1_ref[...],
                 preferred_element_type=jnp.float32) + b1_ref[...]
    h1 = jnp.maximum(h1, 0.0)

    # fused fc21|fc22 -> (TB, 128): mu = [:, :32], logvar = [:, 32:64], rest zero-padded
    mulv = jnp.dot(h1.astype(jnp.bfloat16), w2_ref[...],
                   preferred_element_type=jnp.float32) + b2_ref[...]
    mu = mulv[:, :Z]
    logvar = mulv[:, Z:ZCAT]

    # reparameterize in f32: z = mu + eps * exp(0.5 * logvar)
    z = mu + eps_ref[...] * jnp.exp(0.5 * logvar)

    # decoder: sigmoid(relu(z @ W3 + b3) @ W4 + b4)
    h3 = jnp.dot(z.astype(jnp.bfloat16), w3_ref[...],
                 preferred_element_type=jnp.float32) + b3_ref[...]
    h3 = jnp.maximum(h3, 0.0)
    logits = jnp.dot(h3.astype(jnp.bfloat16), w4_ref[...],
                     preferred_element_type=jnp.float32) + b4_ref[...]

    recon_ref[...] = jax.nn.sigmoid(logits).astype(recon_ref.dtype)   # f32 math, bf16 store
    mulv_ref[...] = mulv


def init_params(key):
    """Deterministic parameter init (PyTorch Linear-style uniform bounds), f32, (in, out)."""
    def linear(key, fan_in, fan_out):
        kw, kb = jax.random.split(key)
        bound = 1.0 / jnp.sqrt(jnp.float32(fan_in))
        w = jax.random.uniform(kw, (fan_in, fan_out), jnp.float32, -bound, bound)
        b = jax.random.uniform(kb, (1, fan_out), jnp.float32, -bound, bound)
        return w, b

    k1, k21, k22, k3, k4 = jax.random.split(key, 5)
    w1, b1 = linear(k1, N_PIX, H)
    w21, b21 = linear(k21, H, Z)
    w22, b22 = linear(k22, H, Z)
    w3, b3 = linear(k3, Z, H)
    w4, b4 = linear(k4, H, N_PIX)
    return (w1, b1, w21, b21, w22, b22, w3, b3, w4, b4)


def pack_params(params):
    """Fuse fc21/fc22 into a 128-lane slab and cast matmul weights to bf16 (biases stay f32)."""
    (w1, b1, w21, b21, w22, b22, w3, b3, w4, b4) = params
    w2 = (jnp.zeros((H, ZPAD), jnp.float32)
          .at[:, :Z].set(w21)
          .at[:, Z:ZCAT].set(w22)
          .astype(jnp.bfloat16))
    b2 = (jnp.zeros((1, ZPAD), jnp.float32)
          .at[:, :Z].set(b21)
          .at[:, Z:ZCAT].set(b22))
    return (w1.astype(jnp.bfloat16), b1,
            w2, b2,
            w3.astype(jnp.bfloat16), b3,
            w4.astype(jnp.bfloat16), b4)


def vae_forward(x, eps, packed_params, *, max_batch_tile=512):
    """x: (B, 28, 28) or (B, 784). eps: (B, 32) ~ N(0,1).

    Returns (recon[bf16], mu[f32], logvar[f32]) matching the PyTorch forward.
    """
    B = x.shape[0]
    x2d = x.reshape(B, N_PIX).astype(jnp.bfloat16)      # single cast pass; no pixel padding
    eps2d = eps.astype(jnp.float32)

    TB, num_tiles = _choose_tiling(B, max_batch_tile=max_batch_tile)
    B_pad = TB * num_tiles
    if B_pad != B:                                       # batch pad only when needed
        x2d = jnp.pad(x2d, ((0, B_pad - B), (0, 0)))
        eps2d = jnp.pad(eps2d, ((0, B_pad - B), (0, 0)))

    (w1, b1, w2, b2, w3, b3, w4, b4) = packed_params
    ins = (x2d, eps2d, w1, b1, w2, b2, w3, b3, w4, b4)

    def batch_spec(cols):
        return pl.BlockSpec((TB, cols), lambda i: (i, 0))

    def resident_spec(shape):
        # constant block index -> weights/biases stay resident in VMEM across grid steps
        return pl.BlockSpec(shape, lambda i: (0, 0))

    in_specs = [
        batch_spec(N_PIX),             # x       (bf16)
        batch_spec(Z),                 # eps     (f32)
        resident_spec((N_PIX, H)),     # w1      (bf16)
        resident_spec((1, H)),         # b1      (f32)
        resident_spec((H, ZPAD)),      # w2      (bf16, fused fc21|fc22|zeros)
        resident_spec((1, ZPAD)),      # b2      (f32)
        resident_spec((Z, H)),         # w3      (bf16)
        resident_spec((1, H)),         # b3      (f32)
        resident_spec((H, N_PIX)),     # w4      (bf16)
        resident_spec((1, N_PIX)),     # b4      (f32)
    ]
    out_shapes = (
        jax.ShapeDtypeStruct((B_pad, N_PIX), jnp.bfloat16),   # recon (bf16 store, native 784 width)
        jax.ShapeDtypeStruct((B_pad, ZPAD), jnp.float32),     # mu | logvar | zero pad
    )
    out_specs = (batch_spec(N_PIX), batch_spec(ZPAD))

    flops = 2 * B_pad * (N_PIX * H + H * ZCAT + Z * H + H * N_PIX)
    transcendentals = B_pad * (Z + N_PIX)                     # exp(0.5*logvar) + sigmoid
    in_bytes = sum(int(a.size) * a.dtype.itemsize for a in ins)
    out_bytes = B_pad * N_PIX * 2 + B_pad * ZPAD * 4

    recon_pad, mulv = pl.pallas_call(
        vae_kernel,
        out_shape=out_shapes,
        grid_spec=pl.GridSpec(
            grid=(num_tiles,),
            in_specs=in_specs,
            out_specs=out_specs,
        ),
        compiler_params=pltpu.CompilerParams(
            dimension_semantics=("parallel",),
            vmem_limit_bytes=48 << 20,     # well under v7x's 64 MiB even at TB=1024
        ),
        cost_estimate=pl.CostEstimate(
            flops=flops,
            transcendentals=transcendentals,
            bytes_accessed=int(in_bytes + out_bytes),
        ),
    )(*ins)

    recon = recon_pad if B_pad == B else recon_pad[:B]
    mu = mulv[:B, :Z]
    logvar = mulv[:B, Z:ZCAT]
    return recon, mu, logvar


def vae_reference(x, eps, params, *, emulate_bf16=True):
    """Pure-JAX reference of the PyTorch forward (optionally with bf16 matmul inputs)."""
    (w1, b1, w21, b21, w22, b22, w3, b3, w4, b4) = params
    x2d = x.reshape(x.shape[0], N_PIX).astype(jnp.float32)
    cast = (lambda a: a.astype(jnp.bfloat16)) if emulate_bf16 else (lambda a: a)

    def mm(a, b):
        return jnp.dot(cast(a), cast(b), preferred_element_type=jnp.float32)

    h1 = jax.nn.relu(mm(x2d, w1) + b1)
    mu = mm(h1, w21) + b21
    logvar = mm(h1, w22) + b22
    z = mu + eps * jnp.exp(0.5 * logvar)
    h3 = jax.nn.relu(mm(z, w3) + b3)
    recon = jax.nn.sigmoid(mm(h3, w4) + b4)
    return recon, mu, logvar


if __name__ == "__main__":
    key = jax.random.PRNGKey(0)
    k_param, k_x, k_eps = jax.random.split(key, 3)

    B = 8
    params = init_params(k_param)
    packed = pack_params(params)
    x = jax.random.uniform(k_x, (B, N, N), jnp.float32)      # MNIST-like images
    eps = jax.random.normal(k_eps, (B, Z), jnp.float32)      # torch.randn_like(std)

    recon, mu_out, logvar_out = vae_forward(x, eps, packed)
    recon, mu_out, logvar_out = jax.block_until_ready((recon, mu_out, logvar_out))

    # sanity check vs. pure-JAX reference (bf16 matmul inputs, f32 accumulation)
    r_ref, m_ref, lv_ref = vae_reference(x, eps, params, emulate_bf16=True)
    assert recon.shape == (B, N_PIX) and mu_out.shape == (B, Z) and logvar_out.shape == (B, Z)
    # recon is stored in bf16 (~0.4% rel error on sigmoid outputs), well within tolerance
    assert jnp.allclose(recon.astype(jnp.float32), r_ref, atol=2e-2, rtol=2e-2), "recon mismatch"
    assert jnp.allclose(mu_out, m_ref, atol=2e-2, rtol=2e-2), "mu mismatch"
    assert jnp.allclose(logvar_out, lv_ref, atol=2e-2, rtol=2e-2), "logvar mismatch"

    print("KERNEL_OK")
</pallas_src>

<mosaic_0001>
module attributes {stable_mosaic.version = 11 : i64} {
  func.func @vae_kernel(%arg0: i32, %arg1: memref<8x784xbf16, #tpu.memory_space<vmem>>, %arg2: memref<8x32xf32, #tpu.memory_space<vmem>>, %arg3: memref<784x512xbf16, #tpu.memory_space<vmem>>, %arg4: memref<1x512xf32, #tpu.memory_space<vmem>>, %arg5: memref<512x128xbf16, #tpu.memory_space<vmem>>, %arg6: memref<1x128xf32, #tpu.memory_space<vmem>>, %arg7: memref<32x512xbf16, #tpu.memory_space<vmem>>, %arg8: memref<1x512xf32, #tpu.memory_space<vmem>>, %arg9: memref<512x784xbf16, #tpu.memory_space<vmem>>, %arg10: memref<1x784xf32, #tpu.memory_space<vmem>>, %arg11: memref<8x784xbf16, #tpu.memory_space<vmem>>, %arg12: memref<8x128xf32, #tpu.memory_space<vmem>>) attributes {dimension_semantics = [#tpu.dimension_semantics<parallel>], iteration_bounds = array<i64: 1>, scalar_prefetch = 0 : i64, scratch_operands = 0 : i64, tpu.core_type = #tpu.core_type<tc>, window_params = [{transform_indices = @transform_0, window_bounds = array<i64: 8, 784>}, {transform_indices = @transform_1, window_bounds = array<i64: 8, 32>}, {pipeline_mode = #tpu.pipeline_mode<synchronous>, transform_indices = @transform_2, window_bounds = array<i64: 784, 512>}, {pipeline_mode = #tpu.pipeline_mode<synchronous>, transform_indices = @transform_3, window_bounds = array<i64: 1, 512>}, {pipeline_mode = #tpu.pipeline_mode<synchronous>, transform_indices = @transform_4, window_bounds = array<i64: 512, 128>}, {pipeline_mode = #tpu.pipeline_mode<synchronous>, transform_indices = @transform_5, window_bounds = array<i64: 1, 128>}, {pipeline_mode = #tpu.pipeline_mode<synchronous>, transform_indices = @transform_6, window_bounds = array<i64: 32, 512>}, {pipeline_mode = #tpu.pipeline_mode<synchronous>, transform_indices = @transform_7, window_bounds = array<i64: 1, 512>}, {pipeline_mode = #tpu.pipeline_mode<synchronous>, transform_indices = @transform_8, window_bounds = array<i64: 512, 784>}, {pipeline_mode = #tpu.pipeline_mode<synchronous>, transform_indices = @transform_9, window_bounds = array<i64: 1, 784>}, {transform_indices = @transform_10, window_bounds = array<i64: 8, 784>}, {transform_indices = @transform_11, window_bounds = array<i64: 8, 128>}]} {
    %c0 = arith.constant 0 : index
    %c0_0 = arith.constant 0 : index
    %0 = vector.load %arg1[%c0, %c0_0] : memref<8x784xbf16, #tpu.memory_space<vmem>>, vector<8x784xbf16>
    %c0_1 = arith.constant 0 : index
    %c0_2 = arith.constant 0 : index
    %1 = vector.load %arg3[%c0_1, %c0_2] : memref<784x512xbf16, #tpu.memory_space<vmem>>, vector<784x512xbf16>
    %cst = arith.constant dense<0.000000e+00> : vector<8x512xf32>
    %2 = tpu.matmul %0, %1, %cst {dimension_numbers = #tpu.dot_dimension_numbers<[1], [0], [0], [1], [0, 0, 1, 1], [], []>} : vector<8x784xbf16>, vector<784x512xbf16>, vector<8x512xf32> -> vector<8x512xf32>
    %c0_3 = arith.constant 0 : index
    %c0_4 = arith.constant 0 : index
    %3 = vector.load %arg4[%c0_3, %c0_4] : memref<1x512xf32, #tpu.memory_space<vmem>>, vector<1x512xf32>
    %4 = vector.broadcast %3 : vector<1x512xf32> to vector<8x512xf32>
    %5 = arith.addf %2, %4 : vector<8x512xf32>
    %cst_5 = arith.constant 0.000000e+00 : f32
    %6 = vector.broadcast %cst_5 : f32 to vector<8x512xf32>
    %7 = arith.maximumf %5, %6 : vector<8x512xf32>
    %8 = arith.truncf %7 : vector<8x512xf32> to vector<8x512xbf16>
    %c0_6 = arith.constant 0 : index
    %c0_7 = arith.constant 0 : index
    %9 = vector.load %arg5[%c0_6, %c0_7] : memref<512x128xbf16, #tpu.memory_space<vmem>>, vector<512x128xbf16>
    %cst_8 = arith.constant dense<0.000000e+00> : vector<8x128xf32>
    %10 = tpu.matmul %8, %9, %cst_8 {dimension_numbers = #tpu.dot_dimension_numbers<[1], [0], [0], [1], [0, 0, 1, 1], [], []>} : vector<8x512xbf16>, vector<512x128xbf16>, vector<8x128xf32> -> vector<8x128xf32>
    %c0_9 = arith.constant 0 : index
    %c0_10 = arith.constant 0 : index
    %11 = vector.load %arg6[%c0_9, %c0_10] : memref<1x128xf32, #tpu.memory_space<vmem>>, vector<1x128xf32>
    %12 = vector.broadcast %11 : vector<1x128xf32> to vector<8x128xf32>
    %13 = arith.addf %10, %12 : vector<8x128xf32>
    %14 = vector.extract_strided_slice %13 {offsets = [0, 0], sizes = [8, 32], strides = [1, 1]} : vector<8x128xf32> to vector<8x32xf32>
    %15 = vector.extract_strided_slice %13 {offsets = [0, 32], sizes = [8, 32], strides = [1, 1]} : vector<8x128xf32> to vector<8x32xf32>
    %c0_11 = arith.constant 0 : index
    %c0_12 = arith.constant 0 : index
    %16 = vector.load %arg2[%c0_11, %c0_12] : memref<8x32xf32, #tpu.memory_space<vmem>>, vector<8x32xf32>
    %cst_13 = arith.constant 5.000000e-01 : f32
    %17 = vector.broadcast %cst_13 : f32 to vector<8x32xf32>
    %18 = arith.mulf %17, %15 : vector<8x32xf32>
    %19 = math.exp %18 : vector<8x32xf32>
    %20 = arith.mulf %16, %19 : vector<8x32xf32>
    %21 = arith.addf %14, %20 : vector<8x32xf32>
    %22 = arith.truncf %21 : vector<8x32xf32> to vector<8x32xbf16>
    %c0_14 = arith.constant 0 : index
    %c0_15 = arith.constant 0 : index
    %23 = vector.load %arg7[%c0_14, %c0_15] : memref<32x512xbf16, #tpu.memory_space<vmem>>, vector<32x512xbf16>
    %cst_16 = arith.constant dense<0.000000e+00> : vector<8x512xf32>
    %24 = tpu.matmul %22, %23, %cst_16 {dimension_numbers = #tpu.dot_dimension_numbers<[1], [0], [0], [1], [0, 0, 1, 1], [], []>} : vector<8x32xbf16>, vector<32x512xbf16>, vector<8x512xf32> -> vector<8x512xf32>
    %c0_17 = arith.constant 0 : index
    %c0_18 = arith.constant 0 : index
    %25 = vector.load %arg8[%c0_17, %c0_18] : memref<1x512xf32, #tpu.memory_space<vmem>>, vector<1x512xf32>
    %26 = vector.broadcast %25 : vector<1x512xf32> to vector<8x512xf32>
    %27 = arith.addf %24, %26 : vector<8x512xf32>
    %cst_19 = arith.constant 0.000000e+00 : f32
    %28 = vector.broadcast %cst_19 : f32 to vector<8x512xf32>
    %29 = arith.maximumf %27, %28 : vector<8x512xf32>
    %30 = arith.truncf %29 : vector<8x512xf32> to vector<8x512xbf16>
    %c0_20 = arith.constant 0 : index
    %c0_21 = arith.constant 0 : index
    %31 = vector.load %arg9[%c0_20, %c0_21] : memref<512x784xbf16, #tpu.memory_space<vmem>>, vector<512x784xbf16>
    %cst_22 = arith.constant dense<0.000000e+00> : vector<8x784xf32>
    %32 = tpu.matmul %30, %31, %cst_22 {dimension_numbers = #tpu.dot_dimension_numbers<[1], [0], [0], [1], [0, 0, 1, 1], [], []>} : vector<8x512xbf16>, vector<512x784xbf16>, vector<8x784xf32> -> vector<8x784xf32>
    %c0_23 = arith.constant 0 : index
    %c0_24 = arith.constant 0 : index
    %33 = vector.load %arg10[%c0_23, %c0_24] : memref<1x784xf32, #tpu.memory_space<vmem>>, vector<1x784xf32>
    %34 = vector.broadcast %33 : vector<1x784xf32> to vector<8x784xf32>
    %35 = arith.addf %32, %34 : vector<8x784xf32>
    %36 = arith.negf %35 : vector<8x784xf32>
    %37 = math.exp %36 : vector<8x784xf32>
    %cst_25 = arith.constant 1.000000e+00 : f32
    %38 = vector.broadcast %cst_25 : f32 to vector<8x784xf32>
    %39 = arith.addf %38, %37 : vector<8x784xf32>
    %40 = arith.divf %38, %39 : vector<8x784xf32>
    %41 = arith.truncf %40 : vector<8x784xf32> to vector<8x784xbf16>
    %c0_26 = arith.constant 0 : index
    %c0_27 = arith.constant 0 : index
    %42 = vector.load %arg11[%c0_26, %c0_27] : memref<8x784xbf16, #tpu.memory_space<vmem>>, vector<8x784xbf16>
    tpu.vector_store %arg11[%c0_26, %c0_27], %41 {strides = array<i32>} : memref<8x784xbf16, #tpu.memory_space<vmem>>, vector<8x784xbf16>,
    %c0_28 = arith.constant 0 : index
    %c0_29 = arith.constant 0 : index
    %43 = vector.load %arg12[%c0_28, %c0_29] : memref<8x128xf32, #tpu.memory_space<vmem>>, vector<8x128xf32>
    tpu.vector_store %arg12[%c0_28, %c0_29], %13 {strides = array<i32>} : memref<8x128xf32, #tpu.memory_space<vmem>>, vector<8x128xf32>,
    return
  }
  func.func @transform_0(%arg0: i32) -> (i32, i32) {
    %c0_i32 = arith.constant 0 : i32
    %c0_i32_0 = arith.constant 0 : i32
    return %arg0, %c0_i32 : i32, i32
  }
  func.func @transform_1(%arg0: i32) -> (i32, i32) {
    %c0_i32 = arith.constant 0 : i32
    %c0_i32_0 = arith.constant 0 : i32
    return %arg0, %c0_i32 : i32, i32
  }
  func.func @transform_2(%arg0: i32) -> (i32, i32) {
    %c0_i32 = arith.constant 0 : i32
    %c0_i32_0 = arith.constant 0 : i32
    %c0_i32_1 = arith.constant 0 : i32
    return %c0_i32, %c0_i32_0 : i32, i32
  }
  func.func @transform_3(%arg0: i32) -> (i32, i32) {
    %c0_i32 = arith.constant 0 : i32
    %c0_i32_0 = arith.constant 0 : i32
    %c0_i32_1 = arith.constant 0 : i32
    return %c0_i32, %c0_i32_0 : i32, i32
  }
  func.func @transform_4(%arg0: i32) -> (i32, i32) {
    %c0_i32 = arith.constant 0 : i32
    %c0_i32_0 = arith.constant 0 : i32
    %c0_i32_1 = arith.constant 0 : i32
    return %c0_i32, %c0_i32_0 : i32, i32
  }
  func.func @transform_5(%arg0: i32) -> (i32, i32) {
    %c0_i32 = arith.constant 0 : i32
    %c0_i32_0 = arith.constant 0 : i32
    %c0_i32_1 = arith.constant 0 : i32
    return %c0_i32, %c0_i32_0 : i32, i32
  }
  func.func @transform_6(%arg0: i32) -> (i32, i32) {
    %c0_i32 = arith.constant 0 : i32
    %c0_i32_0 = arith.constant 0 : i32
    %c0_i32_1 = arith.constant 0 : i32
    return %c0_i32, %c0_i32_0 : i32, i32
  }
  func.func @transform_7(%arg0: i32) -> (i32, i32) {
    %c0_i32 = arith.constant 0 : i32
    %c0_i32_0 = arith.constant 0 : i32
    %c0_i32_1 = arith.constant 0 : i32
    return %c0_i32, %c0_i32_0 : i32, i32
  }
  func.func @transform_8(%arg0: i32) -> (i32, i32) {
    %c0_i32 = arith.constant 0 : i32
    %c0_i32_0 = arith.constant 0 : i32
    %c0_i32_1 = arith.constant 0 : i32
    return %c0_i32, %c0_i32_0 : i32, i32
  }
  func.func @transform_9(%arg0: i32) -> (i32, i32) {
    %c0_i32 = arith.constant 0 : i32
    %c0_i32_0 = arith.constant 0 : i32
    %c0_i32_1 = arith.constant 0 : i32
    return %c0_i32, %c0_i32_0 : i32, i32
  }
  func.func @transform_10(%arg0: i32) -> (i32, i32) {
    %c0_i32 = arith.constant 0 : i32
    %c0_i32_0 = arith.constant 0 : i32
    return %arg0, %c0_i32 : i32, i32
  }
  func.func @transform_11(%arg0: i32) -> (i32, i32) {
    %c0_i32 = arith.constant 0 : i32
    %c0_i32_0 = arith.constant 0 : i32
    return %arg0, %c0_i32 : i32, i32
  }
}

</mosaic_0001>

<bundles_post_ra>
// kernel: tpu_custom_call.1
= control target key start
LH: loop header
LB: loop body
LE: loop exit
PB: predicated region body
PF: predicated region fallthrough
CT: control target
= control target key end

     0   :  { %17 = vsyncpa [#allocation3], 0  ;;  %vm1254_vm0 = vcmask 130048   ;;  %s9338_s0 = inlined_call_operand.vmem [shape: bf16[8,784], index: 0, kind: input, shape index: {}]   ;;  %s9339_s1 = inlined_call_operand.vmem [shape: f32[8,32], index: 1, kind: input, shape index: {}]   ;;  %s9340_s2 = inlined_call_operand.vmem [shape: bf16[784,512], index: 2, kind: input, shape index: {}]   ;;  %s9341_s3 = inlined_call_operand.vmem [shape: f32[1,512], index: 3, kind: input, shape index: {}]   ;;  %s9342_s4 = inlined_call_operand.vmem [shape: bf16[512,128], index: 4, kind: input, shape index: {}]   ;;  %s9343_s5 = inlined_call_operand.vmem [shape: f32[1,128], index: 5, kind: input, shape index: {}]   ;;  %s9344_s6 = inlined_call_operand.vmem [shape: bf16[32,512], index: 6, kind: input, shape index: {}]   ;;  %s9345_s7 = inlined_call_operand.vmem [shape: f32[1,512], index: 7, kind: input, shape index: {}]   ;;  %s9346_s8 = inlined_call_operand.vmem [shape: bf16[512,784], index: 8, kind: input, shape index: {}]   ;;  %s9347_s9 = inlined_call_operand.vmem [shape: f32[1,784], index: 9, kind: input, shape index: {}]   ;;  %s9348_s10 = inlined_call_operand.hbm [shape: bf16[8,784], index: 10, kind: output, shape index: {0}]   ;;  %s9349_s11 = inlined_call_operand.hbm [shape: f32[8,128], index: 11, kind: output, shape index: {1}]  }
   0x1   :  { %v4152_v0 = vld [vmem:[%s9340_s2 + $0xe0] sm:$0xf]  ;;  %v5923_v1 = vld [vmem:[%s9340_s2 + $0xec] sm:$0xf0] }
   0x2   :  { %v4280_v2 = vld [vmem:[%s9340_s2 + $0x1e0] sm:$0xf]  ;;  %v4153_v3 = vor.u32 %v5923_v1, %v4152_v0  ;;  %v5955_v4 = vld [vmem:[%s9340_s2 + $0x1ec] sm:$0xf0] }
   0x3   :  { %v4408_v5 = vld [vmem:[%s9340_s2 + $0x2e0] sm:$0xf]  ;;  %v5987_v6 = vld [vmem:[%s9340_s2 + $0x2ec] sm:$0xf0]  ;;  %v4281_v7 = vor.u32 %v5955_v4, %v4280_v2 }
   0x4   :  { %v4409_v8 = vor.u32 %v5987_v6, %v4408_v5  ;;  %v4536_v9 = vld [vmem:[%s9340_s2 + $0x3e0] sm:$0xf]  ;;  %v6019_v10 = vld [vmem:[%s9340_s2 + $0x3ec] sm:$0xf0]  ;;  %1258 = vmatpush.bf16.msra.mxu0 %v4153_v3 }
   0x5   :  { %v4136_v11 = vld [vmem:[%s9340_s2 + $0xc0] sm:$0xf]  ;;  %v4537_v12 = vor.u32 %v6019_v10, %v4536_v9  ;;  %v5919_v13 = vld [vmem:[%s9340_s2 + $0xcc] sm:$0xf0]  ;;  %1271 = vmatpush.bf16.msra.mxu1 %v4281_v7 }
   0x6   :  { %v4264_v14 = vld [vmem:[%s9340_s2 + $0x1c0] sm:$0xf]  ;;  %v5951_v15 = vld [vmem:[%s9340_s2 + $0x1cc] sm:$0xf0]  ;;  %1284 = vmatpush.bf16.msra.mxu2 %v4409_v8  ;;  %v4137_v16 = vor.u32 %v5919_v13, %v4136_v11 }
   0x7   :  { %v4265_v17 = vor.u32 %v5951_v15, %v4264_v14  ;;  %v4392_v18 = vld [vmem:[%s9340_s2 + $0x2c0] sm:$0xf]  ;;  %v5983_v19 = vld [vmem:[%s9340_s2 + $0x2cc] sm:$0xf0]  ;;  %1297 = vmatpush.bf16.msra.mxu3 %v4537_v12 }
   0x8   :  { %v4520_v20 = vld [vmem:[%s9340_s2 + $0x3c0] sm:$0xf]  ;;  %v4393_v21 = vor.u32 %v5983_v19, %v4392_v18  ;;  %v6015_v22 = vld [vmem:[%s9340_s2 + $0x3cc] sm:$0xf0]  ;;  %1259 = vmatpush.bf16.msra.mxu0 %v4137_v16 }
   0x9   :  { %v4120_v23 = vld [vmem:[%s9340_s2 + $0xa0] sm:$0xf]  ;;  %v5915_v24 = vld [vmem:[%s9340_s2 + $0xac] sm:$0xf0]  ;;  %v4521_v25 = vor.u32 %v6015_v22, %v4520_v20  ;;  %1272 = vmatpush.bf16.msra.mxu1 %v4265_v17 }
   0xa   :  { %v4248_v26 = vld [vmem:[%s9340_s2 + $0x1a0] sm:$0xf]  ;;  %v5947_v27 = vld [vmem:[%s9340_s2 + $0x1ac] sm:$0xf0]  ;;  %v4121_v29 = vor.u32 %v5915_v24, %v4120_v23  ;;  %1285 = vmatpush.bf16.msra.mxu2 %v4393_v21 }
   0xb   :  { %v4376_v28 = vld [vmem:[%s9340_s2 + $0x2a0] sm:$0xf]  ;;  %v5979_v30 = vld [vmem:[%s9340_s2 + $0x2ac] sm:$0xf0]  ;;  %v4249_v33 = vor.u32 %v5947_v27, %v4248_v26  ;;  %1298 = vmatpush.bf16.msra.mxu3 %v4521_v25  ;;  %v41_v25 = vld [vmem:[%s9338_s0 + $0x8] sm:$0xff] }
   0xc   :  { %v4504_v31 = vld [vmem:[%s9340_s2 + $0x3a0] sm:$0xf]  ;;  %v6011_v32 = vld [vmem:[%s9340_s2 + $0x3ac] sm:$0xf0]  ;;  %v4377_v34 = vor.u32 %v5979_v30, %v4376_v28  ;;  %1260 = vmatpush.bf16.msra.mxu0 %v4121_v29 }
   0xd   :  { %v4104_v35 = vld [vmem:[%s9340_s2 + $0x80] sm:$0xf]  ;;  %v5911_v36 = vld [vmem:[%s9340_s2 + $0x8c] sm:$0xf0]  ;;  %v4505_v38 = vor.u32 %v6011_v32, %v4504_v31  ;;  %1273 = vmatpush.bf16.msra.mxu1 %v4249_v33 }
   0xe   :  { %v4232_v37 = vld [vmem:[%s9340_s2 + $0x180] sm:$0xf]  ;;  %v5943_v39 = vld [vmem:[%s9340_s2 + $0x18c] sm:$0xf0]  ;;  %v4105_v44 = vor.u32 %v5911_v36, %v4104_v35  ;;  %1286 = vmatpush.bf16.msra.mxu2 %v4377_v34  ;;  %v5921_v34 = vld [vmem:[%s9340_s2 + $0xe4] sm:$0xf]  ;;  %v256_v36 = vunpack.c.l.b16 %v41_v25 }
   0xf   :  { %v4360_v40 = vld [vmem:[%s9340_s2 + $0x280] sm:$0xf]  ;;  %v5975_v41 = vld [vmem:[%s9340_s2 + $0x28c] sm:$0xf0]  ;;  %v4233_v45 = vor.u32 %v5943_v39, %v4232_v37  ;;  %1299 = vmatpush.bf16.msra.mxu3 %v4505_v38  ;;  %v4154_v35 = vld [vmem:[%s9340_s2 + $0xf0] sm:$0xf0] }
  0x10   :  { %v4488_v42 = vld [vmem:[%s9340_s2 + $0x380] sm:$0xf]  ;;  %v6007_v43 = vld [vmem:[%s9340_s2 + $0x38c] sm:$0xf0]  ;;  %v4361_v46 = vor.u32 %v5975_v41, %v4360_v40  ;;  %1261 = vmatpush.bf16.msra.mxu0 %v4105_v44 }
  0x11   :  { %v4088_v47 = vld [vmem:[%s9340_s2 + $0x60] sm:$0xf]  ;;  %v5907_v48 = vld [vmem:[%s9340_s2 + $0x6c] sm:$0xf0]  ;;  %v4489_v50 = vor.u32 %v6007_v43, %v4488_v42  ;;  %1274 = vmatpush.bf16.msra.mxu1 %v4233_v45  ;;  %v257_v42 = vunpack.c.h.b16 %v41_v25  ;;  %v5941_v25 = vld [vmem:[%s9340_s2 + $0x184] sm:$0xf] }
  0x12   :  { %v4216_v49 = vld [vmem:[%s9340_s2 + $0x160] sm:$0xf]  ;;  %v5939_v51 = vld [vmem:[%s9340_s2 + $0x16c] sm:$0xf0]  ;;  %v4089_v56 = vor.u32 %v5907_v48, %v4088_v47  ;;  %1287 = vmatpush.bf16.msra.mxu2 %v4361_v46  ;;  %v5953_v46 = vld [vmem:[%s9340_s2 + $0x1e4] sm:$0xf] }
  0x13   :  { %v4344_v52 = vld [vmem:[%s9340_s2 + $0x260] sm:$0xf]  ;;  %v5971_v53 = vld [vmem:[%s9340_s2 + $0x26c] sm:$0xf0]  ;;  %v4217_v57 = vor.u32 %v5939_v51, %v4216_v49  ;;  %1300 = vmatpush.bf16.msra.mxu3 %v4489_v50  ;;  %v4282_v47 = vld [vmem:[%s9340_s2 + $0x1f0] sm:$0xf0]  ;;  %v4157_v49 = vor.u32 %v5921_v34, %v4154_v35 }
  0x14   :  { %v4472_v54 = vld [vmem:[%s9340_s2 + $0x360] sm:$0xf]  ;;  %v6003_v55 = vld [vmem:[%s9340_s2 + $0x36c] sm:$0xf0]  ;;  %v4345_v58 = vor.u32 %v5971_v53, %v4344_v52  ;;  %1262 = vmatpush.bf16.msra.mxu0 %v4089_v56  ;;  %v6739_v53 = vpack.c.b16 %v256_v36, %v256_v36  ;;  %v4138_v56 = vld [vmem:[%s9340_s2 + $0xd0] sm:$0xf0] }
  0x15   :  { %v4072_v59 = vld [vmem:[%s9340_s2 + $0x40] sm:$0xf]  ;;  %v5903_v60 = vld [vmem:[%s9340_s2 + $0x4c] sm:$0xf0]  ;;  %v4473_v62 = vor.u32 %v6003_v55, %v4472_v54  ;;  %1275 = vmatpush.bf16.msra.mxu1 %v4217_v57  ;;  %v5917_v55 = vld [vmem:[%s9340_s2 + $0xc4] sm:$0xf] }
  0x16   :  { %v4200_v61 = vld [vmem:[%s9340_s2 + $0x140] sm:$0xf]  ;;  %v5935_v63 = vld [vmem:[%s9340_s2 + $0x14c] sm:$0xf0]  ;;  %v4073_v4 = vor.u32 %v5903_v60, %v4072_v59  ;;  %1288 = vmatpush.bf16.msra.mxu2 %v4345_v58  ;;  %v6752_v60 = vpack.c.b16 %v257_v42, %v257_v42  ;;  %v4090_v34 = vld [vmem:[%s9340_s2 + $0x70] sm:$0xf0] }
  0x17   :  { %v4328_v0 = vld [vmem:[%s9340_s2 + $0x240] sm:$0xf]  ;;  %v5967_v1 = vld [vmem:[%s9340_s2 + $0x24c] sm:$0xf0]  ;;  %v4201_v5 = vor.u32 %v5935_v63, %v4200_v61  ;;  %1301 = vmatpush.bf16.msra.mxu3 %v4473_v62  ;;  %v4285_v61 = vor.u32 %v5953_v46, %v4282_v47  ;;  %v5949_v63 = vld [vmem:[%s9340_s2 + $0x1c4] sm:$0xf] }
  0x18   :  { %v4456_v2 = vld [vmem:[%s9340_s2 + $0x340] sm:$0xf]  ;;  %v5999_v3 = vld [vmem:[%s9340_s2 + $0x34c] sm:$0xf0]  ;;  %v4329_v6 = vor.u32 %v5967_v1, %v4328_v0  ;;  %1263 = vmatpush.bf16.msra.mxu0 %v4073_v4  ;;  %v4266_v0 = vld [vmem:[%s9340_s2 + $0x1d0] sm:$0xf0] }
  0x19   :  { %v4056_v7 = vld [vmem:[%s9340_s2 + $0x20] sm:$0xf]  ;;  %v5899_v8 = vld [vmem:[%s9340_s2 + $0x2c] sm:$0xf0]  ;;  %v4457_v10 = vor.u32 %v5999_v3, %v4456_v2  ;;  %1276 = vmatpush.bf16.msra.mxu1 %v4201_v5  ;;  %v4141_v2 = vor.u32 %v5917_v55, %v4138_v56  ;;  %v5901_v46 = vld [vmem:[%s9340_s2 + $0x44] sm:$0xf] }
  0x1a   :  { %v4184_v9 = vld [vmem:[%s9340_s2 + $0x120] sm:$0xf]  ;;  %v5931_v11 = vld [vmem:[%s9340_s2 + $0x12c] sm:$0xf0]  ;;  %v4057_v17 = vor.u32 %v5899_v8, %v4056_v7  ;;  %1289 = vmatpush.bf16.msra.mxu2 %v4329_v6  ;;  %v5913_v7 = vld [vmem:[%s9340_s2 + $0xa4] sm:$0xf] }
  0x1b   :  { %v4312_v12 = vld [vmem:[%s9340_s2 + $0x220] sm:$0xf]  ;;  %v5963_v13 = vld [vmem:[%s9340_s2 + $0x22c] sm:$0xf0]  ;;  %v4185_v21 = vor.u32 %v5931_v11, %v4184_v9  ;;  %1302 = vmatpush.bf16.msra.mxu3 %v4457_v10  ;;  %v4122_v8 = vld [vmem:[%s9340_s2 + $0xb0] sm:$0xf0]  ;;  %v4269_v10 = vor.u32 %v5949_v63, %v4266_v0 }
  0x1c   :  { %v4440_v14 = vld [vmem:[%s9340_s2 + $0x320] sm:$0xf]  ;;  %v5995_v15 = vld [vmem:[%s9340_s2 + $0x32c] sm:$0xf0]  ;;  %v4313_v22 = vor.u32 %v5963_v13, %v4312_v12  ;;  %1264 = vmatpush.bf16.msra.mxu0 %v4057_v17  ;;  %v5945_v12 = vld [vmem:[%s9340_s2 + $0x1a4] sm:$0xf] }
  0x1d   :  { %v4040_v16 = vld [vmem:[%s9340_s2] sm:$0xf]  ;;  %v5895_v18 = vld [vmem:[%s9340_s2 + $0xc] sm:$0xf0]  ;;  %v4441_v26 = vor.u32 %v5995_v15, %v4440_v14  ;;  %1277 = vmatpush.bf16.msra.mxu1 %v4185_v21  ;;  %v4250_v13 = vld [vmem:[%s9340_s2 + $0x1b0] sm:$0xf0]  ;;  %v4125_v15 = vor.u32 %v5913_v7, %v4122_v8 }
  0x1e   :  { %v4168_v19 = vld [vmem:[%s9340_s2 + $0x100] sm:$0xf]  ;;  %v5927_v20 = vld [vmem:[%s9340_s2 + $0x10c] sm:$0xf0]  ;;  %v4041_v33 = vor.u32 %v5895_v18, %v4040_v16  ;;  %1290 = vmatpush.bf16.msra.mxu2 %v4313_v22  ;;  %v4106_v21 = vld [vmem:[%s9340_s2 + $0x90] sm:$0xf0] }
  0x1f   :  { %v4296_v23 = vld [vmem:[%s9340_s2 + $0x200] sm:$0xf]  ;;  %v5959_v24 = vld [vmem:[%s9340_s2 + $0x20c] sm:$0xf0]  ;;  %v4169_v38 = vor.u32 %v5927_v20, %v4168_v19  ;;  %1303 = vmatpush.bf16.msra.mxu3 %v4441_v26  ;;  %v5909_v20 = vld [vmem:[%s9340_s2 + $0x84] sm:$0xf] }
  0x20   :  { %v4424_v27 = vld [vmem:[%s9340_s2 + $0x300] sm:$0xf]  ;;  %v5991_v28 = vld [vmem:[%s9340_s2 + $0x30c] sm:$0xf0]  ;;  %v4297_v39 = vor.u32 %v5959_v24, %v4296_v23  ;;  %1265 = vmatpush.bf16.msra.mxu0 %v4041_v33  ;;  %v43_v22 = vld [vmem:[%s9338_s0 + $0x18] sm:$0xf]  ;;  %v4253_v23 = vor.u32 %v5945_v12, %v4250_v13 }
  0x21   :  { %v4664_v29 = vld [vmem:[%s9340_s2 + $0x4e0] sm:$0xf]  ;;  %v6051_v30 = vld [vmem:[%s9340_s2 + $0x4ec] sm:$0xf0]  ;;  %v4425_v43 = vor.u32 %v5991_v28, %v4424_v27  ;;  %1278 = vmatpush.bf16.msra.mxu1 %v4169_v38  ;;  %v4234_v26 = vld [vmem:[%s9340_s2 + $0x190] sm:$0xf0]  ;;  %v4109_v28 = vor.u32 %v5909_v20, %v4106_v21  ;;  %v260_v35 = vunpack.c.l.b16 %v43_v22 }
  0x22   :  { %v4792_v31 = vld [vmem:[%s9340_s2 + $0x5e0] sm:$0xf]  ;;  %v6083_v32 = vld [vmem:[%s9340_s2 + $0x5ec] sm:$0xf0]  ;;  %v4665_v44 = vor.u32 %v6051_v30, %v4664_v29  ;;  %1291 = vmatpush.bf16.msra.mxu2 %v4297_v39  ;;  %v5905_v33 = vld [vmem:[%s9340_s2 + $0x64] sm:$0xf]  ;;  %v4237_v36 = vor.u32 %v5941_v25, %v4234_v26 }
  0x23   :  { %v40_v37 = vld [vmem:[%s9338_s0] sm:$0xff]  ;;  %v6087_v45 = vld [vmem:[%s9340_s2 + $0x60c] sm:$0xf0]  ;;  %v4793_v48 = vor.u32 %v6083_v32, %v4792_v31  ;;  %1304 = vmatpush.bf16.msra.mxu3 %v4425_v43  ;;  %v4218_v39 = vld [vmem:[%s9340_s2 + $0x170] sm:$0xf0] }
  0x24   :  { %v4808_v40 = vld [vmem:[%s9340_s2 + $0x600] sm:$0xf]  ;;  %v254_v41 = vunpack.c.l.b16 %v40_v37  ;;  %v6047_v51 = vld [vmem:[%s9340_s2 + $0x4cc] sm:$0xf0]  ;;  %v255_v58 = vunpack.c.h.b16 %v40_v37  ;;  %1310 = vmatpush.bf16.msrb.mxu0 %v4665_v44  ;;  %v5937_v38 = vld [vmem:[%s9340_s2 + $0x164] sm:$0xf] }
  0x25   :  { %v4648_v50 = vld [vmem:[%s9340_s2 + $0x4c0] sm:$0xf]  ;;  %v6079_v54 = vld [vmem:[%s9340_s2 + $0x5cc] sm:$0xf0]  ;;  %v4809_v59 = vor.u32 %v6087_v45, %v4808_v40  ;;  %1323 = vmatpush.bf16.msrb.mxu1 %v4793_v48  ;;  %1292 = vmatmul.bf16.vlgmr.msra.gmra.mxu2 %v6739_v53  ;;  %v4074_v47 = vld [vmem:[%s9340_s2 + $0x50] sm:$0xf0]  ;;  %v6859_v48 = vpack.c.b16 %v260_v35, %v260_v35 }
  0x26   :  { %v4776_v52 = vld [vmem:[%s9340_s2 + $0x5c0] sm:$0xf]  ;;  %v6750_v57 = vpack.c.b16 %v254_v41, %v254_v41  ;;  %v4649_v62 = vor.u32 %v6047_v51, %v4648_v50  ;;  %v6043_v4 = vld [vmem:[%s9340_s2 + $0x4ac] sm:$0xf0]  ;;  %v6780_v9 = vpack.c.b16 %v255_v58, %v255_v58  ;;  %1305 = vmatmul.bf16.vlgmr.msra.gmra.mxu3 %v6752_v60  ;;  %v4093_v41 = vor.u32 %v5905_v33, %v4090_v34  ;;  %v5933_v51 = vld [vmem:[%s9340_s2 + $0x144] sm:$0xf] }
  0x27   :  { %1349 = vmatpush.bf16.msrb.mxu3 %v4157_v49  ;;  %v4777_v1 = vor.u32 %v6079_v54, %v4776_v52  ;;  %v4632_v3 = vld [vmem:[%s9340_s2 + $0x4a0] sm:$0xf]  ;;  %v6075_v6 = vld [vmem:[%s9340_s2 + $0x5ac] sm:$0xf0]  ;;  %1343 = vmatpush.bf16.msrb.mxu2 %v4809_v59  ;;  %v4221_v49 = vor.u32 %v5937_v38, %v4218_v39  ;;  %v4202_v52 = vld [vmem:[%s9340_s2 + $0x150] sm:$0xf0]  ;;  %v4077_v55 = vor.u32 %v5901_v46, %v4074_v47 }
  0x28   :  { %v4760_v5 = vld [vmem:[%s9340_s2 + $0x5a0] sm:$0xf]  ;;  %1266 = vmatmul.bf16.vlgmr.msra.gmra.mxu0 %v6750_v57  ;;  %v4633_v11 = vor.u32 %v6043_v4, %v4632_v3  ;;  %v6039_v17 = vld [vmem:[%s9340_s2 + $0x48c] sm:$0xf0]  ;;  %1279 = vmatmul.bf16.vlgmr.msra.gmra.mxu1 %v6780_v9  ;;  %v4058_v63 = vld [vmem:[%s9340_s2 + $0x30] sm:$0xf0] }
  0x29   :  { %1311 = vmatpush.bf16.msrb.mxu0 %v4649_v62  ;;  %1324 = vmatpush.bf16.msrb.mxu1 %v4777_v1  ;;  %v4761_v14 = vor.u32 %v6075_v6, %v4760_v5  ;;  %v4616_v16 = vld [vmem:[%s9340_s2 + $0x480] sm:$0xf]  ;;  %v6071_v19 = vld [vmem:[%s9340_s2 + $0x58c] sm:$0xf0]  ;;  %v5897_v62 = vld [vmem:[%s9340_s2 + $0x24] sm:$0xf]  ;;  %v4205_v1 = vor.u32 %v5933_v51, %v4202_v52 }
  0x2a   :  { %v4744_v18 = vld [vmem:[%s9340_s2 + $0x580] sm:$0xf]  ;;  %v4617_v24 = vor.u32 %v6039_v17, %v4616_v16  ;;  %v6035_v30 = vld [vmem:[%s9340_s2 + $0x46c] sm:$0xf0]  ;;  %v5929_v0 = vld [vmem:[%s9340_s2 + $0x124] sm:$0xf]  ;;  %v4061_v7 = vor.u32 %v5897_v62, %v4058_v63 }
  0x2b   :  { %1362 = vmatpush.bf16.msra.mxu2 %v4285_v61  ;;  %1350 = vmatpush.bf16.msrb.mxu3 %v4141_v2  ;;  %v4745_v27 = vor.u32 %v6071_v19, %v4744_v18  ;;  %v4600_v29 = vld [vmem:[%s9340_s2 + $0x460] sm:$0xf]  ;;  %v6067_v32 = vld [vmem:[%s9340_s2 + $0x56c] sm:$0xf0]  ;;  %v4186_v3 = vld [vmem:[%s9340_s2 + $0x130] sm:$0xf0] }
  0x2c   :  { %v4728_v31 = vld [vmem:[%s9340_s2 + $0x560] sm:$0xf]  ;;  %v4601_v37 = vor.u32 %v6035_v30, %v4600_v29  ;;  %v6031_v43 = vld [vmem:[%s9340_s2 + $0x44c] sm:$0xf0]  ;;  %v5893_v12 = vld [vmem:[%s9340_s2 + $0x4] sm:$0xf]  ;;  %v4189_v19 = vor.u32 %v5929_v0, %v4186_v3 }
  0x2d   :  { %1312 = vmatpush.bf16.msrb.mxu0 %v4633_v11  ;;  %1325 = vmatpush.bf16.msrb.mxu1 %v4761_v14  ;;  %v4729_v40 = vor.u32 %v6067_v32, %v4728_v31  ;;  %v4584_v42 = vld [vmem:[%s9340_s2 + $0x440] sm:$0xf]  ;;  %v6063_v45 = vld [vmem:[%s9340_s2 + $0x54c] sm:$0xf0]  ;;  %v4042_v13 = vld [vmem:[%s9340_s2 + $0x10] sm:$0xf0] }
  0x2e   :  { %v4712_v44 = vld [vmem:[%s9340_s2 + $0x540] sm:$0xf]  ;;  %v4585_v50 = vor.u32 %v6031_v43, %v4584_v42  ;;  %v6027_v58 = vld [vmem:[%s9340_s2 + $0x42c] sm:$0xf0]  ;;  %v5985_v14 = vld [vmem:[%s9340_s2 + $0x2e4] sm:$0xf]  ;;  %v4045_v25 = vor.u32 %v5893_v12, %v4042_v13 }
  0x2f   :  { %1363 = vmatpush.bf16.msra.mxu2 %v4269_v10  ;;  %1351 = vmatpush.bf16.msrb.mxu3 %v4125_v15  ;;  %v4713_v54 = vor.u32 %v6063_v45, %v4712_v44  ;;  %v4568_v56 = vld [vmem:[%s9340_s2 + $0x420] sm:$0xf]  ;;  %v6059_v61 = vld [vmem:[%s9340_s2 + $0x52c] sm:$0xf0]  ;;  %v4410_v15 = vld [vmem:[%s9340_s2 + $0x2f0] sm:$0xf0] }
  0x30   :  { %v4696_v59 = vld [vmem:[%s9340_s2 + $0x520] sm:$0xf]  ;;  %v4569_v2 = vor.u32 %v6027_v58, %v4568_v56  ;;  %v42_v5 = vld [vmem:[%s9338_s0 + $0x10] sm:$0xff]  ;;  %v6017_v16 = vld [vmem:[%s9340_s2 + $0x3e4] sm:$0xf] }
  0x31   :  { %1313 = vmatpush.bf16.msrb.mxu0 %v4617_v24  ;;  %1326 = vmatpush.bf16.msrb.mxu1 %v4745_v27  ;;  %v4552_v4 = vld [vmem:[%s9340_s2 + $0x400] sm:$0xf]  ;;  %v4697_v6 = vor.u32 %v6059_v61, %v4696_v59  ;;  %v6023_v8 = vld [vmem:[%s9340_s2 + $0x40c] sm:$0xf0]  ;;  %v4538_v17 = vld [vmem:[%s9340_s2 + $0x3f0] sm:$0xf0]  ;;  %v258_v18 = vunpack.c.l.b16 %v42_v5 }
  0x32   :  { %v4680_v10 = vld [vmem:[%s9340_s2 + $0x500] sm:$0xf]  ;;  %v6055_v11 = vld [vmem:[%s9340_s2 + $0x50c] sm:$0xf0]  ;;  %v4553_v20 = vor.u32 %v6023_v8, %v4552_v4  ;;  %v6049_v21 = vld [vmem:[%s9340_s2 + $0x4e4] sm:$0xf]  ;;  %v4541_v29 = vor.u32 %v6017_v16, %v4538_v17 }
  0x33   :  { %1364 = vmatpush.bf16.msra.mxu2 %v4253_v23  ;;  %1352 = vmatpush.bf16.msrb.mxu3 %v4109_v28  ;;  %v4666_v22 = vld [vmem:[%s9340_s2 + $0x4f0] sm:$0xf0]  ;;  %v259_v23 = vunpack.c.h.b16 %v42_v5  ;;  %v4681_v24 = vor.u32 %v6055_v11, %v4680_v10  ;;  %v5925_v26 = vld [vmem:[%s9340_s2 + $0x104] sm:$0xf]  ;;  %v4413_v28 = vor.u32 %v5985_v14, %v4410_v15  ;;  %v6947_v34 = vpack.c.b16 %v258_v18, %v258_v18 }
  0x34   :  { %v4170_v27 = vld [vmem:[%s9340_s2 + $0x110] sm:$0xf0]  ;;  %v6081_v30 = vld [vmem:[%s9340_s2 + $0x5e4] sm:$0xf]  ;;  %v4669_v33 = vor.u32 %v6049_v21, %v4666_v22 }
  0x35   :  { %1314 = vmatpush.bf16.msrb.mxu0 %v4601_v37  ;;  %1327 = vmatpush.bf16.msrb.mxu1 %v4729_v40  ;;  %v4794_v31 = vld [vmem:[%s9340_s2 + $0x5f0] sm:$0xf0]  ;;  %v5981_v32 = vld [vmem:[%s9340_s2 + $0x2c4] sm:$0xf]  ;;  %v4173_v38 = vor.u32 %v5925_v26, %v4170_v27  ;;  %v6958_v39 = vpack.c.b16 %v259_v23, %v259_v23 }
  0x36   :  { %4822 = vmatmul.msk.bf16.vlgmr.msrb.gmra.mxu2 %vm1254_vm0, %v6859_v48  ;;  %v4394_v35 = vld [vmem:[%s9340_s2 + $0x2d0] sm:$0xf0]  ;;  %v6045_v40 = vld [vmem:[%s9340_s2 + $0x4c4] sm:$0xf]  ;;  %v4797_v42 = vor.u32 %v6081_v30, %v4794_v31 }
  0x37   :  { %1365 = vmatpush.bf16.msra.mxu2 %v4237_v36  ;;  %1353 = vmatpush.bf16.msrb.mxu3 %v4093_v41  ;;  %v6013_v36 = vld [vmem:[%s9340_s2 + $0x3c4] sm:$0xf]  ;;  %v4522_v37 = vld [vmem:[%s9340_s2 + $0x3d0] sm:$0xf0]  ;;  %v4397_v43 = vor.u32 %v5981_v32, %v4394_v35 }
  0x38   :  { %v4650_v41 = vld [vmem:[%s9340_s2 + $0x4d0] sm:$0xf0]  ;;  %v4525_v44 = vor.u32 %v6013_v36, %v4522_v37  ;;  %v6077_v45 = vld [vmem:[%s9340_s2 + $0x5c4] sm:$0xf] }
  0x39   :  { %1315 = vmatpush.bf16.msrb.mxu0 %v4585_v50  ;;  %1328 = vmatpush.bf16.msrb.mxu1 %v4713_v54  ;;  %v4778_v46 = vld [vmem:[%s9340_s2 + $0x5d0] sm:$0xf0]  ;;  %v5977_v47 = vld [vmem:[%s9340_s2 + $0x2a4] sm:$0xf] }
  0x3a   :  { %v4378_v50 = vld [vmem:[%s9340_s2 + $0x2b0] sm:$0xf0]  ;;  %v6009_v51 = vld [vmem:[%s9340_s2 + $0x3a4] sm:$0xf]  ;;  %v4781_v56 = vor.u32 %v6077_v45, %v4778_v46 }
  0x3b   :  { %1366 = vmatpush.bf16.msra.mxu2 %v4221_v49  ;;  %1354 = vmatpush.bf16.msrb.mxu3 %v4077_v55  ;;  %v4653_v49 = vor.u32 %v6045_v40, %v4650_v41  ;;  %v4506_v52 = vld [vmem:[%s9340_s2 + $0x3b0] sm:$0xf0]  ;;  %v6041_v54 = vld [vmem:[%s9340_s2 + $0x4a4] sm:$0xf]  ;;  %v4381_v58 = vor.u32 %v5977_v47, %v4378_v50 }
  0x3c   :  { %v4634_v55 = vld [vmem:[%s9340_s2 + $0x4b0] sm:$0xf0]  ;;  %v4509_v59 = vor.u32 %v6009_v51, %v4506_v52  ;;  %v6073_v61 = vld [vmem:[%s9340_s2 + $0x5a4] sm:$0xf] }
  0x3d   :  { %1316 = vmatpush.bf16.msrb.mxu0 %v4569_v2  ;;  %1329 = vmatpush.bf16.msrb.mxu1 %v4697_v6  ;;  %v4762_v62 = vld [vmem:[%s9340_s2 + $0x5b0] sm:$0xf0]  ;;  %v5973_v63 = vld [vmem:[%s9340_s2 + $0x284] sm:$0xf]  ;;  %v4637_v0 = vor.u32 %v6041_v54, %v4634_v55 }
  0x3e   :  { %v6005_v2 = vld [vmem:[%s9340_s2 + $0x384] sm:$0xf]  ;;  %v4490_v3 = vld [vmem:[%s9340_s2 + $0x390] sm:$0xf0]  ;;  %v4765_v6 = vor.u32 %v6073_v61, %v4762_v62 }
  0x3f   :  { %1367 = vmatpush.bf16.msra.mxu2 %v4205_v1  ;;  %1355 = vmatpush.bf16.msrb.mxu3 %v4061_v7  ;;  %v4362_v1 = vld [vmem:[%s9340_s2 + $0x290] sm:$0xf0]  ;;  %v6037_v4 = vld [vmem:[%s9340_s2 + $0x484] sm:$0xf]  ;;  %v4493_v8 = vor.u32 %v6005_v2, %v4490_v3 }
  0x40   :  { %v4618_v5 = vld [vmem:[%s9340_s2 + $0x490] sm:$0xf0]  ;;  %v4365_v7 = vor.u32 %v5973_v63, %v4362_v1  ;;  %v6069_v10 = vld [vmem:[%s9340_s2 + $0x584] sm:$0xf] }
  0x41   :  { %1317 = vmatpush.bf16.msrb.mxu0 %v4553_v20  ;;  %1330 = vmatpush.bf16.msrb.mxu1 %v4681_v24  ;;  %v4746_v11 = vld [vmem:[%s9340_s2 + $0x590] sm:$0xf0]  ;;  %v5969_v12 = vld [vmem:[%s9340_s2 + $0x264] sm:$0xf]  ;;  %v4621_v13 = vor.u32 %v6037_v4, %v4618_v5 }
  0x42   :  { %v4346_v14 = vld [vmem:[%s9340_s2 + $0x270] sm:$0xf0]  ;;  %v6001_v15 = vld [vmem:[%s9340_s2 + $0x364] sm:$0xf] }
  0x43   :  { %1368 = vmatpush.bf16.msra.mxu2 %v4189_v19  ;;  %1356 = vmatpush.bf16.msrb.mxu3 %v4045_v25  ;;  %v4474_v16 = vld [vmem:[%s9340_s2 + $0x370] sm:$0xf0]  ;;  %v6033_v17 = vld [vmem:[%s9340_s2 + $0x464] sm:$0xf]  ;;  %v4749_v19 = vor.u32 %v6069_v10, %v4746_v11  ;;  %v4349_v20 = vor.u32 %v5969_v12, %v4346_v14 }
  0x44   :  { %1318 = vmatmul.bf16.vlgmr.msrb.gmra.mxu0 %v6947_v34  ;;  %1331 = vmatmul.bf16.vlgmr.msrb.gmra.mxu1 %v6958_v39  ;;  %v4602_v18 = vld [vmem:[%s9340_s2 + $0x470] sm:$0xf0]  ;;  %v4477_v21 = vor.u32 %v6001_v15, %v4474_v16  ;;  %v6065_v22 = vld [vmem:[%s9340_s2 + $0x564] sm:$0xf] }
  0x45   :  { %1375 = vmatpush.bf16.msra.mxu0 %v4413_v28  ;;  %1388 = vmatpush.bf16.msra.mxu1 %v4541_v29  ;;  %v4730_v23 = vld [vmem:[%s9340_s2 + $0x570] sm:$0xf0]  ;;  %v5965_v24 = vld [vmem:[%s9340_s2 + $0x244] sm:$0xf]  ;;  %v4605_v25 = vor.u32 %v6033_v17, %v4602_v18 }
  0x46   :  { %1357 = vmatmul.bf16.vlgmr.msrb.gmra.mxu3 %v6750_v57  ;;  %v4330_v26 = vld [vmem:[%s9340_s2 + $0x250] sm:$0xf0]  ;;  %v5997_v27 = vld [vmem:[%s9340_s2 + $0x344] sm:$0xf]  ;;  %v4733_v31 = vor.u32 %v6065_v22, %v4730_v23 }
  0x47   :  { %1401 = vmatpush.bf16.msra.mxu3 %v4669_v33  ;;  %1369 = vmatpush.bf16.msra.mxu2 %v4173_v38  ;;  %v4458_v28 = vld [vmem:[%s9340_s2 + $0x350] sm:$0xf0]  ;;  %v6029_v29 = vld [vmem:[%s9340_s2 + $0x444] sm:$0xf]  ;;  %v4333_v32 = vor.u32 %v5965_v24, %v4330_v26 }
  0x48   :  { %v4586_v30 = vld [vmem:[%s9340_s2 + $0x450] sm:$0xf0]  ;;  %v4461_v33 = vor.u32 %v5997_v27, %v4458_v28  ;;  %v6061_v35 = vld [vmem:[%s9340_s2 + $0x544] sm:$0xf] }
  0x49   :  { %1376 = vmatpush.bf16.msra.mxu0 %v4397_v43  ;;  %1389 = vmatpush.bf16.msra.mxu1 %v4525_v44  ;;  %v4714_v36 = vld [vmem:[%s9340_s2 + $0x550] sm:$0xf0]  ;;  %v5961_v37 = vld [vmem:[%s9340_s2 + $0x224] sm:$0xf]  ;;  %v4589_v38 = vor.u32 %v6029_v29, %v4586_v30 }
  0x4a   :  { %1370 = vmatmul.bf16.vlgmr.msra.gmra.mxu2 %v6780_v9  ;;  %v4314_v40 = vld [vmem:[%s9340_s2 + $0x230] sm:$0xf0]  ;;  %v5993_v41 = vld [vmem:[%s9340_s2 + $0x324] sm:$0xf]  ;;  %v4717_v46 = vor.u32 %v6061_v35, %v4714_v36 }
  0x4b   :  { %1414 = vmatpush.bf16.msrb.mxu2 %v4797_v42  ;;  %1402 = vmatpush.bf16.msra.mxu3 %v4653_v49  ;;  %v4442_v42 = vld [vmem:[%s9340_s2 + $0x330] sm:$0xf0]  ;;  %v6025_v43 = vld [vmem:[%s9340_s2 + $0x424] sm:$0xf]  ;;  %v4317_v51 = vor.u32 %v5961_v37, %v4314_v40 }
  0x4c   :  { %v4570_v44 = vld [vmem:[%s9340_s2 + $0x430] sm:$0xf0]  ;;  %v6057_v45 = vld [vmem:[%s9340_s2 + $0x524] sm:$0xf]  ;;  %v4445_v52 = vor.u32 %v5993_v41, %v4442_v42 }
  0x4d   :  { %1377 = vmatpush.bf16.msra.mxu0 %v4381_v58  ;;  %1390 = vmatpush.bf16.msra.mxu1 %v4509_v59  ;;  %v4698_v47 = vld [vmem:[%s9340_s2 + $0x530] sm:$0xf0]  ;;  %v5957_v49 = vld [vmem:[%s9340_s2 + $0x204] sm:$0xf]  ;;  %v4573_v58 = vor.u32 %v6025_v43, %v4570_v44 }
  0x4e   :  { %v4298_v50 = vld [vmem:[%s9340_s2 + $0x210] sm:$0xf0]  ;;  %v5989_v54 = vld [vmem:[%s9340_s2 + $0x304] sm:$0xf] }
  0x4f   :  { %1415 = vmatpush.bf16.msrb.mxu2 %v4781_v56  ;;  %1403 = vmatpush.bf16.msra.mxu3 %v4637_v0  ;;  %v4426_v55 = vld [vmem:[%s9340_s2 + $0x310] sm:$0xf0]  ;;  %v6021_v56 = vld [vmem:[%s9340_s2 + $0x404] sm:$0xf] }
  0x50   :  { %v4554_v59 = vld [vmem:[%s9340_s2 + $0x410] sm:$0xf0] }
  0x51   :  { %1378 = vmatpush.bf16.msra.mxu0 %v4365_v7  ;;  %1391 = vmatpush.bf16.msra.mxu1 %v4493_v8 }
  0x53   :  { %1416 = vmatpush.bf16.msrb.mxu2 %v4765_v6  ;;  %1404 = vmatpush.bf16.msra.mxu3 %v4621_v13 }
  0x55   :  { %1379 = vmatpush.bf16.msra.mxu0 %v4349_v20  ;;  %1392 = vmatpush.bf16.msra.mxu1 %v4477_v21 }
  0x57   :  { %1417 = vmatpush.bf16.msrb.mxu2 %v4749_v19  ;;  %1405 = vmatpush.bf16.msra.mxu3 %v4605_v25 }
  0x59   :  { %1380 = vmatpush.bf16.msra.mxu0 %v4333_v32  ;;  %1393 = vmatpush.bf16.msra.mxu1 %v4461_v33 }
  0x5b   :  { %1418 = vmatpush.bf16.msrb.mxu2 %v4733_v31  ;;  %1406 = vmatpush.bf16.msra.mxu3 %v4589_v38 }
  0x5c   :  { %18 = vsyncpa [#allocation5], 0  ;;  %v4160_v61 = vld [vmem:[%s9340_s2 + $0xe8] sm:$0xf]  ;;  %v5924_v62 = vld [vmem:[%s9340_s2 + $0xf4] sm:$0xf0]  ;;  %v4701_v0 = vor.u32 %v6057_v45, %v4698_v47  ;;  %v4301_v4 = vor.u32 %v5957_v49, %v4298_v50  ;;  %v4429_v5 = vor.u32 %v5989_v54, %v4426_v55  ;;  %v4557_v10 = vor.u32 %v6021_v56, %v4554_v59 }
  0x5d   :  { %v4288_v63 = vld [vmem:[%s9340_s2 + $0x1e8] sm:$0xf]  ;;  %v5956_v1 = vld [vmem:[%s9340_s2 + $0x1f4] sm:$0xf0]  ;;  %v6085_v2 = vld [vmem:[%s9340_s2 + $0x604] sm:$0xf]  ;;  %1381 = vmatpush.bf16.msra.mxu0 %v4317_v51  ;;  %1394 = vmatpush.bf16.msra.mxu1 %v4445_v52  ;;  %v4161_v11 = vor.u32 %v5924_v62, %v4160_v61 }
  0x5e   :  { %v4810_v3 = vld [vmem:[%s9340_s2 + $0x610] sm:$0xf0]  ;;  %v6053_v6 = vld [vmem:[%s9340_s2 + $0x504] sm:$0xf]  ;;  %v4416_v8 = vld [vmem:[%s9340_s2 + $0x2e8] sm:$0xf]  ;;  %v4289_v15 = vor.u32 %v5956_v1, %v4288_v63 }
  0x5f   :  { %1419 = vmatpush.bf16.msrb.mxu2 %v4717_v46  ;;  %v4682_v7 = vld [vmem:[%s9340_s2 + $0x510] sm:$0xf0]  ;;  %1407 = vmatpush.bf16.msra.mxu3 %v4573_v58  ;;  %v5988_v12 = vld [vmem:[%s9340_s2 + $0x2f4] sm:$0xf0]  ;;  %v4544_v13 = vld [vmem:[%s9340_s2 + $0x3e8] sm:$0xf]  ;;  %v4813_v16 = vor.u32 %v6085_v2, %v4810_v3 }
  0x60   :  { %v6020_v14 = vld [vmem:[%s9340_s2 + $0x3f4] sm:$0xf0]  ;;  %v4144_v17 = vld [vmem:[%s9340_s2 + $0xc8] sm:$0xf]  ;;  %v4685_v19 = vor.u32 %v6053_v6, %v4682_v7  ;;  %v4417_v22 = vor.u32 %v5988_v12, %v4416_v8  ;;  %s6439_s22 = smov 96   ;;  %vm2011_vm1 = vcmask 261120  }
  0x61   :  { %v5920_v18 = vld [vmem:[%s9340_s2 + $0xd4] sm:$0xf0]  ;;  %v4272_v20 = vld [vmem:[%s9340_s2 + $0x1c8] sm:$0xf]  ;;  %1382 = vmatpush.bf16.msra.mxu0 %v4301_v4  ;;  %1395 = vmatpush.bf16.msra.mxu1 %v4429_v5  ;;  %v4545_v23 = vor.u32 %v6020_v14, %v4544_v13  ;;  %s4024_s25 = sshll.u32 %s9349_s11, 4  ;;  %s6441_s11 = smov [#allocation2]   ;;  %s4025_s25 = int_to_ptr.hbm [resolvable:$true] %s4024_s25 }
  0x62   :  { %v5952_v21 = vld [vmem:[%s9340_s2 + $0x1d4] sm:$0xf0]  ;;  %v4400_v24 = vld [vmem:[%s9340_s2 + $0x2c8] sm:$0xf]  ;;  %v4145_v25 = vor.u32 %v5920_v18, %v4144_v17  ;;  %s4011_s26 = sshll.u32 %s6441_s11, 4  ;;  %s4012_s26 = int_to_ptr.vmem [resolvable:$true] %s4011_s26 }
  0x63   :  { %1420 = vmatpush.bf16.msrb.mxu2 %v4701_v0  ;;  %1408 = vmatpush.bf16.msra.mxu3 %v4557_v10  ;;  %v5984_v26 = vld [vmem:[%s9340_s2 + $0x2d4] sm:$0xf0]  ;;  %v4528_v27 = vld [vmem:[%s9340_s2 + $0x3c8] sm:$0xf]  ;;  %v4273_v29 = vor.u32 %v5952_v21, %v4272_v20 }
  0x64   :  { %v6016_v28 = vld [vmem:[%s9340_s2 + $0x3d4] sm:$0xf0]  ;;  %v4128_v30 = vld [vmem:[%s9340_s2 + $0xa8] sm:$0xf]  ;;  %1383 = vmatmul.bf16.vlgmr.msra.gmra.mxu0 %v6739_v53  ;;  %v4401_v35 = vor.u32 %v5984_v26, %v4400_v24  ;;  %1396 = vmatmul.bf16.vlgmr.msra.gmra.mxu1 %v6752_v60 }
  0x65   :  { %1440 = vmatpush.bf16.msrb.mxu1 %v4161_v11  ;;  %1434 = vmatpush.bf16.msrb.mxu0 %v4813_v16  ;;  %v5916_v31 = vld [vmem:[%s9340_s2 + $0xb4] sm:$0xf0]  ;;  %v4256_v32 = vld [vmem:[%s9340_s2 + $0x1a8] sm:$0xf]  ;;  %v4529_v36 = vor.u32 %v6016_v28, %v4528_v27 }
  0x66   :  { %v5948_v33 = vld [vmem:[%s9340_s2 + $0x1b4] sm:$0xf0]  ;;  %v4384_v37 = vld [vmem:[%s9340_s2 + $0x2a8] sm:$0xf]  ;;  %1409 = vmatmul.bf16.vlgmr.msra.gmra.mxu3 %v6947_v34  ;;  %v4129_v38 = vor.u32 %v5916_v31, %v4128_v30 }
  0x67   :  { %1453 = vmatpush.bf16.msrb.mxu3 %v4289_v15  ;;  %1421 = vmatpush.bf16.msrb.mxu2 %v4685_v19  ;;  %v5980_v40 = vld [vmem:[%s9340_s2 + $0x2b4] sm:$0xf0]  ;;  %v4512_v41 = vld [vmem:[%s9340_s2 + $0x3a8] sm:$0xf]  ;;  %v4257_v43 = vor.u32 %v5948_v33, %v4256_v32 }
  0x68   :  { %v6012_v42 = vld [vmem:[%s9340_s2 + $0x3b4] sm:$0xf0]  ;;  %v4112_v44 = vld [vmem:[%s9340_s2 + $0x88] sm:$0xf]  ;;  %v4385_v49 = vor.u32 %v5980_v40, %v4384_v37 }
  0x69   :  { %1466 = vmatpush.bf16.msra.mxu0 %v4417_v22  ;;  %1441 = vmatpush.bf16.msrb.mxu1 %v4145_v25  ;;  %v5912_v45 = vld [vmem:[%s9340_s2 + $0x94] sm:$0xf0]  ;;  %v4240_v46 = vld [vmem:[%s9340_s2 + $0x188] sm:$0xf]  ;;  %v4513_v50 = vor.u32 %v6012_v42, %v4512_v41 }
  0x6a   :  { %1422 = vmatmul.bf16.vlgmr.msrb.gmra.mxu2 %v6958_v39  ;;  %v5944_v47 = vld [vmem:[%s9340_s2 + $0x194] sm:$0xf0]  ;;  %v4368_v51 = vld [vmem:[%s9340_s2 + $0x288] sm:$0xf]  ;;  %v4113_v52 = vor.u32 %v5912_v45, %v4112_v44 }
  0x6b   :  { %1479 = vmatpush.bf16.msra.mxu2 %v4545_v23  ;;  %1454 = vmatpush.bf16.msrb.mxu3 %v4273_v29  ;;  %v5976_v54 = vld [vmem:[%s9340_s2 + $0x294] sm:$0xf0]  ;;  %v4496_v55 = vld [vmem:[%s9340_s2 + $0x388] sm:$0xf]  ;;  %v4241_v58 = vor.u32 %v5944_v47, %v4240_v46 }
  0x6c   :  { %v6008_v56 = vld [vmem:[%s9340_s2 + $0x394] sm:$0xf0]  ;;  %v4096_v59 = vld [vmem:[%s9340_s2 + $0x68] sm:$0xf]  ;;  %v4369_v0 = vor.u32 %v5976_v54, %v4368_v51  ;;  %v5922_v51 = vld [vmem:[%s9340_s2 + $0xec] sm:$0xf] }
  0x6d   :  { %1467 = vmatpush.bf16.msra.mxu0 %v4401_v35  ;;  %1442 = vmatpush.bf16.msrb.mxu1 %v4129_v38  ;;  %v5908_v61 = vld [vmem:[%s9340_s2 + $0x74] sm:$0xf0]  ;;  %v4224_v62 = vld [vmem:[%s9340_s2 + $0x168] sm:$0xf]  ;;  %v4497_v1 = vor.u32 %v6008_v56, %v4496_v55  ;;  %v4162_v55 = vld [vmem:[%s9340_s2 + $0xf8] sm:$0xf0] }
  0x6e   :  { %v5940_v63 = vld [vmem:[%s9340_s2 + $0x174] sm:$0xf0]  ;;  %v4352_v2 = vld [vmem:[%s9340_s2 + $0x268] sm:$0xf]  ;;  %v4097_v3 = vor.u32 %v5908_v61, %v4096_v59 }
  0x6f   :  { %1480 = vmatpush.bf16.msra.mxu2 %v4529_v36  ;;  %1455 = vmatpush.bf16.msrb.mxu3 %v4257_v43  ;;  %v5972_v4 = vld [vmem:[%s9340_s2 + $0x274] sm:$0xf0]  ;;  %v4480_v5 = vld [vmem:[%s9340_s2 + $0x368] sm:$0xf]  ;;  %v4225_v7 = vor.u32 %v5940_v63, %v4224_v62 }
  0x70   :  { %v6004_v6 = vld [vmem:[%s9340_s2 + $0x374] sm:$0xf0]  ;;  %v4080_v8 = vld [vmem:[%s9340_s2 + $0x48] sm:$0xf]  ;;  %v4353_v13 = vor.u32 %v5972_v4, %v4352_v2 }
  0x71   :  { %1468 = vmatpush.bf16.msra.mxu0 %v4385_v49  ;;  %1443 = vmatpush.bf16.msrb.mxu1 %v4113_v52  ;;  %v5904_v10 = vld [vmem:[%s9340_s2 + $0x54] sm:$0xf0]  ;;  %v4208_v11 = vld [vmem:[%s9340_s2 + $0x148] sm:$0xf]  ;;  %v4481_v14 = vor.u32 %v6004_v6, %v4480_v5  ;;  %v5954_v5 = vld [vmem:[%s9340_s2 + $0x1ec] sm:$0xf] }
  0x72   :  { %v5936_v12 = vld [vmem:[%s9340_s2 + $0x154] sm:$0xf0]  ;;  %v4336_v15 = vld [vmem:[%s9340_s2 + $0x248] sm:$0xf]  ;;  %v4081_v16 = vor.u32 %v5904_v10, %v4080_v8  ;;  %v4290_v6 = vld [vmem:[%s9340_s2 + $0x1f8] sm:$0xf0] }
  0x73   :  { %1481 = vmatpush.bf16.msra.mxu2 %v4513_v50  ;;  %1456 = vmatpush.bf16.msrb.mxu3 %v4241_v58  ;;  %v5968_v17 = vld [vmem:[%s9340_s2 + $0x254] sm:$0xf0]  ;;  %v4464_v18 = vld [vmem:[%s9340_s2 + $0x348] sm:$0xf]  ;;  %v4209_v20 = vor.u32 %v5936_v12, %v4208_v11  ;;  %v5918_v8 = vld [vmem:[%s9340_s2 + $0xcc] sm:$0xf] }
  0x74   :  { %v6000_v19 = vld [vmem:[%s9340_s2 + $0x354] sm:$0xf0]  ;;  %v4064_v21 = vld [vmem:[%s9340_s2 + $0x28] sm:$0xf]  ;;  %4823 = vmatmul.msk.bf16.vlgmr.msrb.gmra.mxu0 %vm1254_vm0, %v6859_v48  ;;  %v4337_v25 = vor.u32 %v5968_v17, %v4336_v15  ;;  %v4146_v10 = vld [vmem:[%s9340_s2 + $0xd8] sm:$0xf0] }
  0x75   :  { %1469 = vmatpush.bf16.msra.mxu0 %v4369_v0  ;;  %1444 = vmatpush.bf16.msrb.mxu1 %v4097_v3  ;;  %v5900_v22 = vld [vmem:[%s9340_s2 + $0x34] sm:$0xf0]  ;;  %v4192_v23 = vld [vmem:[%s9340_s2 + $0x128] sm:$0xf]  ;;  %v4465_v26 = vor.u32 %v6000_v19, %v4464_v18  ;;  %v4165_v3 = vor.u32 %v5922_v51, %v4162_v55  ;;  %v4149_v17 = vor.u32 %v5918_v8, %v4146_v10  ;;  %v5950_v18 = vld [vmem:[%s9340_s2 + $0x1cc] sm:$0xf] }
  0x76   :  { %v5932_v24 = vld [vmem:[%s9340_s2 + $0x134] sm:$0xf0]  ;;  %v4320_v27 = vld [vmem:[%s9340_s2 + $0x228] sm:$0xf]  ;;  %v4065_v29 = vor.u32 %v5900_v22, %v4064_v21  ;;  %v4274_v19 = vld [vmem:[%s9340_s2 + $0x1d8] sm:$0xf0] }
  0x77   :  { %1482 = vmatpush.bf16.msra.mxu2 %v4497_v1  ;;  %1457 = vmatpush.bf16.msrb.mxu3 %v4225_v7  ;;  %v5964_v28 = vld [vmem:[%s9340_s2 + $0x234] sm:$0xf0]  ;;  %v4448_v30 = vld [vmem:[%s9340_s2 + $0x328] sm:$0xf]  ;;  %v4193_v33 = vor.u32 %v5932_v24, %v4192_v23  ;;  %v5914_v21 = vld [vmem:[%s9340_s2 + $0xac] sm:$0xf] }
  0x78   :  { %v5996_v31 = vld [vmem:[%s9340_s2 + $0x334] sm:$0xf0]  ;;  %v4048_v32 = vld [vmem:[%s9340_s2 + $0x8] sm:$0xf]  ;;  %v4321_v42 = vor.u32 %v5964_v28, %v4320_v27  ;;  %v4130_v22 = vld [vmem:[%s9340_s2 + $0xb8] sm:$0xf0] }
  0x79   :  { %1470 = vmatpush.bf16.msra.mxu0 %v4353_v13  ;;  %1445 = vmatpush.bf16.msrb.mxu1 %v4081_v16  ;;  %v5896_v35 = vld [vmem:[%s9340_s2 + $0x14] sm:$0xf0]  ;;  %v4176_v36 = vld [vmem:[%s9340_s2 + $0x108] sm:$0xf]  ;;  %v4449_v43 = vor.u32 %v5996_v31, %v4448_v30  ;;  %v5946_v30 = vld [vmem:[%s9340_s2 + $0x1ac] sm:$0xf] }
  0x7a   :  { %v5928_v37 = vld [vmem:[%s9340_s2 + $0x114] sm:$0xf0]  ;;  %v4672_v38 = vld [vmem:[%s9340_s2 + $0x4e8] sm:$0xf]  ;;  %v4049_v47 = vor.u32 %v5896_v35, %v4048_v32  ;;  %v4258_v31 = vld [vmem:[%s9340_s2 + $0x1b8] sm:$0xf0] }
  0x7b   :  { %1483 = vmatpush.bf16.msra.mxu2 %v4481_v14  ;;  %1458 = vmatpush.bf16.msrb.mxu3 %v4209_v20  ;;  %v6052_v40 = vld [vmem:[%s9340_s2 + $0x4f4] sm:$0xf0]  ;;  %v4800_v41 = vld [vmem:[%s9340_s2 + $0x5e8] sm:$0xf]  ;;  %v4177_v52 = vor.u32 %v5928_v37, %v4176_v36  ;;  %v4293_v14 = vor.u32 %v5954_v5, %v4290_v6  ;;  %v4114_v35 = vld [vmem:[%s9340_s2 + $0x98] sm:$0xf0] }
  0x7c   :  { %v6084_v44 = vld [vmem:[%s9340_s2 + $0x5f4] sm:$0xf0]  ;;  %v4304_v45 = vld [vmem:[%s9340_s2 + $0x208] sm:$0xf]  ;;  %v4673_v54 = vor.u32 %v6052_v40, %v4672_v38  ;;  %v4261_v40 = vor.u32 %v5946_v30, %v4258_v31  ;;  %v5934_v8 = vld [vmem:[%s9340_s2 + $0x14c] sm:$0xf] }
  0x7d   :  { %1471 = vmatpush.bf16.msra.mxu0 %v4337_v25  ;;  %v5960_v46 = vld [vmem:[%s9340_s2 + $0x214] sm:$0xf0]  ;;  %1446 = vmatpush.bf16.msrb.mxu1 %v4065_v29  ;;  %v4432_v49 = vld [vmem:[%s9340_s2 + $0x308] sm:$0xf]  ;;  %v4801_v59 = vor.u32 %v6084_v44, %v4800_v41  ;;  %v4133_v29 = vor.u32 %v5914_v21, %v4130_v22  ;;  %v5942_v44 = vld [vmem:[%s9340_s2 + $0x18c] sm:$0xf] }
  0x7e   :  { %v5992_v50 = vld [vmem:[%s9340_s2 + $0x314] sm:$0xf0]  ;;  %v4816_v56 = vld [vmem:[%s9340_s2 + $0x608] sm:$0xf]  ;;  %v4305_v63 = vor.u32 %v5960_v46, %v4304_v45  ;;  %v4242_v45 = vld [vmem:[%s9340_s2 + $0x198] sm:$0xf0] }
  0x7f   :  { %1484 = vmatpush.bf16.msra.mxu2 %v4465_v26  ;;  %1459 = vmatpush.bf16.msrb.mxu3 %v4193_v33  ;;  %v6088_v58 = vld [vmem:[%s9340_s2 + $0x614] sm:$0xf0]  ;;  %v4656_v61 = vld [vmem:[%s9340_s2 + $0x4c8] sm:$0xf]  ;;  %v4433_v0 = vor.u32 %v5992_v50, %v4432_v49  ;;  %v4277_v26 = vor.u32 %v5950_v18, %v4274_v19  ;;  %v5910_v33 = vld [vmem:[%s9340_s2 + $0x8c] sm:$0xf] }
  0x80   :  { %v6048_v62 = vld [vmem:[%s9340_s2 + $0x4d4] sm:$0xf0]  ;;  %v4784_v1 = vld [vmem:[%s9340_s2 + $0x5c8] sm:$0xf]  ;;  %v4817_v4 = vor.u32 %v6088_v58, %v4816_v56  ;;  %v4098_v49 = vld [vmem:[%s9340_s2 + $0x78] sm:$0xf0] }
  0x81   :  { %1472 = vmatpush.bf16.msra.mxu0 %v4321_v42  ;;  %v6080_v2 = vld [vmem:[%s9340_s2 + $0x5d4] sm:$0xf0]  ;;  %1447 = vmatpush.bf16.msrb.mxu1 %v4049_v47  ;;  %v4657_v7 = vor.u32 %v6048_v62, %v4656_v61  ;;  %v4640_v12 = vld [vmem:[%s9340_s2 + $0x4a8] sm:$0xf]  ;;  %v5906_v47 = vld [vmem:[%s9340_s2 + $0x6c] sm:$0xf] }
  0x82   :  { %v4785_v11 = vor.u32 %v6080_v2, %v4784_v1  ;;  %v6044_v13 = vld [vmem:[%s9340_s2 + $0x4b4] sm:$0xf0]  ;;  %v4768_v15 = vld [vmem:[%s9340_s2 + $0x5a8] sm:$0xf]  ;;  %v4101_v58 = vor.u32 %v5906_v47, %v4098_v49  ;;  %v4226_v61 = vld [vmem:[%s9340_s2 + $0x178] sm:$0xf0] }
  0x83   :  { %1485 = vmatpush.bf16.msra.mxu2 %v4449_v43  ;;  %1460 = vmatpush.bf16.msrb.mxu3 %v4177_v52  ;;  %v6076_v16 = vld [vmem:[%s9340_s2 + $0x5b4] sm:$0xf0]  ;;  %v4641_v20 = vor.u32 %v6044_v13, %v4640_v12  ;;  %v4624_v24 = vld [vmem:[%s9340_s2 + $0x488] sm:$0xf]  ;;  %v4117_v43 = vor.u32 %v5910_v33, %v4114_v35  ;;  %v4210_v10 = vld [vmem:[%s9340_s2 + $0x158] sm:$0xf0] }
  0x84   :  { %v4769_v23 = vor.u32 %v6076_v16, %v4768_v15  ;;  %v6040_v25 = vld [vmem:[%s9340_s2 + $0x494] sm:$0xf0]  ;;  %1448 = vmatmul.bf16.vlgmr.msrb.gmra.mxu1 %v6750_v57  ;;  %v4752_v27 = vld [vmem:[%s9340_s2 + $0x588] sm:$0xf]  ;;  %v5898_v12 = vld [vmem:[%s9340_s2 + $0x2c] sm:$0xf]  ;;  %v4213_v19 = vor.u32 %v5934_v8, %v4210_v10 }
  0x85   :  { %1492 = vmatpush.bf16.msra.mxu1 %v4673_v54  ;;  %1473 = vmatpush.bf16.msra.mxu0 %v4305_v63  ;;  %v6072_v28 = vld [vmem:[%s9340_s2 + $0x594] sm:$0xf0]  ;;  %v4625_v32 = vor.u32 %v6040_v25, %v4624_v24  ;;  %v4608_v37 = vld [vmem:[%s9340_s2 + $0x468] sm:$0xf]  ;;  %v4245_v54 = vor.u32 %v5942_v44, %v4242_v45  ;;  %v5902_v63 = vld [vmem:[%s9340_s2 + $0x4c] sm:$0xf] }
  0x86   :  { %1461 = vmatmul.bf16.vlgmr.msrb.gmra.mxu3 %v6780_v9  ;;  %v4753_v36 = vor.u32 %v6072_v28, %v4752_v27  ;;  %v6036_v38 = vld [vmem:[%s9340_s2 + $0x474] sm:$0xf0]  ;;  %v4736_v41 = vld [vmem:[%s9340_s2 + $0x568] sm:$0xf]  ;;  %v4066_v13 = vld [vmem:[%s9340_s2 + $0x38] sm:$0xf0] }
  0x87   :  { %1505 = vmatpush.bf16.msra.mxu3 %v4801_v59  ;;  %1486 = vmatpush.bf16.msra.mxu2 %v4433_v0  ;;  %v6068_v42 = vld [vmem:[%s9340_s2 + $0x574] sm:$0xf0]  ;;  %v4609_v46 = vor.u32 %v6036_v38, %v4608_v37  ;;  %v4592_v51 = vld [vmem:[%s9340_s2 + $0x448] sm:$0xf]  ;;  %v5938_v59 = vld [vmem:[%s9340_s2 + $0x16c] sm:$0xf] }
  0x88   :  { %1474 = vmatmul.bf16.vlgmr.msra.gmra.mxu0 %v6739_v53  ;;  %v4737_v50 = vor.u32 %v6068_v42, %v4736_v41  ;;  %v6032_v52 = vld [vmem:[%s9340_s2 + $0x454] sm:$0xf0]  ;;  %v4720_v55 = vld [vmem:[%s9340_s2 + $0x548] sm:$0xf]  ;;  %v4082_v0 = vld [vmem:[%s9340_s2 + $0x58] sm:$0xf0] }
  0x89   :  { %1525 = vmatpush.bf16.msrb.mxu0 %v4817_v4  ;;  %1493 = vmatpush.bf16.msra.mxu1 %v4657_v7  ;;  %v6064_v56 = vld [vmem:[%s9340_s2 + $0x554] sm:$0xf0]  ;;  %v4593_v62 = vor.u32 %v6032_v52, %v4592_v51  ;;  %v4576_v2 = vld [vmem:[%s9340_s2 + $0x428] sm:$0xf]  ;;  %v4229_v4 = vor.u32 %v5938_v59, %v4226_v61  ;;  %v4085_v7 = vor.u32 %v5902_v63, %v4082_v0  ;;  %v4418_v21 = vld [vmem:[%s9340_s2 + $0x2f8] sm:$0xf0] }
  0x8a   :  { %1487 = vmatmul.bf16.vlgmr.msra.gmra.mxu2 %v6752_v60  ;;  %v4721_v1 = vor.u32 %v6064_v56, %v4720_v55  ;;  %v4704_v5 = vld [vmem:[%s9340_s2 + $0x528] sm:$0xf]  ;;  %v6060_v6 = vld [vmem:[%s9340_s2 + $0x534] sm:$0xf0]  ;;  %v6018_v22 = vld [vmem:[%s9340_s2 + $0x3ec] sm:$0xf] }
  0x8b   :  { %1531 = vmatpush.bf16.msrb.mxu2 %v4165_v3  ;;  %1506 = vmatpush.bf16.msra.mxu3 %v4785_v11  ;;  %v6028_v3 = vld [vmem:[%s9340_s2 + $0x434] sm:$0xf0]  ;;  %v4705_v15 = vor.u32 %v6060_v6, %v4704_v5  ;;  %v4546_v24 = vld [vmem:[%s9340_s2 + $0x3f8] sm:$0xf0]  ;;  %v5930_v25 = vld [vmem:[%s9340_s2 + $0x12c] sm:$0xf] }
  0x8c   :  { %v4577_v11 = vor.u32 %v6028_v3, %v4576_v2  ;;  %v6024_v16 = vld [vmem:[%s9340_s2 + $0x414] sm:$0xf0]  ;;  %v5894_v28 = vld [vmem:[%s9340_s2 + $0xc] sm:$0xf]  ;;  %v4674_v33 = vld [vmem:[%s9340_s2 + $0x4f8] sm:$0xf0]  ;;  %v4549_v35 = vor.u32 %v6018_v22, %v4546_v24 }
  0x8d   :  { %1544 = vmatpush.bf16.msra.mxu0 %v4293_v14  ;;  %1494 = vmatpush.bf16.msra.mxu1 %v4641_v20  ;;  %v4560_v14 = vld [vmem:[%s9340_s2 + $0x408] sm:$0xf]  ;;  %v6056_v18 = vld [vmem:[%s9340_s2 + $0x514] sm:$0xf0]  ;;  %v5986_v20 = vld [vmem:[%s9340_s2 + $0x2ec] sm:$0xf] }
  0x8e   :  { %v4561_v27 = vor.u32 %v6024_v16, %v4560_v14  ;;  %v4421_v31 = vor.u32 %v5986_v20, %v4418_v21  ;;  %v5982_v37 = vld [vmem:[%s9340_s2 + $0x2cc] sm:$0xf]  ;;  %v4402_v38 = vld [vmem:[%s9340_s2 + $0x2d8] sm:$0xf0] }
  0x8f   :  { %1532 = vmatpush.bf16.msrb.mxu2 %v4149_v17  ;;  %1507 = vmatpush.bf16.msra.mxu3 %v4769_v23  ;;  %v4688_v17 = vld [vmem:[%s9340_s2 + $0x508] sm:$0xf]  ;;  %v4069_v23 = vor.u32 %v5898_v12, %v4066_v13  ;;  %v4530_v42 = vld [vmem:[%s9340_s2 + $0x3d8] sm:$0xf0]  ;;  %v4405_v49 = vor.u32 %v5982_v37, %v4402_v38  ;;  %v5978_v55 = vld [vmem:[%s9340_s2 + $0x2ac] sm:$0xf] }
  0x90   :  { %v4689_v30 = vor.u32 %v6056_v18, %v4688_v17  ;;  %v4178_v44 = vld [vmem:[%s9340_s2 + $0x118] sm:$0xf0]  ;;  %v6010_v59 = vld [vmem:[%s9340_s2 + $0x3ac] sm:$0xf] }
  0x91   :  { %1545 = vmatpush.bf16.msra.mxu0 %v4277_v26  ;;  %1495 = vmatpush.bf16.msra.mxu1 %v4625_v32  ;;  %v4194_v26 = vld [vmem:[%s9340_s2 + $0x138] sm:$0xf0]  ;;  %v6050_v32 = vld [vmem:[%s9340_s2 + $0x4ec] sm:$0xf] }
  0x92   :  { %v4677_v45 = vor.u32 %v6050_v32, %v4674_v33  ;;  %v4802_v47 = vld [vmem:[%s9340_s2 + $0x5f8] sm:$0xf0]  ;;  %v6078_v63 = vld [vmem:[%s9340_s2 + $0x5cc] sm:$0xf] }
  0x93   :  { %1533 = vmatpush.bf16.msrb.mxu2 %v4133_v29  ;;  %1508 = vmatpush.bf16.msra.mxu3 %v4753_v36  ;;  %v4050_v29 = vld [vmem:[%s9340_s2 + $0x18] sm:$0xf0]  ;;  %v4197_v36 = vor.u32 %v5930_v25, %v4194_v26  ;;  %v6042_v2 = vld [vmem:[%s9340_s2 + $0x4ac] sm:$0xf] }
  0x94   :  { %v4053_v41 = vor.u32 %v5894_v28, %v4050_v29  ;;  %v4658_v51 = vld [vmem:[%s9340_s2 + $0x4d8] sm:$0xf0]  ;;  %v5974_v5 = vld [vmem:[%s9340_s2 + $0x28c] sm:$0xf] }
  0x95   :  { %1546 = vmatpush.bf16.msra.mxu0 %v4261_v40  ;;  %1496 = vmatpush.bf16.msra.mxu1 %v4609_v46  ;;  %v6014_v40 = vld [vmem:[%s9340_s2 + $0x3cc] sm:$0xf]  ;;  %v4386_v56 = vld [vmem:[%s9340_s2 + $0x2b8] sm:$0xf0] }
  0x96   :  { %v6082_v46 = vld [vmem:[%s9340_s2 + $0x5ec] sm:$0xf]  ;;  %v4533_v52 = vor.u32 %v6014_v40, %v4530_v42  ;;  %v4514_v61 = vld [vmem:[%s9340_s2 + $0x3b8] sm:$0xf0] }
  0x97   :  { %1534 = vmatpush.bf16.msrb.mxu2 %v4117_v43  ;;  %1509 = vmatpush.bf16.msra.mxu3 %v4737_v50  ;;  %v5926_v43 = vld [vmem:[%s9340_s2 + $0x10c] sm:$0xf]  ;;  %v4786_v0 = vld [vmem:[%s9340_s2 + $0x5d8] sm:$0xf0] }
  0x98   :  { %4824 = vmatmul.msk.bf16.vlgmr.msrb.gmra.mxu0 %vm1254_vm0, %v6859_v48  ;;  %v6046_v50 = vld [vmem:[%s9340_s2 + $0x4cc] sm:$0xf]  ;;  %v4642_v3 = vld [vmem:[%s9340_s2 + $0x4b8] sm:$0xf0] }
  0x99   :  { %1547 = vmatpush.bf16.msra.mxu0 %v4245_v54  ;;  %1497 = vmatpush.bf16.msra.mxu1 %v4593_v62  ;;  %v4181_v54 = vor.u32 %v5926_v43, %v4178_v44  ;;  %v4661_v62 = vor.u32 %v6046_v50, %v4658_v51  ;;  %v4370_v6 = vld [vmem:[%s9340_s2 + $0x298] sm:$0xf0]  ;;  %v6006_v8 = vld [vmem:[%s9340_s2 + $0x38c] sm:$0xf] }
  0x9a   :  { %v4498_v10 = vld [vmem:[%s9340_s2 + $0x398] sm:$0xf0]  ;;  %v6074_v12 = vld [vmem:[%s9340_s2 + $0x5ac] sm:$0xf]  ;;  %v4373_v14 = vor.u32 %v5974_v5, %v4370_v6 }
  0x9b   :  { %1535 = vmatpush.bf16.msrb.mxu2 %v4101_v58  ;;  %1510 = vmatpush.bf16.msra.mxu3 %v4721_v1  ;;  %v4805_v58 = vor.u32 %v6082_v46, %v4802_v47  ;;  %v4389_v1 = vor.u32 %v5978_v55, %v4386_v56  ;;  %v4770_v13 = vld [vmem:[%s9340_s2 + $0x5b8] sm:$0xf0]  ;;  %v4501_v16 = vor.u32 %v6006_v8, %v4498_v10  ;;  %v5970_v17 = vld [vmem:[%s9340_s2 + $0x26c] sm:$0xf] }
  0x9c   :  { %v4354_v18 = vld [vmem:[%s9340_s2 + $0x278] sm:$0xf0]  ;;  %v6002_v20 = vld [vmem:[%s9340_s2 + $0x36c] sm:$0xf] }
  0x9d   :  { %1548 = vmatpush.bf16.msra.mxu0 %v4229_v4  ;;  %1498 = vmatpush.bf16.msra.mxu1 %v4577_v11  ;;  %v4517_v4 = vor.u32 %v6010_v59, %v4514_v61  ;;  %v4645_v11 = vor.u32 %v6042_v2, %v4642_v3  ;;  %v4754_v24 = vld [vmem:[%s9340_s2 + $0x598] sm:$0xf0]  ;;  %v4357_v25 = vor.u32 %v5970_v17, %v4354_v18  ;;  %v6034_v26 = vld [vmem:[%s9340_s2 + $0x46c] sm:$0xf] }
  0x9e   :  { %v5966_v29 = vld [vmem:[%s9340_s2 + $0x24c] sm:$0xf]  ;;  %v4738_v38 = vld [vmem:[%s9340_s2 + $0x578] sm:$0xf0] }
  0x9f   :  { %1536 = vmatpush.bf16.msrb.mxu2 %v4085_v7  ;;  %1511 = vmatpush.bf16.msra.mxu3 %v4705_v15  ;;  %v4789_v7 = vor.u32 %v6078_v63, %v4786_v0  ;;  %v6038_v15 = vld [vmem:[%s9340_s2 + $0x48c] sm:$0xf]  ;;  %v4594_v43 = vld [vmem:[%s9340_s2 + $0x458] sm:$0xf0] }
  0xa0   :  { %v5998_v33 = vld [vmem:[%s9340_s2 + $0x34c] sm:$0xf]  ;;  %v4322_v47 = vld [vmem:[%s9340_s2 + $0x238] sm:$0xf0] }
  0xa1   :  { %1549 = vmatpush.bf16.msra.mxu0 %v4213_v19  ;;  %1499 = vmatpush.bf16.msra.mxu1 %v4561_v27  ;;  %v4773_v19 = vor.u32 %v6074_v12, %v4770_v13  ;;  %v4610_v27 = vld [vmem:[%s9340_s2 + $0x478] sm:$0xf0]  ;;  %v6066_v37 = vld [vmem:[%s9340_s2 + $0x56c] sm:$0xf] }
  0xa2   :  { %v6030_v42 = vld [vmem:[%s9340_s2 + $0x44c] sm:$0xf]  ;;  %v4450_v51 = vld [vmem:[%s9340_s2 + $0x338] sm:$0xf0] }
  0xa3   :  { %1537 = vmatpush.bf16.msrb.mxu2 %v4069_v23  ;;  %1512 = vmatpush.bf16.msra.mxu3 %v4689_v30  ;;  %v6070_v23 = vld [vmem:[%s9340_s2 + $0x58c] sm:$0xf]  ;;  %v4338_v30 = vld [vmem:[%s9340_s2 + $0x258] sm:$0xf0] }
  0xa4   :  { %1500 = vmatmul.bf16.vlgmr.msra.gmra.mxu1 %v6947_v34  ;;  %v5962_v46 = vld [vmem:[%s9340_s2 + $0x22c] sm:$0xf]  ;;  %v4722_v56 = vld [vmem:[%s9340_s2 + $0x558] sm:$0xf0] }
  0xa5   :  { %1557 = vmatpush.bf16.msrb.mxu1 %v4421_v31  ;;  %1550 = vmatpush.bf16.msra.mxu0 %v4197_v36  ;;  %v7634_v21 = vpop.f32.mrf.mxu0  ;;  %v4757_v31 = vor.u32 %v6070_v23, %v4754_v24  ;;  %v7654_v32 = vpop.f32.mrf.mxu1  ;;  %v4613_v36 = vor.u32 %v6034_v26, %v4610_v27  ;;  %v5994_v50 = vld [vmem:[%s9340_s2 + $0x32c] sm:$0xf]  ;;  %v4325_v59 = vor.u32 %v5962_v46, %v4322_v47  ;;  %v4690_v23 = vld [vmem:[%s9340_s2 + $0x518] sm:$0xf0]  ;;  %v6095_v26 = vld [vmem:[%s9342_s4 + $0x30] sm:$0xff] }
  0xa6   :  { %1513 = vmatmul.bf16.vlgmr.msra.gmra.mxu3 %v6958_v39  ;;  %v6062_v55 = vld [vmem:[%s9340_s2 + $0x54c] sm:$0xf]  ;;  %v4453_v63 = vor.u32 %v5994_v50, %v4450_v51  ;;  %v6104_v24 = vld [vmem:[%s9342_s4 + $0x78] sm:$0xff]  ;;  %v6089_v50 = vld [vmem:[%s9342_s4] sm:$0xff] }
  0xa7   :  { %1570 = vmatpush.bf16.msrb.mxu3 %v4549_v35  ;;  %1538 = vmatpush.bf16.msrb.mxu2 %v4053_v41  ;;  %v4466_v35 = vld [vmem:[%s9340_s2 + $0x358] sm:$0xf0]  ;;  %v4341_v41 = vor.u32 %v5966_v29, %v4338_v30  ;;  %v6026_v61 = vld [vmem:[%s9340_s2 + $0x42c] sm:$0xf]  ;;  %v4725_v3 = vor.u32 %v6062_v55, %v4722_v56 }
  0xa8   :  { %v7668_v40 = vpop.f32.mrf.mxu2  ;;  %v4469_v44 = vor.u32 %v5998_v33, %v4466_v35  ;;  %v5958_v0 = vld [vmem:[%s9340_s2 + $0x20c] sm:$0xf]  ;;  %v6101_v35 = vld [vmem:[%s9342_s4 + $0x60] sm:$0xff] }
  0xa9   :  { %1558 = vmatpush.bf16.msrb.mxu1 %v4405_v49  ;;  %1551 = vmatpush.bf16.msra.mxu0 %v4181_v54  ;;  %v4741_v49 = vor.u32 %v6066_v37, %v4738_v38  ;;  %v4597_v54 = vor.u32 %v6030_v42, %v4594_v43  ;;  %v5990_v2 = vld [vmem:[%s9340_s2 + $0x30c] sm:$0xf]  ;;  %v6100_v38 = vld [vmem:[%s9342_s4 + $0x58] sm:$0xff] }
  0xaa   :  { %1539 = vmatmul.bf16.vlgmr.msrb.gmra.mxu2 %v6750_v57  ;;  %v4626_v57 = vld [vmem:[%s9340_s2 + $0x498] sm:$0xf0]  ;;  %v6086_v6 = vld [vmem:[%s9340_s2 + $0x60c] sm:$0xf] }
  0xab   :  { %1583 = vmatpush.bf16.msra.mxu2 %v4677_v45  ;;  %1571 = vmatpush.bf16.msrb.mxu3 %v4533_v52  ;;  %v4629_v22 = vor.u32 %v6038_v15, %v4626_v57  ;;  %v7676_v45 = vpop.f32.mrf.mxu3  ;;  %v6058_v10 = vld [vmem:[%s9340_s2 + $0x52c] sm:$0xf]  ;;  %v4562_v15 = vld [vmem:[%s9340_s2 + $0x418] sm:$0xf0] }
  0xac   :  { %1552 = vmatmul.bf16.vlgmr.msra.gmra.mxu0 %v6780_v9  ;;  %v4482_v9 = vld [vmem:[%s9340_s2 + $0x378] sm:$0xf0]  ;;  %v6094_v30 = vld [vmem:[%s9342_s4 + $0x28] sm:$0xff] }
  0xad   :  { %1596 = vmatpush.bf16.msrb.mxu0 %v4805_v58  ;;  %1559 = vmatpush.bf16.msrb.mxu1 %v4389_v1  ;;  %v4485_v28 = vor.u32 %v6002_v20, %v4482_v9  ;;  %v1269_v52 = vpop.f32.mrf.mxu0  ;;  %v7699_v58 = vld [vmem:[%s9341_s3] sm:$0xf]  ;;  %v4306_v1 = vld [vmem:[%s9340_s2 + $0x218] sm:$0xf0]  ;;  %v1282_v5 = vpop.f32.mrf.mxu1  ;;  %v6090_v47 = vld [vmem:[%s9342_s4 + $0x8] sm:$0xff] }
  0xae   :  { %v4309_v13 = vor.u32 %v5958_v0, %v4306_v1  ;;  %v242_v57 = vperm.slane %v7699_v58, 0  ;;  %v243_v56 = vperm.slane %v7699_v58, 1  ;;  %v6112_v5 = vld [vmem:[%s9342_s4 + $0xb8] sm:$0xff] }
  0xaf   :  { %1584 = vmatpush.bf16.msra.mxu2 %v4661_v62  ;;  %1572 = vmatpush.bf16.msrb.mxu3 %v4517_v4  ;;  %v4578_v62 = vld [vmem:[%s9340_s2 + $0x438] sm:$0xf0] }
  0xb0   :  { %v4434_v4 = vld [vmem:[%s9340_s2 + $0x318] sm:$0xf0]  ;;  %v4581_v8 = vor.u32 %v6026_v61, %v4578_v62  ;;  %v1295_v12 = vpop.f32.mrf.mxu2 }
  0xb1   :  { %1597 = vmatpush.bf16.msrb.mxu0 %v4789_v7  ;;  %1560 = vmatpush.bf16.msrb.mxu1 %v4373_v14  ;;  %v4818_v7 = vld [vmem:[%s9340_s2 + $0x618] sm:$0xf0]  ;;  %v6022_v14 = vld [vmem:[%s9340_s2 + $0x40c] sm:$0xf] }
  0xb2   :  { %v4821_v17 = vor.u32 %v6086_v6, %v4818_v7  ;;  %v4565_v9 = vor.u32 %v6022_v14, %v4562_v15  ;;  %v6110_v12 = vld [vmem:[%s9342_s4 + $0xa8] sm:$0xff] }
  0xb3   :  { %1585 = vmatpush.bf16.msra.mxu2 %v4645_v11  ;;  %1573 = vmatpush.bf16.msrb.mxu3 %v4501_v16  ;;  %v4706_v11 = vld [vmem:[%s9340_s2 + $0x538] sm:$0xf0]  ;;  %v4437_v16 = vor.u32 %v5990_v2, %v4434_v4  ;;  %v1308_v18 = vpop.f32.mrf.mxu3 }
  0xb4   :  { %v4709_v20 = vor.u32 %v6058_v10, %v4706_v11 }
  0xb5   :  { %1598 = vmatpush.bf16.msrb.mxu0 %v4773_v19  ;;  %1561 = vmatpush.bf16.msrb.mxu1 %v4357_v25  ;;  %v6096_v19 = vld [vmem:[%s9342_s4 + $0x38] sm:$0xff]  ;;  %v1268_v25 = vadd.f32 %v7634_v21, %v242_v57  ;;  %v6103_v21 = vld [vmem:[%s9342_s4 + $0x70] sm:$0xff] }
  0xb7   :  { %1586 = vmatpush.bf16.msra.mxu2 %v4629_v22  ;;  %1574 = vmatpush.bf16.msrb.mxu3 %v4485_v28  ;;  %v6054_v22 = vld [vmem:[%s9340_s2 + $0x50c] sm:$0xf]  ;;  %v1281_v29 = vadd.f32 %v7654_v32, %v1268_v25  ;;  %s4013_s2 = sshll.u32 %s9348_s10, 4  ;;  %s4014_s2 = int_to_ptr.hbm [resolvable:$true] %s4013_s2 }
  0xb8   :  { %v4693_v27 = vor.u32 %v6054_v22, %v4690_v23 }
  0xb9   :  { %1599 = vmatpush.bf16.msrb.mxu0 %v4757_v31  ;;  %1562 = vmatpush.bf16.msrb.mxu1 %v4341_v41  ;;  %v1345_v28 = vpop.f32.mrf.mxu2  ;;  %v6093_v31 = vld [vmem:[%s9342_s4 + $0x20] sm:$0xff] }
  0xbb   :  { %1587 = vmatpush.bf16.msra.mxu2 %v4613_v36  ;;  %1575 = vmatpush.bf16.msrb.mxu3 %v4469_v44 }
  0xbd   :  { %1600 = vmatpush.bf16.msrb.mxu0 %v4741_v49  ;;  %1563 = vmatpush.bf16.msrb.mxu1 %v4325_v59 }
  0xbf   :  { %1588 = vmatpush.bf16.msra.mxu2 %v4597_v54  ;;  %1576 = vmatpush.bf16.msrb.mxu3 %v4453_v63  ;;  %v6097_v54 = vld [vmem:[%s9342_s4 + $0x40] sm:$0xff] }
  0xc1   :  { %1601 = vmatpush.bf16.msrb.mxu0 %v4725_v3  ;;  %1564 = vmatpush.bf16.msrb.mxu1 %v4309_v13  ;;  %v1332_v32 = vpop.f32.mrf.mxu1  ;;  %v1347_v33 = vpop.f32.mrf.mxu2 }
  0xc3   :  { %1589 = vmatpush.bf16.msra.mxu2 %v4581_v8  ;;  %1577 = vmatpush.bf16.msrb.mxu3 %v4437_v16  ;;  %v6111_v8 = vld [vmem:[%s9342_s4 + $0xb0] sm:$0xff]  ;;  %v6109_v16 = vld [vmem:[%s9342_s4 + $0xa0] sm:$0xff] }
  0xc4   :  { %1565 = vmatmul.bf16.vlgmr.msrb.gmra.mxu1 %v6739_v53  ;;  %v6102_v53 = vld [vmem:[%s9342_s4 + $0x68] sm:$0xff] }
  0xc5   :  { %1616 = vmatpush.bf16.msra.mxu1 %v4821_v17  ;;  %1602 = vmatpush.bf16.msrb.mxu0 %v4709_v20  ;;  %v6108_v20 = vld [vmem:[%s9342_s4 + $0x98] sm:$0xff] }
  0xc6   :  { %1578 = vmatmul.bf16.vlgmr.msrb.gmra.mxu3 %v6752_v60  ;;  %v1294_v60 = vadd.f32 %v7668_v40, %v1281_v29  ;;  %v6091_v40 = vld [vmem:[%s9342_s4 + $0x10] sm:$0xff]  ;;  %v6120_v29 = vld [vmem:[%s9342_s4 + $0xf8] sm:$0xff] }
  0xc7   :  { %1890 = vmatpush.bf16.msra.mxu3 %v6096_v19  ;;  %1590 = vmatpush.bf16.msra.mxu2 %v4565_v9  ;;  %v6107_v9 = vld [vmem:[%s9342_s4 + $0x90] sm:$0xff] }
  0xc8   :  { %v1307_v36 = vadd.f32 %v7676_v45, %v1294_v60  ;;  %v6099_v45 = vld [vmem:[%s9342_s4 + $0x50] sm:$0xff]  ;;  %v244_v60 = vperm.slane %v7699_v58, 2 }
  0xc9   :  { %1903 = vmatpush.bf16.msrb.mxu1 %v6104_v24  ;;  %1603 = vmatpush.bf16.msrb.mxu0 %v4693_v27  ;;  %v1358_v43 = vpop.f32.mrf.mxu3  ;;  %v1334_v44 = vpop.f32.mrf.mxu1  ;;  %v6106_v24 = vld [vmem:[%s9342_s4 + $0x88] sm:$0xff] }
  0xca   :  { %1591 = vmatmul.bf16.vlgmr.msra.gmra.mxu2 %v6947_v34  ;;  %v1319_v34 = vpop.f32.mrf.mxu0  ;;  %v1359_v61 = vadd.f32 %v1358_v43, %v243_v56  ;;  %v6113_v56 = vld [vmem:[%s9342_s4 + $0xc0] sm:$0xff] }
  0xcb   :  { %1891 = vmatpush.bf16.msra.mxu3 %v6095_v26  ;;  %v1320_v37 = vadd.f32 %v1319_v34, %v1307_v36  ;;  %1916 = vmatpush.bf16.msrb.mxu2 %v6112_v5  ;;  %v6105_v26 = vld [vmem:[%s9342_s4 + $0x80] sm:$0xff] }
  0xcc   :  { %1604 = vmatmul.bf16.vlgmr.msrb.gmra.mxu0 %v6958_v39  ;;  %v6092_v39 = vld [vmem:[%s9342_s4 + $0x18] sm:$0xff] }
  0xcd   :  { %1904 = vmatpush.bf16.msrb.mxu1 %v6103_v21  ;;  %v1333_v41 = vadd.f32 %v1332_v32, %v1320_v37  ;;  %v1371_v46 = vpop.f32.mrf.mxu2  ;;  %1929 = vmatpush.bf16.msra.mxu0 %v6120_v29 }
  0xce   :  { %v1372_v62 = vadd.f32 %v1371_v46, %v1359_v61  ;;  %v245_v61 = vperm.slane %v7699_v58, 3 }
  0xcf   :  { %1892 = vmatpush.bf16.msra.mxu3 %v6094_v30  ;;  %v1346_v49 = vadd.f32 %v1345_v28, %v1333_v41  ;;  %1917 = vmatpush.bf16.msrb.mxu2 %v6111_v8  ;;  %v6119_v30 = vld [vmem:[%s9342_s4 + $0xf0] sm:$0xff]  ;;  %v6116_v41 = vld [vmem:[%s9342_s4 + $0xd8] sm:$0xff] }
  0xd1   :  { %1905 = vmatpush.bf16.msrb.mxu1 %v6102_v53  ;;  %v1622_v51 = vmax.f32 %v1346_v49, 0.0  ;;  %v1360_v52 = vpop.f32.mrf.mxu3  ;;  %1930 = vmatpush.bf16.msra.mxu0 %v6119_v30 }
  0xd2   :  { %v1321_v42 = vpop.f32.mrf.mxu0 }
  0xd3   :  { %1893 = vmatpush.bf16.msra.mxu3 %v6093_v31  ;;  %v1626_v59 = vpack.c.bf16 %v1622_v51, %v1622_v51  ;;  %1918 = vmatpush.bf16.msrb.mxu2 %v6110_v12  ;;  %v6114_v51 = vld [vmem:[%s9342_s4 + $0xc8] sm:$0xff] }
  0xd4   :  { %4825 = vmatmul.msk.bf16.vlgmr.msra.gmra.mxu1 %vm1254_vm0, %v6859_v48  ;;  %v6098_v48 = vld [vmem:[%s9342_s4 + $0x48] sm:$0xff] }
  0xd5   :  { %1906 = vmatpush.bf16.msrb.mxu1 %v6101_v35  ;;  %v1373_v55 = vpop.f32.mrf.mxu2  ;;  %v6118_v35 = vld [vmem:[%s9342_s4 + $0xe8] sm:$0xff] }
  0xd6   :  { %1931 = vmatpush.bf16.msra.mxu0 %v6118_v35  ;;  %v6128_v35 = vld [vmem:[%s9344_s6 + $0x34] sm:$0xf0] }
  0xd7   :  { %1894 = vmatpush.bf16.msra.mxu3 %v6092_v39  ;;  %1919 = vmatpush.bf16.msrb.mxu2 %v6109_v16  ;;  %v6117_v39 = vld [vmem:[%s9342_s4 + $0xe0] sm:$0xff] }
  0xd9   :  { %1907 = vmatpush.bf16.msrb.mxu1 %v6100_v38 }
  0xda   :  { %1932 = vmatpush.bf16.msra.mxu0 %v6117_v39 }
  0xdb   :  { %1895 = vmatpush.bf16.msra.mxu3 %v6091_v40  ;;  %1920 = vmatpush.bf16.msrb.mxu2 %v6108_v20 }
  0xdd   :  { %1908 = vmatpush.bf16.msrb.mxu1 %v6099_v45  ;;  %v6115_v45 = vld [vmem:[%s9342_s4 + $0xd0] sm:$0xff] }
  0xde   :  { %1933 = vmatpush.bf16.msra.mxu0 %v6116_v41 }
  0xdf   :  { %1896 = vmatpush.bf16.msra.mxu3 %v6090_v47  ;;  %1921 = vmatpush.bf16.msrb.mxu2 %v6107_v9 }
  0xe1   :  { %1909 = vmatpush.bf16.msrb.mxu1 %v6098_v48  ;;  %v1384_v63 = vpop.f32.mrf.mxu0  ;;  %v1397_v1 = vpop.f32.mrf.mxu1 }
  0xe2   :  { %v1385_v0 = vadd.f32 %v1384_v63, %v1372_v62  ;;  %1934 = vmatpush.bf16.msra.mxu0 %v6115_v45 }
  0xe3   :  { %1897 = vmatpush.bf16.msra.mxu3 %v6089_v50  ;;  %1922 = vmatpush.bf16.msrb.mxu2 %v6106_v24 }
  0xe4   :  { %v1398_v2 = vadd.f32 %v1397_v1, %v1385_v0 }
  0xe5   :  { %1910 = vmatpush.bf16.msrb.mxu1 %v6097_v54 }
  0xe6   :  { %1898 = vmatmul.bf16.vlgmr.msra.gmra.mxu3 %v1626_v59  ;;  %1935 = vmatpush.bf16.msra.mxu0 %v6114_v51  ;;  %v4966_v51 = vld [vmem:[%s9344_s6 + $0x18] sm:$0xf0] }
  0xe7   :  { %1923 = vmatpush.bf16.msrb.mxu2 %v6105_v26 }
  0xe9   :  { %v1386_v3 = vpop.f32.mrf.mxu0  ;;  %v1410_v4 = vpop.f32.mrf.mxu3 }
  0xea   :  { %v1411_v6 = vadd.f32 %v1410_v4, %v1398_v2  ;;  %v1399_v10 = vpop.f32.mrf.mxu1  ;;  %1936 = vmatpush.bf16.msra.mxu0 %v6113_v56  ;;  %v5384_v56 = vld [vmem:[%s9346_s8 + $0x310] sm:$0xf] }
  0xed   :  { %v1423_v7 = vpop.f32.mrf.mxu2 }
  0xee   :  { %v1424_v11 = vadd.f32 %v1423_v7, %v1411_v6 }
  0xf1   :  { %v1436_v13 = vpop.f32.mrf.mxu0  ;;  %v1412_v14 = vpop.f32.mrf.mxu3 }
  0xf2   :  { %v1437_v15 = vadd.f32 %v1436_v13, %v1424_v11 }
  0xf4   :  { %v1623_v17 = vmax.f32 %v1437_v15, 0.0 }
  0xf5   :  { %v1425_v57 = vpop.f32.mrf.mxu2 }
  0xf6   :  { %v1627_v18 = vpack.c.bf16 %v1623_v17, %v1623_v17 }
  0xf8   :  { %1911 = vmatmul.bf16.vlgmr.msrb.gmra.mxu1 %v1627_v18  ;;  %v6356_v18 = vld [vmem:[%s9343_s5] ss:$0 sm:$0xff] }
  0xf9   :  { %v1438_v19 = vpop.f32.mrf.mxu0 }
 0x101   :  { %v1449_v23 = vpop.f32.mrf.mxu1 }
 0x102   :  { %v1450_v32 = vadd.f32 %v1449_v23, %v244_v60  ;;  %v6127_v60 = vld [vmem:[%s9344_s6 + $0x2c] sm:$0xf0] }
 0x105   :  { %v1475_v22 = vpop.f32.mrf.mxu0 }
 0x109   :  { %v1462_v25 = vpop.f32.mrf.mxu3  ;;  %v1451_v21 = vpop.f32.mrf.mxu1 }
 0x10a   :  { %v1463_v33 = vadd.f32 %v1462_v25, %v1450_v32  ;;  %v4974_v32 = vld [vmem:[%s9344_s6 + $0x30] sm:$0xf0] }
 0x10c   :  { %v1476_v37 = vadd.f32 %v1475_v22, %v1463_v33  ;;  %v4980_v33 = vld [vmem:[%s9344_s6 + $0x28] sm:$0xf] }
 0x10d   :  { %v1477_v27 = vpop.f32.mrf.mxu0  ;;  %v1488_v28 = vpop.f32.mrf.mxu2  ;;  %v4981_v39 = vor.u32 %v6128_v35, %v4980_v33  ;;  %v5076_v35 = vld [vmem:[%s9346_s8 + $0xa8] sm:$0xf] }
 0x10e   :  { %v1489_v40 = vadd.f32 %v1488_v28, %v1476_v37  ;;  %v4956_v37 = vld [vmem:[%s9344_s6] sm:$0xf] }
 0x10f   :  { %2047 = vmatpush.bf16.msra.mxu2 %v4981_v39 }
 0x111   :  { %v1464_v53 = vpop.f32.mrf.mxu3 }
 0x112   :  { %v4972_v53 = vld [vmem:[%s9344_s6 + $0x20] sm:$0xf] }
 0x115   :  { %v1527_v31 = vpop.f32.mrf.mxu0  ;;  %v1490_v34 = vpop.f32.mrf.mxu2 }
 0x116   :  { %v4973_v34 = vor.u32 %v6127_v60, %v4972_v53  ;;  %v5300_v60 = vld [vmem:[%s9346_s8 + $0x268] sm:$0xf] }
 0x118   :  { %2021 = vmatpush.bf16.msrb.mxu3 %v4973_v34 }
 0x11d   :  { %v1529_v36 = vpop.f32.mrf.mxu0 }
 0x121   :  { %v1501_v38 = vpop.f32.mrf.mxu1 }
 0x122   :  { %v1502_v42 = vadd.f32 %v1501_v38, %v1489_v40  ;;  %v6123_v38 = vld [vmem:[%s9344_s6 + $0xc] sm:$0xf0]  ;;  %v6121_v40 = vld [vmem:[%s9344_s6 + $0x4] sm:$0xf] }
 0x123   :  { %v4957_v41 = vor.u32 %v6123_v38, %v4956_v37  ;;  %v6265_v38 = vld [vmem:[%s9346_s8 + $0x440] sm:$0xf0] }
 0x125   :  { %2022 = vmatpush.bf16.msrb.mxu3 %v4957_v41  ;;  %v6342_v41 = vld [vmem:[%s9346_s8 + $0x6a8] sm:$0xf0] }
 0x129   :  { %v1553_v43 = vpop.f32.mrf.mxu0  ;;  %v1514_v44 = vpop.f32.mrf.mxu3 }
 0x12a   :  { %v1515_v46 = vadd.f32 %v1514_v44, %v1502_v42  ;;  %v1503_v47 = vpop.f32.mrf.mxu1  ;;  %v4958_v42 = vld [vmem:[%s9344_s6 + $0x10] sm:$0xf0]  ;;  %v6124_v44 = vld [vmem:[%s9344_s6 + $0x14] sm:$0xf0] }
 0x12b   :  { %v4961_v45 = vor.u32 %v6121_v40, %v4958_v42  ;;  %v6126_v47 = vld [vmem:[%s9344_s6 + $0x2c] sm:$0xf]  ;;  %v5832_v40 = vld [vmem:[%s9346_s8 + $0x690] sm:$0xf] }
 0x12c   :  { %v1528_v49 = vadd.f32 %v1527_v31, %v1515_v46  ;;  %v6125_v31 = vld [vmem:[%s9344_s6 + $0x24] sm:$0xf]  ;;  %v5272_v42 = vld [vmem:[%s9346_s8 + $0x230] sm:$0xf] }
 0x12d   :  { %v1540_v48 = vpop.f32.mrf.mxu2  ;;  %v4977_v36 = vor.u32 %v6125_v31, %v4974_v32  ;;  %v6209_v31 = vld [vmem:[%s9346_s8 + $0x280] sm:$0xf0] }
 0x12e   :  { %v1624_v50 = vmax.f32 %v1528_v49, 0.0  ;;  %v1541_v62 = vadd.f32 %v1540_v48, %v245_v61  ;;  %v4982_v49 = vld [vmem:[%s9344_s6 + $0x38] sm:$0xf0]  ;;  %v6122_v48 = vld [vmem:[%s9344_s6 + $0xc] sm:$0xf]  ;;  %v5301_v37 = vor.u32 %v6209_v31, %v5300_v60 }
 0x12f   :  { %2034 = vmatpush.bf16.msra.mxu1 %v4977_v36  ;;  %v6230_v61 = vld [vmem:[%s9346_s8 + $0x328] sm:$0xf0]  ;;  %v5524_v36 = vld [vmem:[%s9346_s8 + $0x428] sm:$0xf]  ;;  %v5162_v60 = vld [vmem:[%s9346_s8 + $0x16c] sm:$0xf0] }
 0x130   :  { %v1628_v52 = vpack.c.bf16 %v1624_v50, %v1624_v50  ;;  %v1554_v0 = vadd.f32 %v1553_v43, %v1541_v62  ;;  %v4964_v43 = vld [vmem:[%s9344_s6 + $0x8] sm:$0xf]  ;;  %v4985_v50 = vor.u32 %v6126_v47, %v4982_v49  ;;  %v6146_v47 = vld [vmem:[%s9346_s8 + $0x88] sm:$0xf0]  ;;  %v5496_v49 = vld [vmem:[%s9346_s8 + $0x3f0] sm:$0xf] }
 0x131   :  { %v1555_v54 = vpop.f32.mrf.mxu0  ;;  %v1516_v55 = vpop.f32.mrf.mxu3  ;;  %v4965_v46 = vor.u32 %v6124_v44, %v4964_v43  ;;  %v5188_v62 = vld [vmem:[%s9346_s8 + $0x188] sm:$0xf]  ;;  %v6202_v43 = vld [vmem:[%s9346_s8 + $0x248] sm:$0xf0]  ;;  %v6283_v31 = vld [vmem:[%s9346_s8 + $0x4d4] sm:$0xf] }
 0x132   :  { %1924 = vmatmul.bf16.vlgmr.msrb.gmra.mxu2 %v1628_v52  ;;  %2060 = vmatpush.bf16.msra.mxu3 %v4985_v50  ;;  %v4969_v52 = vor.u32 %v6122_v48, %v4966_v51  ;;  %v5412_v54 = vld [vmem:[%s9346_s8 + $0x348] sm:$0xf]  ;;  %v6237_v55 = vld [vmem:[%s9346_s8 + $0x360] sm:$0xf0]  ;;  %v5833_v48 = vor.u32 %v6342_v41, %v5832_v40  ;;  %v5273_v50 = vor.u32 %v6202_v43, %v5272_v42  ;;  %v6258_v51 = vld [vmem:[%s9346_s8 + $0x408] sm:$0xf0] }
 0x133   :  { %2035 = vmatpush.bf16.msra.mxu1 %v4961_v45  ;;  %2048 = vmatpush.bf16.msra.mxu2 %v4965_v46  ;;  %v5525_v45 = vor.u32 %v6265_v38, %v5524_v36  ;;  %v5048_v46 = vld [vmem:[%s9346_s8 + $0x70] sm:$0xf]  ;;  %v6220_v36 = vld [vmem:[%s9346_s8 + $0x2dc] sm:$0xf]  ;;  %v5134_v41 = vld [vmem:[%s9346_s8 + $0x134] sm:$0xf0] }
 0x134   :  { %v6164_v40 = vld [vmem:[%s9346_s8 + $0x11c] sm:$0xf] }
 0x135   :  { %v1542_v59 = vpop.f32.mrf.mxu2  ;;  %v6276_v42 = vld [vmem:[%s9346_s8 + $0x49c] sm:$0xf] }
 0x136   :  { %2061 = vmatpush.bf16.msra.mxu3 %v4969_v52  ;;  %v5413_v59 = vor.u32 %v6237_v55, %v5412_v54  ;;  %v5804_v52 = vld [vmem:[%s9346_s8 + $0x658] sm:$0xf]  ;;  %v6335_v54 = vld [vmem:[%s9346_s8 + $0x670] sm:$0xf0] }
 0x137   :  { %v5244_v55 = vld [vmem:[%s9346_s8 + $0x1f8] sm:$0xf] }
 0x138   :  { %3512 = vmatpush.bf16.msrb.mxu1 %v5413_v59  ;;  %v5049_v59 = vor.u32 %v6146_v47, %v5048_v46  ;;  %v6307_v46 = vld [vmem:[%s9346_s8 + $0x590] sm:$0xf0]  ;;  %v6213_v47 = vld [vmem:[%s9346_s8 + $0x2a4] sm:$0xf] }
 0x141   :  { %v1566_v63 = vpop.f32.mrf.mxu1 }
 0x142   :  { %v1567_v1 = vadd.f32 %v1566_v63, %v1554_v0  ;;  %v6181_v63 = vld [vmem:[%s9346_s8 + $0x1a0] sm:$0xf0] }
 0x143   :  { %v5189_v0 = vor.u32 %v6181_v63, %v5188_v62  ;;  %v5020_v62 = vld [vmem:[%s9346_s8 + $0x38] sm:$0xf]  ;;  %v6139_v63 = vld [vmem:[%s9346_s8 + $0x50] sm:$0xf0] }
 0x145   :  { %3499 = vmatpush.bf16.msrb.mxu0 %v5189_v0  ;;  %v5468_v0 = vld [vmem:[%s9346_s8 + $0x3b8] sm:$0xf] }
 0x149   :  { %v1579_v2 = vpop.f32.mrf.mxu3  ;;  %v1605_v3 = vpop.f32.mrf.mxu0 }
 0x14a   :  { %v1580_v4 = vadd.f32 %v1579_v2, %v1567_v1  ;;  %v1568_v5 = vpop.f32.mrf.mxu1  ;;  %v5636_v1 = vld [vmem:[%s9346_s8 + $0x508] sm:$0xf]  ;;  %v6293_v2 = vld [vmem:[%s9346_s8 + $0x520] sm:$0xf0] }
 0x14b   :  { %v5356_v5 = vld [vmem:[%s9346_s8 + $0x2d8] sm:$0xf] }
 0x14d   :  { %v1592_v6 = vpop.f32.mrf.mxu2 }
 0x14e   :  { %v1593_v7 = vadd.f32 %v1592_v6, %v1580_v4  ;;  %v5637_v4 = vor.u32 %v6293_v2, %v5636_v1  ;;  %v5160_v6 = vld [vmem:[%s9346_s8 + $0x150] sm:$0xf]  ;;  %v5805_v1 = vor.u32 %v6335_v54, %v5804_v52  ;;  %v6157_v52 = vld [vmem:[%s9346_s8 + $0xe4] sm:$0xf]  ;;  %v5106_v54 = vld [vmem:[%s9346_s8 + $0xfc] sm:$0xf0] }
 0x150   :  { %v1606_v11 = vadd.f32 %v1605_v3, %v1593_v7  ;;  %v5385_v3 = vor.u32 %v6230_v61, %v5384_v56  ;;  %v6174_v7 = vld [vmem:[%s9346_s8 + $0x168] sm:$0xf0]  ;;  %3525 = vmatpush.bf16.msrb.mxu2 %v5637_v4  ;;  %v6195_v56 = vld [vmem:[%s9346_s8 + $0x210] sm:$0xf0]  ;;  %v5497_v61 = vor.u32 %v6258_v51, %v5496_v49  ;;  %v5776_v4 = vld [vmem:[%s9346_s8 + $0x620] sm:$0xf] }
 0x151   :  { %v1581_v8 = vpop.f32.mrf.mxu3  ;;  %v1607_v10 = vpop.f32.mrf.mxu0  ;;  %v5245_v2 = vor.u32 %v6195_v56, %v5244_v55  ;;  %v5330_v49 = vld [vmem:[%s9346_s8 + $0x2bc] sm:$0xf0]  ;;  %v6269_v55 = vld [vmem:[%s9346_s8 + $0x464] sm:$0xf] }
 0x152   :  { %v1618_v12 = vpop.f32.mrf.mxu1  ;;  %v6223_v8 = vld [vmem:[%s9346_s8 + $0x2f0] sm:$0xf0]  ;;  %v5161_v10 = vor.u32 %v6174_v7, %v5160_v6  ;;  %3513 = vmatpush.bf16.msrb.mxu1 %v5385_v3  ;;  %v5216_v6 = vld [vmem:[%s9346_s8 + $0x1c0] sm:$0xf]  ;;  %v6188_v7 = vld [vmem:[%s9346_s8 + $0x1d8] sm:$0xf0]  ;;  %v5333_v56 = vor.u32 %v6213_v47, %v5330_v49 }
 0x153   :  { %v1619_v13 = vadd.f32 %v1618_v12, %v1606_v11  ;;  %v5608_v11 = vld [vmem:[%s9346_s8 + $0x4d0] sm:$0xf]  ;;  %v6286_v12 = vld [vmem:[%s9346_s8 + $0x4e8] sm:$0xf0]  ;;  %v6251_v3 = vld [vmem:[%s9346_s8 + $0x3d0] sm:$0xf0] }
 0x154   :  { %3500 = vmatpush.bf16.msrb.mxu0 %v5161_v10  ;;  %v5414_v10 = vld [vmem:[%s9346_s8 + $0x364] sm:$0xf0] }
 0x155   :  { %v1594_v14 = vpop.f32.mrf.mxu2  ;;  %v1625_v15 = vmax.f32 %v1619_v13, 0.0  ;;  %v5609_v13 = vor.u32 %v6286_v12, %v5608_v11  ;;  %v5021_v11 = vor.u32 %v6139_v63, %v5020_v62  ;;  %v4992_v12 = vld [vmem:[%s9346_s8] sm:$0xf]  ;;  %v6300_v62 = vld [vmem:[%s9346_s8 + $0x558] sm:$0xf0] }
 0x156   :  { %v5132_v14 = vld [vmem:[%s9346_s8 + $0x118] sm:$0xf]  ;;  %v6206_v63 = vld [vmem:[%s9346_s8 + $0x26c] sm:$0xf]  ;;  %v5750_v47 = vld [vmem:[%s9346_s8 + $0x604] sm:$0xf0] }
 0x157   :  { %v1629_v57 = vpack.c.bf16 %v1625_v15, %v1625_v15  ;;  %v6167_v15 = vld [vmem:[%s9346_s8 + $0x130] sm:$0xf0]  ;;  %3526 = vmatpush.bf16.msrb.mxu2 %v5609_v13  ;;  %v5469_v13 = vor.u32 %v6251_v3, %v5468_v0  ;;  %v5302_v0 = vld [vmem:[%s9346_s8 + $0x284] sm:$0xf0] }
 0x159   :  { %1937 = vmatmul.bf16.vlgmr.msra.gmra.mxu0 %v1629_v57  ;;  %v5580_v57 = vld [vmem:[%s9346_s8 + $0x498] sm:$0xf] }
 0x15a   :  { %v1620_v58 = vpop.f32.mrf.mxu1 }
 0x15b   :  { %v6279_v58 = vld [vmem:[%s9346_s8 + $0x4b0] sm:$0xf0] }
 0x169   :  { %v1899_v16 = vpop.f32.mrf.mxu3 }
 0x16a   :  { %v1900_v19 = vadd.f32 %v6356_v18, %v1899_v16  ;;  %v1942_v16 = vld [vmem:[%s9339_s1] sm:$0xff] }
 0x16b   :  { %v5328_v18 = vld [vmem:[%s9346_s8 + $0x2a0] sm:$0xf] }
 0x171   :  { %v1901_v17 = vpop.f32.mrf.mxu3 }
 0x172   :  { %v5357_v17 = vor.u32 %v6223_v8, %v5356_v5  ;;  %v6328_v5 = vld [vmem:[%s9346_s8 + $0x638] sm:$0xf0]  ;;  %v6234_v8 = vld [vmem:[%s9346_s8 + $0x34c] sm:$0xf] }
 0x174   :  { %3514 = vmatpush.bf16.msrb.mxu1 %v5357_v17  ;;  %v6178_v17 = vld [vmem:[%s9346_s8 + $0x18c] sm:$0xf] }
 0x175   :  { %v1912_v20 = vpop.f32.mrf.mxu1 }
 0x176   :  { %v1913_v9 = vadd.f32 %v1912_v20, %v1900_v19  ;;  %v6216_v19 = vld [vmem:[%s9346_s8 + $0x2b8] sm:$0xf0]  ;;  %v5133_v20 = vor.u32 %v6167_v15, %v5132_v14  ;;  %v5440_v15 = vld [vmem:[%s9346_s8 + $0x380] sm:$0xf] }
 0x177   :  { %v6132_v14 = vld [vmem:[%s9346_s8 + $0x18] sm:$0xf0] }
 0x178   :  { %3501 = vmatpush.bf16.msrb.mxu0 %v5133_v20  ;;  %v5417_v20 = vor.u32 %v6234_v8, %v5414_v10  ;;  %v6150_v8 = vld [vmem:[%s9346_s8 + $0xac] sm:$0xf]  ;;  %v5078_v10 = vld [vmem:[%s9346_s8 + $0xc4] sm:$0xf0] }
 0x17d   :  { %v1914_v22 = vpop.f32.mrf.mxu1 }
 0x17e   :  { %v5581_v22 = vor.u32 %v6279_v58, %v5580_v57  ;;  %v6244_v57 = vld [vmem:[%s9346_s8 + $0x398] sm:$0xf0]  ;;  %v5777_v58 = vor.u32 %v6328_v5, %v5776_v4  ;;  %v5305_v4 = vor.u32 %v6206_v63, %v5302_v0  ;;  %v6199_v5 = vld [vmem:[%s9346_s8 + $0x234] sm:$0xf] }
 0x180   :  { %3527 = vmatpush.bf16.msrb.mxu2 %v5581_v22  ;;  %v5748_v22 = vld [vmem:[%s9346_s8 + $0x5e8] sm:$0xf] }
 0x1b5   :  { %v1925_v23 = vpop.f32.mrf.mxu2 }
 0x1b6   :  { %v1926_v25 = vadd.f32 %v1925_v23, %v1913_v9 }
 0x1bd   :  { %v1927_v24 = vpop.f32.mrf.mxu2 }
 0x1be   :  { %v5104_v24 = vld [vmem:[%s9346_s8 + $0xe0] sm:$0xf] }
 0x1d6   :  { %v1938_v26 = vpop.f32.mrf.mxu0 }
 0x1d7   :  { %v7856_v27 = vadd.f32 %v1938_v26, %v1926_v25  ;;  %v6160_v25 = vld [vmem:[%s9346_s8 + $0xf8] sm:$0xf0]  ;;  %v5552_v26 = vld [vmem:[%s9346_s8 + $0x460] sm:$0xf] }
 0x1d8   :  { %v5105_v34 = vor.u32 %v6160_v25, %v5104_v24  ;;  %v6227_v24 = vld [vmem:[%s9346_s8 + $0x314] sm:$0xf]  ;;  %v5386_v25 = vld [vmem:[%s9346_s8 + $0x32c] sm:$0xf0] }
 0x1d9   :  { %v1943_v28 = vmul.f32 0.5, %v7856_v27  ;;  %4005 = vst [vmem:[#allocation4] sm:$0xff] %v7856_v27 }
 0x1da   :  { %3502 = vmatpush.bf16.msrb.mxu0 %v5105_v34  ;;  %v5389_v34 = vor.u32 %v6227_v24, %v5386_v25  ;;  %v6339_v24 = vld [vmem:[%s9346_s8 + $0x694] sm:$0xf]  ;;  %v5834_v25 = vld [vmem:[%s9346_s8 + $0x6ac] sm:$0xf0] }
 0x1db   :  { %v1944_v21 = vmul.f32 1.442695, %v1943_v28  ;;  %v5329_v28 = vor.u32 %v6216_v19, %v5328_v18  ;;  %v5190_v18 = vld [vmem:[%s9346_s8 + $0x1a4] sm:$0xf0]  ;;  %v6290_v19 = vld [vmem:[%s9346_s8 + $0x50c] sm:$0xf] }
 0x1dd   :  { %6357 = vpow2.f32 %v1944_v21  ;;  %v6272_v21 = vld [vmem:[%s9346_s8 + $0x478] sm:$0xf0]  ;;  %3515 = vmatpush.bf16.msrb.mxu1 %v5329_v28  ;;  %v5441_v28 = vor.u32 %v6244_v57, %v5440_v15  ;;  %v5862_v15 = vld [vmem:[%s9346_s8 + $0x6e4] sm:$0xf0] }
 0x1de   :  { %v1940_v29 = vpop.f32.mrf.mxu0  ;;  %v5553_v33 = vor.u32 %v6272_v21, %v5552_v26  ;;  %v4993_v26 = vor.u32 %v6132_v14, %v4992_v12  ;;  %v5193_v21 = vor.u32 %v6178_v17, %v5190_v18  ;;  %v5081_v12 = vor.u32 %v6150_v8, %v5078_v10  ;;  %v6346_v14 = vld [vmem:[%s9346_s8 + $0x6cc] sm:$0xf]  ;;  %v5246_v17 = vld [vmem:[%s9346_s8 + $0x214] sm:$0xf0] }
 0x1df   :  { %v5860_v29 = vld [vmem:[%s9346_s8 + $0x6c8] sm:$0xf]  ;;  %v5392_v10 = vld [vmem:[%s9346_s8 + $0x318] sm:$0xf] }
 0x1e0   :  { %3528 = vmatpush.bf16.msrb.mxu2 %v5553_v33  ;;  %v5610_v33 = vld [vmem:[%s9346_s8 + $0x4ec] sm:$0xf0] }
 0x1e1   :  { %3516 = vmatpush.bf16.msrb.mxu1 %v5301_v37  ;;  %v5613_v37 = vor.u32 %v6283_v31, %v5610_v33  ;;  %v5470_v33 = vld [vmem:[%s9346_s8 + $0x3d4] sm:$0xf0] }
 0x1e3   :  { %v6358_v30 = vpop.eup %6357 }
 0x1e4   :  { %1947 = vrot.lane.b32.xlu0 %v6358_v30, %s6439_s22  ;;  %v6349_v30 = vld [vmem:[%s9346_s8 + $0x6e0] sm:$0xf0]  ;;  %3529 = vmatpush.bf16.msrb.mxu2 %v5525_v45  ;;  %v5692_v45 = vld [vmem:[%s9346_s8 + $0x578] sm:$0xf] }
 0x1e5   :  { %v5861_v39 = vor.u32 %v6349_v30, %v5860_v29  ;;  %3517 = vmatpush.bf16.msrb.mxu1 %v5273_v50  ;;  %v5693_v51 = vor.u32 %v6307_v46, %v5692_v45  ;;  %v6318_v46 = vld [vmem:[%s9346_s8 + $0x5ec] sm:$0xf] }
 0x1e6   :  { %v5753_v49 = vor.u32 %v6318_v46, %v5750_v47  ;;  %v5112_v46 = vld [vmem:[%s9346_s8 + $0xe8] sm:$0xf]  ;;  %v6161_v47 = vld [vmem:[%s9346_s8 + $0x100] sm:$0xf0] }
 0x1e8   :  { %3530 = vmatpush.bf16.msrb.mxu2 %v5497_v61  ;;  %v5664_v61 = vld [vmem:[%s9346_s8 + $0x540] sm:$0xf] }
 0x1e9   :  { %3518 = vmatpush.bf16.msrb.mxu1 %v5245_v2  ;;  %v5665_v3 = vor.u32 %v6300_v62, %v5664_v61  ;;  %v5666_v61 = vld [vmem:[%s9346_s8 + $0x55c] sm:$0xf0] }
 0x1ec   :  { %3531 = vmatpush.bf16.msrb.mxu2 %v5469_v13  ;;  %v5526_v13 = vld [vmem:[%s9346_s8 + $0x444] sm:$0xf0] }
 0x1f0   :  { %3532 = vmatpush.bf16.msrb.mxu2 %v5441_v28  ;;  %v5837_v28 = vor.u32 %v6339_v24, %v5834_v25 }
 0x256   :  { %v1948_v9 = vpop.permute.xlu0 %1947 }
 0x257   :  { %v1950_v23 = vmul.f32 %v1948_v9, %v1942_v16  ;;  %v5217_v16 = vor.u32 %v6188_v7, %v5216_v6  ;;  %v5638_v9 = vld [vmem:[%s9346_s8 + $0x524] sm:$0xf0]  ;;  %v5274_v6 = vld [vmem:[%s9346_s8 + $0x24c] sm:$0xf0] }
 0x258   :  { %v5641_v29 = vor.u32 %v6290_v19, %v5638_v9  ;;  %v5277_v7 = vor.u32 %v6199_v5, %v5274_v6  ;;  %v6143_v19 = vld [vmem:[%s9346_s8 + $0x74] sm:$0xf] }
 0x259   :  { %v1951_v53 = vadd.f32 %v1950_v23, %v7856_v27  ;;  %v6153_v27 = vld [vmem:[%s9346_s8 + $0xc0] sm:$0xf0]  ;;  %3519 = vmatpush.bf16.msrb.mxu1 %v5217_v16  ;;  %v6192_v16 = vld [vmem:[%s9346_s8 + $0x1fc] sm:$0xf]  ;;  %v6255_v9 = vld [vmem:[%s9346_s8 + $0x3f4] sm:$0xf] }
 0x25a   :  { %v5077_v44 = vor.u32 %v6153_v27, %v5076_v35  ;;  %v6321_v23 = vld [vmem:[%s9346_s8 + $0x600] sm:$0xf0]  ;;  %v5720_v35 = vld [vmem:[%s9346_s8 + $0x5b0] sm:$0xf]  ;;  %v6314_v27 = vld [vmem:[%s9346_s8 + $0x5c8] sm:$0xf0]  ;;  %v5249_v18 = vor.u32 %v6192_v16, %v5246_v17 }
 0x25b   :  { %v7996_v32 = vpack.c.bf16 %v1951_v53, %v1951_v53  ;;  %v5749_v30 = vor.u32 %v6321_v23, %v5748_v22  ;;  %v6171_v53 = vld [vmem:[%s9346_s8 + $0x154] sm:$0xf]  ;;  %v5721_v38 = vor.u32 %v6314_v27, %v5720_v35  ;;  %v5498_v23 = vld [vmem:[%s9346_s8 + $0x40c] sm:$0xf0]  ;;  %v6332_v35 = vld [vmem:[%s9346_s8 + $0x65c] sm:$0xf] }
 0x25c   :  { %3503 = vmatpush.bf16.msrb.mxu0 %v5077_v44  ;;  %v5582_v44 = vld [vmem:[%s9346_s8 + $0x4b4] sm:$0xf0] }
 0x25d   :  { %4986 = vmatmul.msk.bf16.vlgmr.msrb.gmra.mxu3 %vm2011_vm1, %v7996_v32  ;;  %4987 = vmatmul.msk.bf16.vlgmr.msra.gmra.mxu1 %vm2011_vm1, %v7996_v32  ;;  %v5585_v50 = vor.u32 %v6276_v42, %v5582_v44  ;;  %v6325_v42 = vld [vmem:[%s9346_s8 + $0x624] sm:$0xf] }
 0x25e   :  { %4988 = vmatmul.msk.bf16.vlgmr.msra.gmra.mxu2 %vm2011_vm1, %v7996_v32  ;;  %3538 = vmatpush.bf16.msrb.mxu3 %v5861_v39  ;;  %v5165_v39 = vor.u32 %v6171_v53, %v5162_v60  ;;  %v6136_v53 = vld [vmem:[%s9346_s8 + $0x3c] sm:$0xf]  ;;  %v5022_v60 = vld [vmem:[%s9346_s8 + $0x54] sm:$0xf0] }
 0x25f   :  { %3564 = vmatpush.bf16.msra.mxu1 %v5417_v20  ;;  %3577 = vmatpush.bf16.msra.mxu2 %v5641_v29  ;;  %v5050_v20 = vld [vmem:[%s9346_s8 + $0x8c] sm:$0xf0]  ;;  %v5218_v29 = vld [vmem:[%s9346_s8 + $0x1dc] sm:$0xf0]  ;;  %v5025_v31 = vor.u32 %v6136_v53, %v5022_v60  ;;  %v5616_v53 = vld [vmem:[%s9346_s8 + $0x4d8] sm:$0xf] }
 0x260   :  { %3504 = vmatpush.bf16.msrb.mxu0 %v5049_v59  ;;  %v5554_v59 = vld [vmem:[%s9346_s8 + $0x47c] sm:$0xf0]  ;;  %v5053_v22 = vor.u32 %v6143_v19, %v5050_v20  ;;  %v6294_v19 = vld [vmem:[%s9346_s8 + $0x528] sm:$0xf0]  ;;  %v6287_v60 = vld [vmem:[%s9346_s8 + $0x4f0] sm:$0xf0] }
 0x261   :  { %v5557_v2 = vor.u32 %v6269_v55, %v5554_v59  ;;  %v6297_v59 = vld [vmem:[%s9346_s8 + $0x544] sm:$0xf] }
 0x262   :  { %3539 = vmatpush.bf16.msrb.mxu3 %v5833_v48  ;;  %v5137_v48 = vor.u32 %v6164_v40, %v5134_v41  ;;  %v5442_v41 = vld [vmem:[%s9346_s8 + $0x39c] sm:$0xf0]  ;;  %v5669_v62 = vor.u32 %v6297_v59, %v5666_v61  ;;  %v5084_v61 = vld [vmem:[%s9346_s8 + $0xb0] sm:$0xf] }
 0x263   :  { %3565 = vmatpush.bf16.msra.mxu1 %v5389_v34  ;;  %3578 = vmatpush.bf16.msra.mxu2 %v5613_v37  ;;  %v6248_v34 = vld [vmem:[%s9346_s8 + $0x3bc] sm:$0xf]  ;;  %v4994_v37 = vld [vmem:[%s9346_s8 + $0x1c] sm:$0xf0] }
 0x264   :  { %3505 = vmatpush.bf16.msrb.mxu0 %v5021_v11  ;;  %v6262_v11 = vld [vmem:[%s9346_s8 + $0x42c] sm:$0xf]  ;;  %v5473_v27 = vor.u32 %v6248_v34, %v5470_v33  ;;  %v6217_v34 = vld [vmem:[%s9346_s8 + $0x2c0] sm:$0xf0] }
 0x265   :  { %v5529_v57 = vor.u32 %v6262_v11, %v5526_v13  ;;  %v6231_v11 = vld [vmem:[%s9346_s8 + $0x330] sm:$0xf0] }
 0x266   :  { %3540 = vmatpush.bf16.msrb.mxu3 %v5805_v1  ;;  %v5109_v1 = vor.u32 %v6157_v52, %v5106_v54  ;;  %v6304_v52 = vld [vmem:[%s9346_s8 + $0x57c] sm:$0xf]  ;;  %v5694_v54 = vld [vmem:[%s9346_s8 + $0x594] sm:$0xf0]  ;;  %v5393_v17 = vor.u32 %v6231_v11, %v5392_v10 }
 0x267   :  { %3579 = vmatpush.bf16.msra.mxu2 %v5585_v50  ;;  %v5722_v50 = vld [vmem:[%s9346_s8 + $0x5cc] sm:$0xf0]  ;;  %v5697_v55 = vor.u32 %v6304_v52, %v5694_v54  ;;  %v6203_v52 = vld [vmem:[%s9346_s8 + $0x250] sm:$0xf0] }
 0x268   :  { %3506 = vmatpush.bf16.msrb.mxu0 %v4993_v26  ;;  %v5501_v26 = vor.u32 %v6255_v9, %v5498_v23  ;;  %v5364_v9 = vld [vmem:[%s9346_s8 + $0x2e0] sm:$0xf] }
 0x26a   :  { %3541 = vmatpush.bf16.msrb.mxu3 %v5777_v58  ;;  %v5865_v58 = vor.u32 %v6346_v14, %v5862_v15  ;;  %v5196_v15 = vld [vmem:[%s9346_s8 + $0x190] sm:$0xf] }
 0x26b   :  { %3580 = vmatpush.bf16.msra.mxu2 %v5557_v2  ;;  %v5420_v2 = vld [vmem:[%s9346_s8 + $0x350] sm:$0xf] }
 0x26c   :  { %3551 = vmatpush.bf16.msra.mxu0 %v5193_v21  ;;  %v6185_v21 = vld [vmem:[%s9346_s8 + $0x1c4] sm:$0xf] }
 0x26d   :  { %4989 = vmatmul.msk.bf16.vlgmr.msra.gmra.mxu3 %vm2011_vm1, %v7996_v32  ;;  %v5358_v32 = vld [vmem:[%s9346_s8 + $0x2f4] sm:$0xf0] }
 0x26e   :  { %3542 = vmatpush.bf16.msrb.mxu3 %v5749_v30  ;;  %v5361_v43 = vor.u32 %v6220_v36, %v5358_v32  ;;  %v5221_v30 = vor.u32 %v6185_v21, %v5218_v29  ;;  %v5806_v36 = vld [vmem:[%s9346_s8 + $0x674] sm:$0xf0]  ;;  %v6175_v21 = vld [vmem:[%s9346_s8 + $0x170] sm:$0xf0] }
 0x26f   :  { %3581 = vmatpush.bf16.msra.mxu2 %v5529_v57  ;;  %v5809_v32 = vor.u32 %v6332_v35, %v5806_v36  ;;  %v6182_v57 = vld [vmem:[%s9346_s8 + $0x1a8] sm:$0xf0]  ;;  %v5617_v36 = vor.u32 %v6287_v60, %v5616_v53  ;;  %v6252_v60 = vld [vmem:[%s9346_s8 + $0x3d8] sm:$0xf0] }
 0x270   :  { %3552 = vmatpush.bf16.msra.mxu0 %v5165_v39  ;;  %3566 = vmatpush.bf16.msra.mxu1 %v5361_v43  ;;  %v6129_v39 = vld [vmem:[%s9346_s8 + $0x4] sm:$0xf]  ;;  %v5778_v43 = vld [vmem:[%s9346_s8 + $0x63c] sm:$0xf0]  ;;  %v5197_v24 = vor.u32 %v6182_v57, %v5196_v15  ;;  %v5504_v15 = vld [vmem:[%s9346_s8 + $0x3f8] sm:$0xf] }
 0x271   :  { %v4997_v40 = vor.u32 %v6129_v39, %v4994_v37  ;;  %v5781_v45 = vor.u32 %v6325_v42, %v5778_v43  ;;  %v6168_v39 = vld [vmem:[%s9346_s8 + $0x138] sm:$0xf0]  ;;  %v6210_v42 = vld [vmem:[%s9346_s8 + $0x288] sm:$0xf0] }
 0x272   :  { %3543 = vmatpush.bf16.msrb.mxu3 %v5721_v38  ;;  %v6241_v38 = vld [vmem:[%s9346_s8 + $0x384] sm:$0xf] }
 0x273   :  { %3582 = vmatpush.bf16.msra.mxu2 %v5501_v26  ;;  %v5445_v44 = vor.u32 %v6241_v38, %v5442_v41  ;;  %v5588_v38 = vld [vmem:[%s9346_s8 + $0x4a0] sm:$0xf]  ;;  %v5308_v41 = vld [vmem:[%s9346_s8 + $0x270] sm:$0xf] }
 0x274   :  { %3553 = vmatpush.bf16.msra.mxu0 %v5137_v48  ;;  %3567 = vmatpush.bf16.msra.mxu1 %v5333_v56  ;;  %v6311_v48 = vld [vmem:[%s9346_s8 + $0x5b4] sm:$0xf]  ;;  %v8303_v56 = vld [vmem:[%s9345_s7] sm:$0xf] }
 0x275   :  { %v1964_v63 = vperm.slane %v8303_v56, 1  ;;  %v1963_v5 = vperm.slane %v8303_v56, 0  ;;  %v1965_v6 = vperm.slane %v8303_v56, 2 }
 0x276   :  { %3544 = vmatpush.bf16.msrb.mxu3 %v5693_v51  ;;  %v5725_v51 = vor.u32 %v6311_v48, %v5722_v50  ;;  %v5560_v48 = vld [vmem:[%s9346_s8 + $0x468] sm:$0xf]  ;;  %v6273_v50 = vld [vmem:[%s9346_s8 + $0x480] sm:$0xf0] }
 0x277   :  { %3583 = vmatpush.bf16.msra.mxu2 %v5473_v27  ;;  %v5561_v59 = vor.u32 %v6273_v50, %v5560_v48  ;;  %v6221_v50 = vld [vmem:[%s9346_s8 + $0x2e4] sm:$0xf] }
 0x278   :  { %3554 = vmatpush.bf16.msra.mxu0 %v5109_v1  ;;  %3568 = vmatpush.bf16.msra.mxu1 %v5305_v4 }
 0x27a   :  { %3545 = vmatpush.bf16.msrb.mxu3 %v5665_v3  ;;  %v6238_v3 = vld [vmem:[%s9346_s8 + $0x368] sm:$0xf0] }
 0x27b   :  { %3584 = vmatpush.bf16.msra.mxu2 %v5445_v44 }
 0x27c   :  { %3569 = vmatpush.bf16.msra.mxu1 %v5277_v7  ;;  %3555 = vmatpush.bf16.msra.mxu0 %v5081_v12  ;;  %v5421_v7 = vor.u32 %v6238_v3, %v5420_v2  ;;  %v5868_v2 = vld [vmem:[%s9346_s8 + $0x6d0] sm:$0xf]  ;;  %v6350_v3 = vld [vmem:[%s9346_s8 + $0x6e8] sm:$0xf0] }
 0x27e   :  { %3590 = vmatpush.bf16.msra.mxu3 %v5865_v58 }
 0x280   :  { %3570 = vmatpush.bf16.msra.mxu1 %v5249_v18  ;;  %3556 = vmatpush.bf16.msra.mxu0 %v5053_v22  ;;  %v5644_v18 = vld [vmem:[%s9346_s8 + $0x510] sm:$0xf]  ;;  %v6224_v22 = vld [vmem:[%s9346_s8 + $0x2f8] sm:$0xf0] }
 0x281   :  { %v5645_v26 = vor.u32 %v6294_v19, %v5644_v18  ;;  %v5224_v18 = vld [vmem:[%s9346_s8 + $0x1c8] sm:$0xf]  ;;  %v6189_v19 = vld [vmem:[%s9346_s8 + $0x1e0] sm:$0xf0] }
 0x282   :  { %3591 = vmatpush.bf16.msra.mxu3 %v5837_v28  ;;  %v5168_v28 = vld [vmem:[%s9346_s8 + $0x158] sm:$0xf]  ;;  %v5225_v53 = vor.u32 %v6189_v19, %v5224_v18 }
 0x283   :  { %v5169_v35 = vor.u32 %v6175_v21, %v5168_v28  ;;  %v5028_v28 = vld [vmem:[%s9346_s8 + $0x40] sm:$0xf]  ;;  %v6140_v21 = vld [vmem:[%s9346_s8 + $0x58] sm:$0xf0] }
 0x284   :  { %3571 = vmatpush.bf16.msra.mxu1 %v5221_v30  ;;  %3557 = vmatpush.bf16.msra.mxu0 %v5025_v31  ;;  %v5365_v30 = vor.u32 %v6224_v22, %v5364_v9  ;;  %v5336_v31 = vld [vmem:[%s9346_s8 + $0x2a8] sm:$0xf]  ;;  %v6235_v22 = vld [vmem:[%s9346_s8 + $0x354] sm:$0xf] }
 0x285   :  { %v5337_v37 = vor.u32 %v6217_v34, %v5336_v31  ;;  %v5812_v31 = vld [vmem:[%s9346_s8 + $0x660] sm:$0xf]  ;;  %v6336_v34 = vld [vmem:[%s9346_s8 + $0x678] sm:$0xf0] }
 0x286   :  { %3592 = vmatpush.bf16.msra.mxu3 %v5809_v32  ;;  %v5140_v32 = vld [vmem:[%s9346_s8 + $0x120] sm:$0xf] }
 0x287   :  { %v5141_v43 = vor.u32 %v6168_v39, %v5140_v32  ;;  %v5000_v32 = vld [vmem:[%s9346_s8 + $0x8] sm:$0xf] }
 0x288   :  { %3558 = vmatpush.bf16.msra.mxu0 %v4997_v40  ;;  %v6280_v40 = vld [vmem:[%s9346_s8 + $0x4b8] sm:$0xf0] }
 0x289   :  { %v5589_v44 = vor.u32 %v6280_v40, %v5588_v38  ;;  %v6133_v38 = vld [vmem:[%s9346_s8 + $0x20] sm:$0xf0]  ;;  %v5448_v40 = vld [vmem:[%s9346_s8 + $0x388] sm:$0xf] }
 0x28a   :  { %3593 = vmatpush.bf16.msra.mxu3 %v5781_v45  ;;  %v1966_v45 = vperm.slane %v8303_v56, 3  ;;  %v5001_v48 = vor.u32 %v6133_v38, %v5000_v32  ;;  %v6347_v38 = vld [vmem:[%s9346_s8 + $0x6d4] sm:$0xf] }
 0x28e   :  { %3594 = vmatpush.bf16.msra.mxu3 %v5753_v49  ;;  %v5309_v49 = vor.u32 %v6210_v42, %v5308_v41  ;;  %v6245_v41 = vld [vmem:[%s9346_s8 + $0x3a0] sm:$0xf0]  ;;  %v5784_v42 = vld [vmem:[%s9346_s8 + $0x628] sm:$0xf] }
 0x292   :  { %3595 = vmatpush.bf16.msra.mxu3 %v5725_v51  ;;  %v5280_v51 = vld [vmem:[%s9346_s8 + $0x238] sm:$0xf] }
 0x296   :  { %3596 = vmatpush.bf16.msra.mxu3 %v5697_v55  ;;  %v5113_v55 = vor.u32 %v6161_v47, %v5112_v46  ;;  %v5198_v46 = vld [vmem:[%s9346_s8 + $0x1ac] sm:$0xf0]  ;;  %v6291_v47 = vld [vmem:[%s9346_s8 + $0x514] sm:$0xf] }
 0x29a   :  { %3597 = vmatpush.bf16.msra.mxu3 %v5669_v62  ;;  %v6154_v62 = vld [vmem:[%s9346_s8 + $0xc8] sm:$0xf0] }
 0x2da   :  { %v2037_v0 = vpop.f32.mrf.mxu1 }
 0x2db   :  { %v2038_v1 = vadd.f32 %v2037_v0, %v1964_v63  ;;  %v5532_v63 = vld [vmem:[%s9346_s8 + $0x430] sm:$0xf]  ;;  %v5281_v0 = vor.u32 %v6203_v52, %v5280_v51  ;;  %v5366_v51 = vld [vmem:[%s9346_s8 + $0x2fc] sm:$0xf0]  ;;  %v5449_v52 = vor.u32 %v6245_v41, %v5448_v40  ;;  %v6193_v41 = vld [vmem:[%s9346_s8 + $0x204] sm:$0xf] }
 0x2dc   :  { %v5870_v40 = vld [vmem:[%s9346_s8 + $0x6ec] sm:$0xf0] }
 0x2dd   :  { %v2068_v4 = vmax.f32 %v2038_v1, 0.0  ;;  %v6266_v1 = vld [vmem:[%s9346_s8 + $0x448] sm:$0xf0] }
 0x2de   :  { %v5533_v11 = vor.u32 %v6266_v1, %v5532_v63  ;;  %v5369_v63 = vor.u32 %v6221_v50, %v5366_v51  ;;  %v6284_v1 = vld [vmem:[%s9346_s8 + $0x4dc] sm:$0xf]  ;;  %v5506_v51 = vld [vmem:[%s9346_s8 + $0x414] sm:$0xf0] }
 0x2df   :  { %v8320_v8 = vpack.c.bf16 %v2068_v4, %v2068_v4  ;;  %v6256_v50 = vld [vmem:[%s9346_s8 + $0x3fc] sm:$0xf] }
 0x2e0   :  { %v2024_v12 = vpop.f32.mrf.mxu3 }
 0x2e1   :  { %v2025_v13 = vadd.f32 %v2024_v12, %v1963_v5  ;;  %v2050_v14 = vpop.f32.mrf.mxu2  ;;  %3520 = vmatmul.bf16.vlgmr.msrb.gmra.mxu1 %v8320_v8  ;;  %v5252_v5 = vld [vmem:[%s9346_s8 + $0x200] sm:$0xf]  ;;  %v5869_v12 = vor.u32 %v6350_v3, %v5868_v2  ;;  %v5618_v2 = vld [vmem:[%s9346_s8 + $0x4f4] sm:$0xf0]  ;;  %v6214_v3 = vld [vmem:[%s9346_s8 + $0x2ac] sm:$0xf] }
 0x2e2   :  { %v2051_v58 = vadd.f32 %v2050_v14, %v1965_v6  ;;  %3616 = vmatpush.bf16.msrb.mxu1 %v5421_v7  ;;  %v2039_v16 = vpop.f32.mrf.mxu1  ;;  %v6196_v6 = vld [vmem:[%s9346_s8 + $0x218] sm:$0xf0]  ;;  %v5085_v7 = vor.u32 %v6154_v62, %v5084_v61  ;;  %v6147_v14 = vld [vmem:[%s9346_s8 + $0x90] sm:$0xf0]  ;;  %v6322_v61 = vld [vmem:[%s9346_s8 + $0x608] sm:$0xf0] }
 0x2e3   :  { %v2067_v20 = vmax.f32 %v2025_v13, 0.0  ;;  %v5056_v13 = vld [vmem:[%s9346_s8 + $0x78] sm:$0xf]  ;;  %v5253_v57 = vor.u32 %v6196_v6, %v5252_v5  ;;  %v6172_v62 = vld [vmem:[%s9346_s8 + $0x15c] sm:$0xf] }
 0x2e4   :  { %v2069_v23 = vmax.f32 %v2051_v58, 0.0  ;;  %v6259_v58 = vld [vmem:[%s9346_s8 + $0x410] sm:$0xf0]  ;;  %v5840_v16 = vld [vmem:[%s9346_s8 + $0x698] sm:$0xf]  ;;  %v5057_v9 = vor.u32 %v6147_v14, %v5056_v13 }
 0x2e5   :  { %v8347_v25 = vpack.c.bf16 %v2067_v20, %v2067_v20  ;;  %v6165_v13 = vld [vmem:[%s9346_s8 + $0x124] sm:$0xf] }
 0x2e6   :  { %v8355_v29 = vpack.c.bf16 %v2069_v23, %v2069_v23  ;;  %3617 = vmatpush.bf16.msrb.mxu1 %v5393_v17  ;;  %v6343_v17 = vld [vmem:[%s9346_s8 + $0x6b0] sm:$0xf0]  ;;  %v5422_v23 = vld [vmem:[%s9346_s8 + $0x36c] sm:$0xf0] }
 0x2e7   :  { %3507 = vmatmul.bf16.vlgmr.msrb.gmra.mxu0 %v8347_v25 }
 0x2e8   :  { %3533 = vmatmul.bf16.vlgmr.msrb.gmra.mxu2 %v8355_v29  ;;  %3603 = vmatpush.bf16.msrb.mxu0 %v5197_v24  ;;  %v2026_v33 = vpop.f32.mrf.mxu3  ;;  %v5505_v24 = vor.u32 %v6259_v58, %v5504_v15  ;;  %v5142_v15 = vld [vmem:[%s9346_s8 + $0x13c] sm:$0xf0] }
 0x2e9   :  { %3629 = vmatpush.bf16.msrb.mxu2 %v5645_v26  ;;  %v2052_v27 = vpop.f32.mrf.mxu2  ;;  %v5841_v26 = vor.u32 %v6343_v17, %v5840_v16  ;;  %v5425_v33 = vor.u32 %v6235_v22, %v5422_v23  ;;  %v5590_v58 = vld [vmem:[%s9346_s8 + $0x4bc] sm:$0xf0]  ;;  %v6207_v16 = vld [vmem:[%s9346_s8 + $0x274] sm:$0xf]  ;;  %v5310_v17 = vld [vmem:[%s9346_s8 + $0x28c] sm:$0xf0]  ;;  %v5145_v19 = vor.u32 %v6165_v13, %v5142_v15 }
 0x2ea   :  { %3618 = vmatpush.bf16.msrb.mxu1 %v5365_v30  ;;  %v5476_v30 = vld [vmem:[%s9346_s8 + $0x3c0] sm:$0xf]  ;;  %v6228_v27 = vld [vmem:[%s9346_s8 + $0x31c] sm:$0xf]  ;;  %v6158_v23 = vld [vmem:[%s9346_s8 + $0xec] sm:$0xf] }
 0x2eb   :  { %v5477_v39 = vor.u32 %v6252_v60, %v5476_v30  ;;  %v6308_v22 = vld [vmem:[%s9346_s8 + $0x598] sm:$0xf0] }
 0x2ec   :  { %3604 = vmatpush.bf16.msrb.mxu0 %v5169_v35  ;;  %v5029_v35 = vor.u32 %v6140_v21, %v5028_v28  ;;  %v6270_v28 = vld [vmem:[%s9346_s8 + $0x46c] sm:$0xf]  ;;  %v5562_v21 = vld [vmem:[%s9346_s8 + $0x484] sm:$0xf0]  ;;  %v6200_v30 = vld [vmem:[%s9346_s8 + $0x23c] sm:$0xf] }
 0x2ed   :  { %3630 = vmatpush.bf16.msrb.mxu2 %v5617_v36  ;;  %v5394_v36 = vld [vmem:[%s9346_s8 + $0x334] sm:$0xf0]  ;;  %v6232_v13 = vld [vmem:[%s9346_s8 + $0x338] sm:$0xf0] }
 0x2ee   :  { %3619 = vmatpush.bf16.msrb.mxu1 %v5337_v37  ;;  %v5813_v37 = vor.u32 %v6336_v34, %v5812_v31  ;;  %v5672_v31 = vld [vmem:[%s9346_s8 + $0x548] sm:$0xf] }
 0x2f0   :  { %3605 = vmatpush.bf16.msrb.mxu0 %v5141_v43  ;;  %v2063_v54 = vpop.f32.mrf.mxu3  ;;  %v6329_v43 = vld [vmem:[%s9346_s8 + $0x640] sm:$0xf0] }
 0x2f1   :  { %3631 = vmatpush.bf16.msrb.mxu2 %v5589_v44  ;;  %v2064_v56 = vadd.f32 %v2063_v54, %v1966_v45  ;;  %3572 = vmatmul.bf16.vlgmr.msra.gmra.mxu1 %v8320_v8  ;;  %v6179_v44 = vld [vmem:[%s9346_s8 + $0x194] sm:$0xf]  ;;  %v5397_v45 = vor.u32 %v6228_v27, %v5394_v36  ;;  %v5785_v54 = vor.u32 %v6329_v43, %v5784_v42  ;;  %v5086_v36 = vld [vmem:[%s9346_s8 + $0xcc] sm:$0xf0]  ;;  %v5254_v42 = vld [vmem:[%s9346_s8 + $0x21c] sm:$0xf0] }
 0x2f2   :  { %3620 = vmatpush.bf16.msrb.mxu1 %v5309_v49  ;;  %v5646_v49 = vld [vmem:[%s9346_s8 + $0x52c] sm:$0xf0]  ;;  %v6151_v27 = vld [vmem:[%s9346_s8 + $0xb4] sm:$0xf] }
 0x2f3   :  { %v2070_v4 = vmax.f32 %v2064_v56, 0.0  ;;  %v5649_v56 = vor.u32 %v6291_v47, %v5646_v49  ;;  %v5058_v47 = vld [vmem:[%s9346_s8 + $0x94] sm:$0xf0]  ;;  %v5873_v49 = vor.u32 %v6347_v38, %v5870_v40  ;;  %v5344_v38 = vld [vmem:[%s9346_s8 + $0x2b0] sm:$0xf] }
 0x2f4   :  { %3606 = vmatpush.bf16.msrb.mxu0 %v5113_v55  ;;  %v5201_v55 = vor.u32 %v6179_v44, %v5198_v46  ;;  %v5089_v44 = vor.u32 %v6151_v27, %v5086_v36  ;;  %v6144_v46 = vld [vmem:[%s9346_s8 + $0x7c] sm:$0xf]  ;;  %v5176_v36 = vld [vmem:[%s9346_s8 + $0x160] sm:$0xf]  ;;  %v6218_v40 = vld [vmem:[%s9346_s8 + $0x2c8] sm:$0xf0] }
 0x2f5   :  { %v8433_v10 = vpack.c.bf16 %v2070_v4, %v2070_v4  ;;  %3632 = vmatpush.bf16.msrb.mxu2 %v5561_v59  ;;  %v5756_v59 = vld [vmem:[%s9346_s8 + $0x5f0] sm:$0xf]  ;;  %v5338_v4 = vld [vmem:[%s9346_s8 + $0x2c4] sm:$0xf0] }
 0x2f6   :  { %3621 = vmatpush.bf16.msrb.mxu1 %v5281_v0  ;;  %v5170_v0 = vld [vmem:[%s9346_s8 + $0x174] sm:$0xf0]  ;;  %v5757_v5 = vor.u32 %v6322_v61, %v5756_v59  ;;  %v5341_v14 = vor.u32 %v6214_v3, %v5338_v4  ;;  %v6239_v61 = vld [vmem:[%s9346_s8 + $0x370] sm:$0xf0]  ;;  %v5030_v3 = vld [vmem:[%s9346_s8 + $0x5c] sm:$0xf0] }
 0x2f7   :  { %3546 = vmatmul.bf16.vlgmr.msrb.gmra.mxu3 %v8433_v10  ;;  %3559 = vmatmul.bf16.vlgmr.msra.gmra.mxu0 %v8347_v25  ;;  %v5173_v6 = vor.u32 %v6172_v62, %v5170_v0  ;;  %v5428_v59 = vld [vmem:[%s9346_s8 + $0x358] sm:$0xf]  ;;  %v5061_v62 = vor.u32 %v6144_v46, %v5058_v47  ;;  %v6137_v0 = vld [vmem:[%s9346_s8 + $0x44] sm:$0xf]  ;;  %v5345_v46 = vor.u32 %v6218_v40, %v5344_v38  ;;  %v5148_v47 = vld [vmem:[%s9346_s8 + $0x128] sm:$0xf] }
 0x2f8   :  { %3585 = vmatmul.bf16.vlgmr.msra.gmra.mxu2 %v8355_v29  ;;  %3607 = vmatpush.bf16.msrb.mxu0 %v5085_v7  ;;  %v2065_v20 = vpop.f32.mrf.mxu3  ;;  %v5621_v7 = vor.u32 %v6284_v1, %v5618_v2  ;;  %v6249_v4 = vld [vmem:[%s9346_s8 + $0x3c4] sm:$0xf]  ;;  %v5484_v38 = vld [vmem:[%s9346_s8 + $0x3c8] sm:$0xf] }
 0x2f9   :  { %3633 = vmatpush.bf16.msrb.mxu2 %v5533_v11  ;;  %3642 = vmatpush.bf16.msrb.mxu3 %v5869_v12  ;;  %v5728_v11 = vld [vmem:[%s9346_s8 + $0x5b8] sm:$0xf]  ;;  %v6315_v12 = vld [vmem:[%s9346_s8 + $0x5d0] sm:$0xf0] }
 0x2fa   :  { %3622 = vmatpush.bf16.msrb.mxu1 %v5253_v57  ;;  %v6277_v57 = vld [vmem:[%s9346_s8 + $0x4a4] sm:$0xf]  ;;  %v5729_v18 = vor.u32 %v6315_v12, %v5728_v11  ;;  %v5814_v11 = vld [vmem:[%s9346_s8 + $0x67c] sm:$0xf0] }
 0x2fb   :  { %v5593_v20 = vor.u32 %v6277_v57, %v5590_v58  ;;  %v5400_v12 = vld [vmem:[%s9346_s8 + $0x320] sm:$0xf]  ;;  %v6130_v57 = vld [vmem:[%s9346_s8 + $0xc] sm:$0xf]  ;;  %v5002_v58 = vld [vmem:[%s9346_s8 + $0x24] sm:$0xf0] }
 0x2fc   :  { %3608 = vmatpush.bf16.msrb.mxu0 %v5057_v9  ;;  %v5700_v9 = vld [vmem:[%s9346_s8 + $0x580] sm:$0xf] }
 0x2fd   :  { %3634 = vmatpush.bf16.msrb.mxu2 %v5505_v24  ;;  %3643 = vmatpush.bf16.msrb.mxu3 %v5841_v26  ;;  %v5313_v24 = vor.u32 %v6207_v16, %v5310_v17  ;;  %v5114_v26 = vld [vmem:[%s9346_s8 + $0x104] sm:$0xf0]  ;;  %v5701_v60 = vor.u32 %v6308_v22, %v5700_v9  ;;  %v6242_v16 = vld [vmem:[%s9346_s8 + $0x38c] sm:$0xf]  ;;  %v5401_v9 = vor.u32 %v6232_v13, %v5400_v12  ;;  %v5204_v22 = vld [vmem:[%s9346_s8 + $0x198] sm:$0xf] }
 0x2fe   :  { %3623 = vmatpush.bf16.msrb.mxu1 %v5225_v53  ;;  %v5282_v53 = vld [vmem:[%s9346_s8 + $0x254] sm:$0xf0]  ;;  %v5117_v34 = vor.u32 %v6158_v23, %v5114_v26  ;;  %v6183_v23 = vld [vmem:[%s9346_s8 + $0x1b0] sm:$0xf0] }
 0x2ff   :  { %v5285_v32 = vor.u32 %v6200_v30, %v5282_v53  ;;  %v6295_v26 = vld [vmem:[%s9346_s8 + $0x530] sm:$0xf0]  ;;  %v5005_v30 = vor.u32 %v6130_v57, %v5002_v58  ;;  %v5540_v57 = vld [vmem:[%s9346_s8 + $0x438] sm:$0xf] }
 0x300   :  { %3609 = vmatpush.bf16.msrb.mxu0 %v5029_v35  ;;  %v6301_v35 = vld [vmem:[%s9346_s8 + $0x560] sm:$0xf0]  ;;  %v6267_v58 = vld [vmem:[%s9346_s8 + $0x450] sm:$0xf0] }
 0x301   :  { %3635 = vmatpush.bf16.msrb.mxu2 %v5477_v39  ;;  %3644 = vmatpush.bf16.msrb.mxu3 %v5813_v37  ;;  %v6263_v39 = vld [vmem:[%s9346_s8 + $0x434] sm:$0xf]  ;;  %v5534_v37 = vld [vmem:[%s9346_s8 + $0x44c] sm:$0xf0]  ;;  %v5673_v43 = vor.u32 %v6301_v35, %v5672_v31  ;;  %v5205_v31 = vor.u32 %v6183_v23, %v5204_v22  ;;  %v5541_v22 = vor.u32 %v6267_v58, %v5540_v57  ;;  %v6285_v57 = vld [vmem:[%s9346_s8 + $0x4e4] sm:$0xf] }
 0x302   :  { %3668 = vmatpush.bf16.msra.mxu1 %v5425_v33  ;;  %v5565_v33 = vor.u32 %v6270_v28, %v5562_v21  ;;  %v5372_v28 = vld [vmem:[%s9346_s8 + $0x2e8] sm:$0xf]  ;;  %v6225_v21 = vld [vmem:[%s9346_s8 + $0x300] sm:$0xf0]  ;;  %v5626_v58 = vld [vmem:[%s9346_s8 + $0x4fc] sm:$0xf0] }
 0x303   :  { %3624 = vmatmul.bf16.vlgmr.msrb.gmra.mxu1 %v8320_v8  ;;  %v5373_v27 = vor.u32 %v6225_v21, %v5372_v28  ;;  %v5512_v28 = vld [vmem:[%s9346_s8 + $0x400] sm:$0xf] }
 0x304   :  { %3610 = vmatpush.bf16.msrb.mxu0 %v5001_v48  ;;  %v5257_v48 = vor.u32 %v6193_v41, %v5254_v42 }
 0x305   :  { %3636 = vmatpush.bf16.msrb.mxu2 %v5449_v52  ;;  %3645 = vmatpush.bf16.msrb.mxu3 %v5785_v54  ;;  %v6340_v52 = vld [vmem:[%s9346_s8 + $0x69c] sm:$0xf]  ;;  %v5842_v54 = vld [vmem:[%s9346_s8 + $0x6b4] sm:$0xf0] }
 0x306   :  { %3669 = vmatpush.bf16.msra.mxu1 %v5397_v45  ;;  %v5537_v45 = vor.u32 %v6263_v39, %v5534_v37  ;;  %v5845_v1 = vor.u32 %v6340_v52, %v5842_v54  ;;  %v5624_v39 = vld [vmem:[%s9346_s8 + $0x4e0] sm:$0xf]  ;;  %v6288_v37 = vld [vmem:[%s9346_s8 + $0x4f8] sm:$0xf0]  ;;  %v6211_v52 = vld [vmem:[%s9346_s8 + $0x290] sm:$0xf0] }
 0x307   :  { %3598 = vmatmul.bf16.vlgmr.msra.gmra.mxu3 %v8433_v10  ;;  %3611 = vmatmul.bf16.vlgmr.msrb.gmra.mxu0 %v8347_v25 }
 0x308   :  { %3655 = vmatpush.bf16.msra.mxu0 %v5201_v55  ;;  %3637 = vmatmul.bf16.vlgmr.msrb.gmra.mxu2 %v8355_v29  ;;  %v6186_v55 = vld [vmem:[%s9346_s8 + $0x1cc] sm:$0xf] }
 0x309   :  { %3681 = vmatpush.bf16.msra.mxu2 %v5649_v56  ;;  %3646 = vmatpush.bf16.msrb.mxu3 %v5757_v5  ;;  %v5226_v56 = vld [vmem:[%s9346_s8 + $0x1e4] sm:$0xf0]  ;;  %v5478_v5 = vld [vmem:[%s9346_s8 + $0x3dc] sm:$0xf0] }
 0x30a   :  { %3670 = vmatpush.bf16.msra.mxu1 %v5369_v63  ;;  %v5509_v63 = vor.u32 %v6256_v50, %v5506_v51  ;;  %v5229_v2 = vor.u32 %v6186_v55, %v5226_v56  ;;  %v5481_v15 = vor.u32 %v6249_v4, %v5478_v5  ;;  %v6281_v50 = vld [vmem:[%s9346_s8 + $0x4c0] sm:$0xf0]  ;;  %v5316_v51 = vld [vmem:[%s9346_s8 + $0x278] sm:$0xf]  ;;  %v6204_v4 = vld [vmem:[%s9346_s8 + $0x258] sm:$0xf0] }
 0x30b   :  { %v6305_v56 = vld [vmem:[%s9346_s8 + $0x584] sm:$0xf] }
 0x30c   :  { %3656 = vmatpush.bf16.msra.mxu0 %v5173_v6  ;;  %v5429_v6 = vor.u32 %v6239_v61, %v5428_v59  ;;  %v5702_v59 = vld [vmem:[%s9346_s8 + $0x59c] sm:$0xf0] }
 0x30d   :  { %3682 = vmatpush.bf16.msra.mxu2 %v5621_v7  ;;  %3647 = vmatpush.bf16.msrb.mxu3 %v5729_v18  ;;  %v6333_v7 = vld [vmem:[%s9346_s8 + $0x664] sm:$0xf]  ;;  %v5450_v18 = vld [vmem:[%s9346_s8 + $0x3a4] sm:$0xf0]  ;;  %v5705_v5 = vor.u32 %v6305_v56, %v5702_v59  ;;  %v6330_v56 = vld [vmem:[%s9346_s8 + $0x648] sm:$0xf0] }
 0x30e   :  { %3671 = vmatpush.bf16.msra.mxu1 %v5341_v14  ;;  %v5033_v14 = vor.u32 %v6137_v0, %v5030_v3  ;;  %v5817_v17 = vor.u32 %v6333_v7, %v5814_v11  ;;  %v5453_v53 = vor.u32 %v6242_v16, %v5450_v18  ;;  %v6162_v0 = vld [vmem:[%s9346_s8 + $0x108] sm:$0xf0]  ;;  %v5288_v3 = vld [vmem:[%s9346_s8 + $0x240] sm:$0xf]  ;;  %v5674_v11 = vld [vmem:[%s9346_s8 + $0x564] sm:$0xf0] }
 0x30f   :  { %v6298_v7 = vld [vmem:[%s9346_s8 + $0x54c] sm:$0xf]  ;;  %v5289_v13 = vor.u32 %v6204_v4, %v5288_v3  ;;  %v5876_v16 = vld [vmem:[%s9346_s8 + $0x6d8] sm:$0xf]  ;;  %v5260_v18 = vld [vmem:[%s9346_s8 + $0x208] sm:$0xf] }
 0x310   :  { %3657 = vmatpush.bf16.msra.mxu0 %v5145_v19  ;;  %v6326_v19 = vld [vmem:[%s9346_s8 + $0x62c] sm:$0xf]  ;;  %v6180_v59 = vld [vmem:[%s9346_s8 + $0x19c] sm:$0xf]  ;;  %v5374_v3 = vld [vmem:[%s9346_s8 + $0x304] sm:$0xf0] }
 0x311   :  { %3683 = vmatpush.bf16.msra.mxu2 %v5593_v20  ;;  %3648 = vmatpush.bf16.msrb.mxu3 %v5701_v60  ;;  %v5786_v20 = vld [vmem:[%s9346_s8 + $0x644] sm:$0xf0] }
 0x312   :  { %3672 = vmatpush.bf16.msra.mxu1 %v5313_v24  ;;  %v5652_v24 = vld [vmem:[%s9346_s8 + $0x518] sm:$0xf]  ;;  %v5789_v60 = vor.u32 %v6326_v19, %v5786_v20  ;;  %v6197_v19 = vld [vmem:[%s9346_s8 + $0x220] sm:$0xf0]  ;;  %v5677_v20 = vor.u32 %v6298_v7, %v5674_v11 }
 0x313   :  { %v5653_v35 = vor.u32 %v6295_v26, %v5652_v24  ;;  %v5064_v24 = vld [vmem:[%s9346_s8 + $0x80] sm:$0xf]  ;;  %v6148_v26 = vld [vmem:[%s9346_s8 + $0x98] sm:$0xf0]  ;;  %v5261_v21 = vor.u32 %v6197_v19, %v5260_v18  ;;  %v5764_v11 = vld [vmem:[%s9346_s8 + $0x5f8] sm:$0xf] }
 0x314   :  { %3658 = vmatpush.bf16.msra.mxu0 %v5117_v34  ;;  %v6319_v34 = vld [vmem:[%s9346_s8 + $0x5f4] sm:$0xf] }
 0x315   :  { %3684 = vmatpush.bf16.msra.mxu2 %v5565_v33  ;;  %3649 = vmatpush.bf16.msrb.mxu3 %v5673_v43  ;;  %v5758_v33 = vld [vmem:[%s9346_s8 + $0x60c] sm:$0xf0]  ;;  %v6312_v43 = vld [vmem:[%s9346_s8 + $0x5bc] sm:$0xf] }
 0x316   :  { %3673 = vmatpush.bf16.msra.mxu1 %v5285_v32  ;;  %v6176_v32 = vld [vmem:[%s9346_s8 + $0x178] sm:$0xf0]  ;;  %v5761_v41 = vor.u32 %v6319_v34, %v5758_v33  ;;  %v6190_v34 = vld [vmem:[%s9346_s8 + $0x1e8] sm:$0xf0]  ;;  %v5065_v33 = vor.u32 %v6148_v26, %v5064_v24  ;;  %v5150_v26 = vld [vmem:[%s9346_s8 + $0x144] sm:$0xf0] }
 0x317   :  { %v5177_v42 = vor.u32 %v6176_v32, %v5176_v36 }
 0x318   :  { %3659 = vmatpush.bf16.msra.mxu0 %v5089_v44  ;;  %3650 = vmatmul.bf16.vlgmr.msrb.gmra.mxu3 %v8433_v10  ;;  %v5730_v44 = vld [vmem:[%s9346_s8 + $0x5d4] sm:$0xf0] }
 0x319   :  { %3685 = vmatpush.bf16.msra.mxu2 %v5537_v45  ;;  %3694 = vmatpush.bf16.msra.mxu3 %v5873_v49  ;;  %v5625_v45 = vor.u32 %v6288_v37, %v5624_v39  ;;  %v6169_v49 = vld [vmem:[%s9346_s8 + $0x140] sm:$0xf0]  ;;  %v5733_v54 = vor.u32 %v6312_v43, %v5730_v44  ;;  %v5036_v39 = vld [vmem:[%s9346_s8 + $0x48] sm:$0xf] }
 0x31a   :  { %3674 = vmatpush.bf16.msra.mxu1 %v5257_v48  ;;  %v5596_v48 = vld [vmem:[%s9346_s8 + $0x4a8] sm:$0xf]  ;;  %v5149_v55 = vor.u32 %v6169_v49, %v5148_v47  ;;  %v6141_v37 = vld [vmem:[%s9346_s8 + $0x60] sm:$0xf0]  ;;  %v5402_v47 = vld [vmem:[%s9346_s8 + $0x33c] sm:$0xf0] }
 0x31b   :  { %v5597_v61 = vor.u32 %v6281_v50, %v5596_v48  ;;  %v6337_v43 = vld [vmem:[%s9346_s8 + $0x680] sm:$0xf0]  ;;  %v5008_v49 = vld [vmem:[%s9346_s8 + $0x10] sm:$0xf] }
 0x31c   :  { %3660 = vmatpush.bf16.msra.mxu0 %v5061_v62  ;;  %v5317_v62 = vor.u32 %v6211_v52, %v5316_v51  ;;  %v6134_v51 = vld [vmem:[%s9346_s8 + $0x28] sm:$0xf0]  ;;  %v5456_v52 = vld [vmem:[%s9346_s8 + $0x390] sm:$0xf] }
 0x31d   :  { %3686 = vmatpush.bf16.msra.mxu2 %v5509_v63  ;;  %3695 = vmatpush.bf16.msra.mxu3 %v5845_v1  ;;  %v5120_v63 = vld [vmem:[%s9346_s8 + $0xf0] sm:$0xf] }
 0x31e   :  { %3675 = vmatpush.bf16.msra.mxu1 %v5229_v2  ;;  %v5568_v1 = vld [vmem:[%s9346_s8 + $0x470] sm:$0xf]  ;;  %v6274_v2 = vld [vmem:[%s9346_s8 + $0x488] sm:$0xf0] }
 0x31f   :  { %v5569_v12 = vor.u32 %v6274_v2, %v5568_v1  ;;  %v5009_v1 = vor.u32 %v6134_v51, %v5008_v49  ;;  %v6222_v2 = vld [vmem:[%s9346_s8 + $0x2ec] sm:$0xf]  ;;  %v6348_v51 = vld [vmem:[%s9346_s8 + $0x6dc] sm:$0xf] }
 0x320   :  { %3661 = vmatpush.bf16.msra.mxu0 %v5033_v14  ;;  %v5092_v14 = vld [vmem:[%s9346_s8 + $0xb8] sm:$0xf] }
 0x321   :  { %3687 = vmatpush.bf16.msra.mxu2 %v5481_v15  ;;  %3696 = vmatpush.bf16.msra.mxu3 %v5817_v17  ;;  %v6155_v15 = vld [vmem:[%s9346_s8 + $0xd0] sm:$0xf0] }
 0x322   :  { %3720 = vmatpush.bf16.msrb.mxu1 %v5429_v6  ;;  %v5121_v6 = vor.u32 %v6162_v0, %v5120_v63  ;;  %v6351_v17 = vld [vmem:[%s9346_s8 + $0x6f0] sm:$0xf0]  ;;  %v6292_v63 = vld [vmem:[%s9346_s8 + $0x51c] sm:$0xf]  ;;  %v5654_v0 = vld [vmem:[%s9346_s8 + $0x534] sm:$0xf0] }
 0x323   :  { %3676 = vmatmul.bf16.vlgmr.msra.gmra.mxu1 %v8320_v8  ;;  %v5877_v23 = vor.u32 %v6351_v17, %v5876_v16  ;;  %v5657_v7 = vor.u32 %v6292_v63, %v5654_v0  ;;  %v6215_v16 = vld [vmem:[%s9346_s8 + $0x2b4] sm:$0xf]  ;;  %v5346_v17 = vld [vmem:[%s9346_s8 + $0x2cc] sm:$0xf0]  ;;  %v5066_v63 = vld [vmem:[%s9346_s8 + $0x9c] sm:$0xf0] }
 0x324   :  { %3662 = vmatpush.bf16.msra.mxu0 %v5005_v30  ;;  %v6260_v30 = vld [vmem:[%s9346_s8 + $0x418] sm:$0xf0]  ;;  %v5349_v24 = vor.u32 %v6215_v16, %v5346_v17  ;;  %v5038_v16 = vld [vmem:[%s9346_s8 + $0x64] sm:$0xf0]  ;;  %v6250_v17 = vld [vmem:[%s9346_s8 + $0x3cc] sm:$0xf] }
 0x325   :  { %3688 = vmatpush.bf16.msra.mxu2 %v5453_v53  ;;  %3697 = vmatpush.bf16.msra.mxu3 %v5789_v60  ;;  %v5848_v53 = vld [vmem:[%s9346_s8 + $0x6a0] sm:$0xf]  ;;  %v6344_v60 = vld [vmem:[%s9346_s8 + $0x6b8] sm:$0xf0]  ;;  %v5513_v36 = vor.u32 %v6260_v30, %v5512_v28  ;;  %v6278_v28 = vld [vmem:[%s9346_s8 + $0x4ac] sm:$0xf] }
 0x326   :  { %3721 = vmatpush.bf16.msrb.mxu1 %v5401_v9  ;;  %v5093_v9 = vor.u32 %v6155_v15, %v5092_v14  ;;  %v5849_v32 = vor.u32 %v6344_v60, %v5848_v53  ;;  %v5377_v14 = vor.u32 %v6222_v2, %v5374_v3  ;;  %v5178_v15 = vld [vmem:[%s9346_s8 + $0x17c] sm:$0xf0]  ;;  %v6208_v30 = vld [vmem:[%s9346_s8 + $0x27c] sm:$0xf]  ;;  %v5318_v53 = vld [vmem:[%s9346_s8 + $0x294] sm:$0xf0] }
 0x327   :  { %3663 = vmatmul.bf16.vlgmr.msra.gmra.mxu0 %v8347_v25  ;;  %v6257_v2 = vld [vmem:[%s9346_s8 + $0x404] sm:$0xf]  ;;  %v5514_v3 = vld [vmem:[%s9346_s8 + $0x41c] sm:$0xf0] }
 0x328   :  { %3707 = vmatpush.bf16.msrb.mxu0 %v5205_v31  ;;  %3689 = vmatmul.bf16.vlgmr.msra.gmra.mxu2 %v8355_v29  ;;  %v5232_v31 = vld [vmem:[%s9346_s8 + $0x1d0] sm:$0xf] }
 0x329   :  { %3733 = vmatpush.bf16.msrb.mxu2 %v5653_v35  ;;  %3698 = vmatpush.bf16.msra.mxu3 %v5761_v41  ;;  %v6236_v35 = vld [vmem:[%s9346_s8 + $0x35c] sm:$0xf]  ;;  %v5233_v40 = vor.u32 %v6190_v34, %v5232_v31  ;;  %v6253_v41 = vld [vmem:[%s9346_s8 + $0x3e0] sm:$0xf0] }
 0x32a   :  { %3722 = vmatpush.bf16.msrb.mxu1 %v5373_v27  ;;  %v5430_v27 = vld [vmem:[%s9346_s8 + $0x374] sm:$0xf0]  ;;  %v5485_v48 = vor.u32 %v6253_v41, %v5484_v38  ;;  %v6201_v38 = vld [vmem:[%s9346_s8 + $0x244] sm:$0xf] }
 0x32b   :  { %v5433_v44 = vor.u32 %v6236_v35, %v5430_v27  ;;  %v6309_v35 = vld [vmem:[%s9346_s8 + $0x5a0] sm:$0xf0]  ;;  %v6159_v27 = vld [vmem:[%s9346_s8 + $0xf4] sm:$0xf] }
 0x32c   :  { %3708 = vmatpush.bf16.msrb.mxu0 %v5177_v42  ;;  %v5820_v42 = vld [vmem:[%s9346_s8 + $0x668] sm:$0xf] }
 0x32d   :  { %3734 = vmatpush.bf16.msrb.mxu2 %v5625_v45  ;;  %3699 = vmatpush.bf16.msra.mxu3 %v5733_v54  ;;  %v5037_v45 = vor.u32 %v6141_v37, %v5036_v39  ;;  %v5821_v50 = vor.u32 %v6337_v43, %v5820_v42  ;;  %v6246_v54 = vld [vmem:[%s9346_s8 + $0x3a8] sm:$0xf0]  ;;  %v6271_v39 = vld [vmem:[%s9346_s8 + $0x474] sm:$0xf]  ;;  %v5570_v37 = vld [vmem:[%s9346_s8 + $0x48c] sm:$0xf0] }
 0x32e   :  { %3723 = vmatpush.bf16.msrb.mxu1 %v5345_v46  ;;  %v6229_v46 = vld [vmem:[%s9346_s8 + $0x324] sm:$0xf]  ;;  %v5457_v4 = vor.u32 %v6246_v54, %v5456_v52  ;;  %v5680_v42 = vld [vmem:[%s9346_s8 + $0x550] sm:$0xf]  ;;  %v5878_v52 = vld [vmem:[%s9346_s8 + $0x6f4] sm:$0xf0] }
 0x32f   :  { %v6194_v54 = vld [vmem:[%s9346_s8 + $0x20c] sm:$0xf]  ;;  %v5881_v0 = vor.u32 %v6348_v51, %v5878_v52  ;;  %v5352_v51 = vld [vmem:[%s9346_s8 + $0x2b8] sm:$0xf]  ;;  %v6219_v52 = vld [vmem:[%s9346_s8 + $0x2d0] sm:$0xf0] }
 0x330   :  { %3709 = vmatpush.bf16.msrb.mxu0 %v5149_v55  ;;  %v5792_v55 = vld [vmem:[%s9346_s8 + $0x630] sm:$0xf] }
 0x331   :  { %3735 = vmatpush.bf16.msrb.mxu2 %v5597_v61  ;;  %3700 = vmatpush.bf16.msra.mxu3 %v5705_v5  ;;  %v5405_v61 = vor.u32 %v6229_v46, %v5402_v47  ;;  %v5793_v5 = vor.u32 %v6330_v56, %v5792_v55  ;;  %v6152_v46 = vld [vmem:[%s9346_s8 + $0xbc] sm:$0xf]  ;;  %v5094_v47 = vld [vmem:[%s9346_s8 + $0xd4] sm:$0xf0]  ;;  %v5262_v55 = vld [vmem:[%s9346_s8 + $0x224] sm:$0xf0] }
 0x332   :  { %3724 = vmatpush.bf16.msrb.mxu1 %v5317_v62  ;;  %v5206_v62 = vld [vmem:[%s9346_s8 + $0x1b4] sm:$0xf0] }
 0x334   :  { %3710 = vmatpush.bf16.msrb.mxu0 %v5121_v6  ;;  %v5209_v6 = vor.u32 %v6180_v59, %v5206_v62  ;;  %v5097_v59 = vor.u32 %v6152_v46, %v5094_v47  ;;  %v6145_v62 = vld [vmem:[%s9346_s8 + $0x84] sm:$0xf]  ;;  %v5184_v47 = vld [vmem:[%s9346_s8 + $0x168] sm:$0xf] }
 0x335   :  { %3736 = vmatpush.bf16.msrb.mxu2 %v5569_v12  ;;  %3701 = vmatpush.bf16.msra.mxu3 %v5677_v20  ;;  %v6323_v12 = vld [vmem:[%s9346_s8 + $0x610] sm:$0xf0]  ;;  %v5629_v20 = vor.u32 %v6285_v57, %v5626_v58 }
 0x336   :  { %3725 = vmatpush.bf16.msrb.mxu1 %v5289_v13  ;;  %v6173_v13 = vld [vmem:[%s9346_s8 + $0x164] sm:$0xf]  ;;  %v5765_v18 = vor.u32 %v6323_v12, %v5764_v11  ;;  %v5436_v11 = vld [vmem:[%s9346_s8 + $0x360] sm:$0xf]  ;;  %v6240_v12 = vld [vmem:[%s9346_s8 + $0x378] sm:$0xf0] }
 0x337   :  { %v5181_v19 = vor.u32 %v6173_v13, %v5178_v15  ;;  %v5069_v13 = vor.u32 %v6145_v62, %v5066_v63  ;;  %v6138_v15 = vld [vmem:[%s9346_s8 + $0x4c] sm:$0xf]  ;;  %v5353_v63 = vor.u32 %v6219_v52, %v5352_v51 }
 0x338   :  { %3711 = vmatpush.bf16.msrb.mxu0 %v5093_v9  ;;  %3702 = vmatmul.bf16.vlgmr.msra.gmra.mxu3 %v8433_v10  ;;  %v5736_v9 = vld [vmem:[%s9346_s8 + $0x5c0] sm:$0xf] }
 0x339   :  { %3737 = vmatpush.bf16.msrb.mxu2 %v5541_v22  ;;  %3746 = vmatpush.bf16.msrb.mxu3 %v5877_v23  ;;  %v6316_v22 = vld [vmem:[%s9346_s8 + $0x5d8] sm:$0xf0]  ;;  %v6166_v23 = vld [vmem:[%s9346_s8 + $0x12c] sm:$0xf] }
 0x33a   :  { %3726 = vmatpush.bf16.msrb.mxu1 %v5261_v21  ;;  %v5598_v21 = vld [vmem:[%s9346_s8 + $0x4c4] sm:$0xf0]  ;;  %v5737_v60 = vor.u32 %v6316_v22, %v5736_v9  ;;  %v5153_v31 = vor.u32 %v6166_v23, %v5150_v26  ;;  %v6233_v23 = vld [vmem:[%s9346_s8 + $0x340] sm:$0xf0] }
 0x33b   :  { %v5601_v34 = vor.u32 %v6278_v28, %v5598_v21  ;;  %v5822_v9 = vld [vmem:[%s9346_s8 + $0x684] sm:$0xf0]  ;;  %v6131_v28 = vld [vmem:[%s9346_s8 + $0x14] sm:$0xf]  ;;  %v5010_v21 = vld [vmem:[%s9346_s8 + $0x2c] sm:$0xf0] }
 0x33c   :  { %3712 = vmatpush.bf16.msrb.mxu0 %v5065_v33  ;;  %v5708_v33 = vld [vmem:[%s9346_s8 + $0x588] sm:$0xf] }
 0x33d   :  { %3738 = vmatpush.bf16.msrb.mxu2 %v5513_v36  ;;  %3747 = vmatpush.bf16.msrb.mxu3 %v5849_v32  ;;  %v5321_v36 = vor.u32 %v6208_v30, %v5318_v53  ;;  %v5122_v32 = vld [vmem:[%s9346_s8 + $0x10c] sm:$0xf0]  ;;  %v5709_v41 = vor.u32 %v6309_v35, %v5708_v33  ;;  %v5408_v22 = vld [vmem:[%s9346_s8 + $0x328] sm:$0xf]  ;;  %v6243_v30 = vld [vmem:[%s9346_s8 + $0x394] sm:$0xf] }
 0x33e   :  { %3727 = vmatpush.bf16.msrb.mxu1 %v5233_v40  ;;  %v5290_v40 = vld [vmem:[%s9346_s8 + $0x25c] sm:$0xf0]  ;;  %v5125_v43 = vor.u32 %v6159_v27, %v5122_v32  ;;  %v5409_v33 = vor.u32 %v6233_v23, %v5408_v22  ;;  %v6184_v27 = vld [vmem:[%s9346_s8 + $0x1b8] sm:$0xf0]  ;;  %v6299_v23 = vld [vmem:[%s9346_s8 + $0x554] sm:$0xf] }
 0x33f   :  { %v5293_v49 = vor.u32 %v6201_v38, %v5290_v40  ;;  %v5212_v35 = vld [vmem:[%s9346_s8 + $0x1a0] sm:$0xf]  ;;  %v6296_v32 = vld [vmem:[%s9346_s8 + $0x538] sm:$0xf0]  ;;  %v5013_v38 = vor.u32 %v6131_v28, %v5010_v21 }
 0x340   :  { %3713 = vmatpush.bf16.msrb.mxu0 %v5037_v45  ;;  %v6302_v45 = vld [vmem:[%s9346_s8 + $0x568] sm:$0xf0]  ;;  %v5100_v21 = vld [vmem:[%s9346_s8 + $0xc0] sm:$0xf] }
 0x341   :  { %3739 = vmatpush.bf16.msrb.mxu2 %v5485_v48  ;;  %3748 = vmatpush.bf16.msrb.mxu3 %v5821_v50  ;;  %v6264_v48 = vld [vmem:[%s9346_s8 + $0x43c] sm:$0xf]  ;;  %v5542_v50 = vld [vmem:[%s9346_s8 + $0x454] sm:$0xf0]  ;;  %v5681_v56 = vor.u32 %v6302_v45, %v5680_v42  ;;  %v5213_v42 = vor.u32 %v6184_v27, %v5212_v35  ;;  %v6198_v35 = vld [vmem:[%s9346_s8 + $0x228] sm:$0xf0] }
 0x342   :  { %3772 = vmatpush.bf16.msra.mxu1 %v5433_v44  ;;  %v5573_v44 = vor.u32 %v6271_v39, %v5570_v37  ;;  %v5380_v39 = vld [vmem:[%s9346_s8 + $0x2f0] sm:$0xf]  ;;  %v6226_v37 = vld [vmem:[%s9346_s8 + $0x308] sm:$0xf0]  ;;  %v9229_v27 = vld [vmem:[%s9347_s9] sm:$0x7f] }
 0x343   :  { %3728 = vmatmul.bf16.vlgmr.msrb.gmra.mxu1 %v8320_v8  ;;  %v5381_v46 = vor.u32 %v6226_v37, %v5380_v39 }
 0x344   :  { %3714 = vmatpush.bf16.msrb.mxu0 %v5009_v1  ;;  %v5265_v1 = vor.u32 %v6194_v54, %v5262_v55 }
 0x345   :  { %3740 = vmatpush.bf16.msrb.mxu2 %v5457_v4  ;;  %3749 = vmatpush.bf16.msrb.mxu3 %v5793_v5  ;;  %v6341_v4 = vld [vmem:[%s9346_s8 + $0x6a4] sm:$0xf]  ;;  %v5850_v5 = vld [vmem:[%s9346_s8 + $0x6bc] sm:$0xf0] }
 0x346   :  { %3773 = vmatpush.bf16.msra.mxu1 %v5405_v61  ;;  %v5545_v61 = vor.u32 %v6264_v48, %v5542_v50  ;;  %v5853_v57 = vor.u32 %v6341_v4, %v5850_v5  ;;  %v5632_v48 = vld [vmem:[%s9346_s8 + $0x4e8] sm:$0xf]  ;;  %v6289_v50 = vld [vmem:[%s9346_s8 + $0x500] sm:$0xf0]  ;;  %v5324_v4 = vld [vmem:[%s9346_s8 + $0x280] sm:$0xf] }
 0x347   :  { %3715 = vmatmul.bf16.vlgmr.msrb.gmra.mxu0 %v8347_v25  ;;  %v5633_v62 = vor.u32 %v6289_v50, %v5632_v48  ;;  %v6212_v5 = vld [vmem:[%s9346_s8 + $0x298] sm:$0xf0]  ;;  %v6191_v48 = vld [vmem:[%s9346_s8 + $0x1f0] sm:$0xf0]  ;;  %v2333_v50 = vperm.slane %v9229_v27, 0 }
 0x348   :  { %3759 = vmatpush.bf16.msra.mxu0 %v5209_v6  ;;  %3741 = vmatmul.bf16.vlgmr.msrb.gmra.mxu2 %v8355_v29  ;;  %v6187_v6 = vld [vmem:[%s9346_s8 + $0x1d4] sm:$0xf] }
 0x349   :  { %3785 = vmatpush.bf16.msra.mxu2 %v5657_v7  ;;  %3750 = vmatpush.bf16.msrb.mxu3 %v5765_v18  ;;  %v5234_v7 = vld [vmem:[%s9346_s8 + $0x1ec] sm:$0xf0]  ;;  %v5486_v18 = vld [vmem:[%s9346_s8 + $0x3e4] sm:$0xf0] }
 0x34a   :  { %3774 = vmatpush.bf16.msra.mxu1 %v5377_v14  ;;  %v5517_v14 = vor.u32 %v6257_v2, %v5514_v3  ;;  %v5237_v58 = vor.u32 %v6187_v6, %v5234_v7  ;;  %v5489_v26 = vor.u32 %v6250_v17, %v5486_v18  ;;  %v5604_v2 = vld [vmem:[%s9346_s8 + $0x4b0] sm:$0xf]  ;;  %v6282_v3 = vld [vmem:[%s9346_s8 + $0x4c8] sm:$0xf0]  ;;  %v6275_v17 = vld [vmem:[%s9346_s8 + $0x490] sm:$0xf0] }
 0x34b   :  { %v5296_v18 = vld [vmem:[%s9346_s8 + $0x248] sm:$0xf] }
 0x34c   :  { %3760 = vmatpush.bf16.msra.mxu0 %v5181_v19  ;;  %v5437_v19 = vor.u32 %v6240_v12, %v5436_v11  ;;  %v6306_v11 = vld [vmem:[%s9346_s8 + $0x58c] sm:$0xf]  ;;  %v5710_v12 = vld [vmem:[%s9346_s8 + $0x5a4] sm:$0xf0] }
 0x34d   :  { %3786 = vmatpush.bf16.msra.mxu2 %v5629_v20  ;;  %3751 = vmatpush.bf16.msrb.mxu3 %v5737_v60  ;;  %v6334_v20 = vld [vmem:[%s9346_s8 + $0x66c] sm:$0xf]  ;;  %v5458_v60 = vld [vmem:[%s9346_s8 + $0x3ac] sm:$0xf0] }
 0x34e   :  { %3775 = vmatpush.bf16.msra.mxu1 %v5349_v24  ;;  %v5041_v24 = vor.u32 %v6138_v15, %v5038_v16  ;;  %v5825_v53 = vor.u32 %v6334_v20, %v5822_v9  ;;  %v5461_v40 = vor.u32 %v6243_v30, %v5458_v60  ;;  %v5128_v15 = vld [vmem:[%s9346_s8 + $0xf8] sm:$0xf]  ;;  %v5713_v9 = vor.u32 %v6306_v11, %v5710_v12  ;;  %v6156_v30 = vld [vmem:[%s9346_s8 + $0xd8] sm:$0xf0]  ;;  %v6135_v12 = vld [vmem:[%s9346_s8 + $0x30] sm:$0xf0] }
 0x34f   :  { %v6268_v60 = vld [vmem:[%s9346_s8 + $0x458] sm:$0xf0]  ;;  %v5016_v11 = vld [vmem:[%s9346_s8 + $0x18] sm:$0xf] }
 0x350   :  { %3761 = vmatpush.bf16.msra.mxu0 %v5153_v31  ;;  %v6327_v31 = vld [vmem:[%s9346_s8 + $0x634] sm:$0xf] }
 0x351   :  { %3787 = vmatpush.bf16.msra.mxu2 %v5601_v34  ;;  %3752 = vmatpush.bf16.msrb.mxu3 %v5709_v41  ;;  %v5794_v34 = vld [vmem:[%s9346_s8 + $0x64c] sm:$0xf0] }
 0x352   :  { %3776 = vmatpush.bf16.msra.mxu1 %v5321_v36  ;;  %v5660_v36 = vld [vmem:[%s9346_s8 + $0x520] sm:$0xf]  ;;  %v5797_v41 = vor.u32 %v6327_v31, %v5794_v34  ;;  %v6352_v34 = vld [vmem:[%s9346_s8 + $0x6f8] sm:$0xf0] }
 0x353   :  { %v5661_v45 = vor.u32 %v6296_v32, %v5660_v36  ;;  %v5884_v31 = vld [vmem:[%s9346_s8 + $0x6e0] sm:$0xf]  ;;  %v5101_v32 = vor.u32 %v6156_v30, %v5100_v21  ;;  %v6317_v30 = vld [vmem:[%s9346_s8 + $0x5e0] sm:$0xf0] }
 0x354   :  { %3762 = vmatpush.bf16.msra.mxu0 %v5125_v43  ;;  %v6320_v43 = vld [vmem:[%s9346_s8 + $0x5fc] sm:$0xf] }
 0x355   :  { %3788 = vmatpush.bf16.msra.mxu2 %v5573_v44  ;;  %3753 = vmatpush.bf16.msrb.mxu3 %v5681_v56  ;;  %v5766_v44 = vld [vmem:[%s9346_s8 + $0x614] sm:$0xf0] }
 0x356   :  { %3777 = vmatpush.bf16.msra.mxu1 %v5293_v49  ;;  %v6177_v49 = vld [vmem:[%s9346_s8 + $0x180] sm:$0xf0]  ;;  %v5769_v55 = vor.u32 %v6320_v43, %v5766_v44 }
 0x357   :  { %v5185_v56 = vor.u32 %v6177_v49, %v5184_v47  ;;  %v6345_v47 = vld [vmem:[%s9346_s8 + $0x6c0] sm:$0xf0]  ;;  %v5240_v49 = vld [vmem:[%s9346_s8 + $0x1d8] sm:$0xf] }
 0x358   :  { %3763 = vmatpush.bf16.msra.mxu0 %v5097_v59  ;;  %3754 = vmatmul.bf16.vlgmr.msrb.gmra.mxu3 %v8433_v10  ;;  %v6313_v59 = vld [vmem:[%s9346_s8 + $0x5c4] sm:$0xf] }
 0x359   :  { %3789 = vmatpush.bf16.msra.mxu2 %v5545_v61  ;;  %3798 = vmatpush.bf16.msra.mxu3 %v5881_v0  ;;  %v5738_v61 = vld [vmem:[%s9346_s8 + $0x5dc] sm:$0xf0]  ;;  %v5156_v0 = vld [vmem:[%s9346_s8 + $0x130] sm:$0xf] }
 0x35a   :  { %3778 = vmatpush.bf16.msra.mxu1 %v5265_v1  ;;  %v6170_v1 = vld [vmem:[%s9346_s8 + $0x148] sm:$0xf0]  ;;  %v5741_v6 = vor.u32 %v6313_v59, %v5738_v61  ;;  %v5044_v59 = vld [vmem:[%s9346_s8 + $0x50] sm:$0xf] }
 0x35b   :  { %v5157_v7 = vor.u32 %v6170_v1, %v5156_v0  ;;  %v6142_v61 = vld [vmem:[%s9346_s8 + $0x68] sm:$0xf0]  ;;  %v5828_v1 = vld [vmem:[%s9346_s8 + $0x670] sm:$0xf] }
 0x35c   :  { %3764 = vmatpush.bf16.msra.mxu0 %v5069_v13  ;;  %v5605_v13 = vor.u32 %v6282_v3, %v5604_v2  ;;  %v6254_v0 = vld [vmem:[%s9346_s8 + $0x3e8] sm:$0xf0]  ;;  %v5045_v3 = vor.u32 %v6142_v61, %v5044_v59 }
 0x35d   :  { %3790 = vmatpush.bf16.msra.mxu2 %v5517_v14  ;;  %3799 = vmatpush.bf16.msra.mxu3 %v5853_v57  ;;  %v5325_v14 = vor.u32 %v6212_v5, %v5324_v4  ;;  %v6163_v57 = vld [vmem:[%s9346_s8 + $0x110] sm:$0xf0]  ;;  %v6338_v2 = vld [vmem:[%s9346_s8 + $0x688] sm:$0xf0] }
 0x35e   :  { %3779 = vmatpush.bf16.msra.mxu1 %v5237_v58  ;;  %v9142_v54 = vpop.f32.mrf.mxu1  ;;  %v5576_v58 = vld [vmem:[%s9346_s8 + $0x478] sm:$0xf]  ;;  %v5129_v22 = vor.u32 %v6163_v57, %v5128_v15  ;;  %v6247_v15 = vld [vmem:[%s9346_s8 + $0x3b0] sm:$0xf0] }
 0x35f   :  { %v5800_v57 = vld [vmem:[%s9346_s8 + $0x638] sm:$0xf] }
 0x360   :  { %3765 = vmatpush.bf16.msra.mxu0 %v5041_v24  ;;  %v5682_v24 = vld [vmem:[%s9346_s8 + $0x56c] sm:$0xf0] }
 0x361   :  { %3791 = vmatpush.bf16.msra.mxu2 %v5489_v26  ;;  %3800 = vmatpush.bf16.msra.mxu3 %v5825_v53  ;;  %v5577_v26 = vor.u32 %v6275_v17, %v5576_v58  ;;  %v5548_v53 = vld [vmem:[%s9346_s8 + $0x440] sm:$0xf]  ;;  %v5685_v36 = vor.u32 %v6299_v23, %v5682_v24  ;;  %v6331_v58 = vld [vmem:[%s9346_s8 + $0x650] sm:$0xf0]  ;;  %v5017_v17 = vor.u32 %v6135_v12, %v5016_v11 }
 0x362   :  { %3824 = vmatpush.bf16.msrb.mxu1 %v5437_v19  ;;  %v6205_v19 = vld [vmem:[%s9346_s8 + $0x260] sm:$0xf0]  ;;  %v5549_v37 = vor.u32 %v6268_v60, %v5548_v53  ;;  %v2334_v60 = vperm.slane %v9229_v27, 1 }
 0x363   :  { %3780 = vmatmul.bf16.vlgmr.msra.gmra.mxu1 %v8320_v8  ;;  %v5297_v28 = vor.u32 %v6205_v19, %v5296_v18 }
 0x364   :  { %3766 = vmatpush.bf16.msra.mxu0 %v5013_v38  ;;  %v9185_v16 = vpop.f32.mrf.mxu0  ;;  %v5885_v38 = vor.u32 %v6352_v34, %v5884_v31 }
 0x365   :  { %3792 = vmatpush.bf16.msra.mxu2 %v5461_v40  ;;  %3801 = vmatpush.bf16.msra.mxu3 %v5797_v41  ;;  %v5072_v40 = vld [vmem:[%s9346_s8 + $0x88] sm:$0xf]  ;;  %v6149_v41 = vld [vmem:[%s9346_s8 + $0xa0] sm:$0xf0]  ;;  %v3509_v4 = vadd.f32 %v9185_v16, %v2333_v50 }
 0x366   :  { %3825 = vmatpush.bf16.msrb.mxu1 %v5409_v33  ;;  %v3523_v20 = vpop.f32.mrf.mxu1  ;;  %v5268_v33 = vld [vmem:[%s9346_s8 + $0x210] sm:$0xf]  ;;  %v5073_v52 = vor.u32 %v6149_v41, %v5072_v40 }
 0x367   :  { %3767 = vmatmul.bf16.vlgmr.msra.gmra.mxu0 %v8347_v25  ;;  %v5269_v44 = vor.u32 %v6198_v35, %v5268_v33  ;;  %v3522_v18 = vadd.f32 %v9142_v54, %v3509_v4  ;;  %v5801_v20 = vor.u32 %v6331_v58, %v5800_v57  ;;  %v5716_v33 = vld [vmem:[%s9346_s8 + $0x590] sm:$0xf]  ;;  %v6310_v35 = vld [vmem:[%s9346_s8 + $0x5a8] sm:$0xf0] }
 0x368   :  { %3811 = vmatpush.bf16.msrb.mxu0 %v5213_v42  ;;  %3793 = vmatmul.bf16.vlgmr.msra.gmra.mxu2 %v8355_v29  ;;  %v5520_v42 = vld [vmem:[%s9346_s8 + $0x408] sm:$0xf] }
 0x369   :  { %3837 = vmatpush.bf16.msrb.mxu2 %v5661_v45  ;;  %3802 = vmatpush.bf16.msra.mxu3 %v5769_v55  ;;  %v6261_v45 = vld [vmem:[%s9346_s8 + $0x420] sm:$0xf0] }
 0x36a   :  { %3826 = vmatpush.bf16.msrb.mxu1 %v5381_v46  ;;  %v5856_v46 = vld [vmem:[%s9346_s8 + $0x6a8] sm:$0xf]  ;;  %v5521_v55 = vor.u32 %v6261_v45, %v5520_v42 }
 0x36b   :  { %v3534_v39 = vpop.f32.mrf.mxu2 }
 0x36c   :  { %3812 = vmatpush.bf16.msrb.mxu0 %v5185_v56  ;;  %v3510_v43 = vpop.f32.mrf.mxu0  ;;  %v5857_v56 = vor.u32 %v6345_v47, %v5856_v46  ;;  %v3535_v23 = vadd.f32 %v3534_v39, %v3522_v18  ;;  %v5717_v39 = vor.u32 %v6310_v35, %v5716_v33 }
 0x36d   :  { %3838 = vmatpush.bf16.msrb.mxu2 %v5633_v62  ;;  %3803 = vmatpush.bf16.msra.mxu3 %v5741_v6  ;;  %v5492_v62 = vld [vmem:[%s9346_s8 + $0x3d0] sm:$0xf] }
 0x36e   :  { %3827 = vmatpush.bf16.msrb.mxu1 %v5353_v63  ;;  %v9256_v51 = vpop.f32.mrf.mxu1  ;;  %v5241_v63 = vor.u32 %v6191_v48, %v5240_v49  ;;  %v5493_v6 = vor.u32 %v6254_v0, %v5492_v62 }
 0x370   :  { %3813 = vmatpush.bf16.msrb.mxu0 %v5157_v7  ;;  %v5829_v7 = vor.u32 %v6338_v2, %v5828_v1 }
 0x371   :  { %3839 = vmatpush.bf16.msrb.mxu2 %v5605_v13  ;;  %3804 = vmatpush.bf16.msra.mxu3 %v5713_v9  ;;  %v5464_v13 = vld [vmem:[%s9346_s8 + $0x398] sm:$0xf]  ;;  %v5772_v9 = vld [vmem:[%s9346_s8 + $0x600] sm:$0xf] }
 0x372   :  { %3828 = vmatpush.bf16.msrb.mxu1 %v5325_v14  ;;  %v5465_v19 = vor.u32 %v6247_v15, %v5464_v13 }
 0x373   :  { %v3536_v5 = vpop.f32.mrf.mxu2 }
 0x374   :  { %3814 = vmatpush.bf16.msrb.mxu0 %v5129_v22  ;;  %v3560_v14 = vpop.f32.mrf.mxu0  ;;  %v6324_v22 = vld [vmem:[%s9346_s8 + $0x618] sm:$0xf0] }
 0x375   :  { %3840 = vmatpush.bf16.msrb.mxu2 %v5577_v26  ;;  %3805 = vmatpush.bf16.msra.mxu3 %v5685_v36 }
 0x376   :  { %3829 = vmatpush.bf16.msrb.mxu1 %v5297_v28  ;;  %v3575_v16 = vpop.f32.mrf.mxu1  ;;  %v5773_v28 = vor.u32 %v6324_v22, %v5772_v9 }
 0x378   :  { %3815 = vmatpush.bf16.msrb.mxu0 %v5101_v32  ;;  %3806 = vmatmul.bf16.vlgmr.msra.gmra.mxu3 %v8433_v10  ;;  %v3561_v32 = vadd.f32 %v3560_v14, %v2334_v60 }
 0x379   :  { %3841 = vmatpush.bf16.msrb.mxu2 %v5549_v37  ;;  %3850 = vmatpush.bf16.msrb.mxu3 %v5885_v38  ;;  %v6303_v37 = vld [vmem:[%s9346_s8 + $0x570] sm:$0xf0] }
 0x37a   :  { %3830 = vmatpush.bf16.msrb.mxu1 %v5269_v44  ;;  %v3547_v24 = vpop.f32.mrf.mxu3  ;;  %v3574_v41 = vadd.f32 %v9256_v51, %v3561_v32 }
 0x37b   :  { %v3548_v54 = vadd.f32 %v3547_v24, %v3535_v23  ;;  %v3586_v26 = vpop.f32.mrf.mxu2 }
 0x37c   :  { %3816 = vmatpush.bf16.msrb.mxu0 %v5073_v52  ;;  %v3562_v21 = vpop.f32.mrf.mxu0  ;;  %v3587_v45 = vadd.f32 %v3586_v26, %v3574_v41 }
 0x37d   :  { %3842 = vmatpush.bf16.msrb.mxu2 %v5521_v55  ;;  %3851 = vmatpush.bf16.msrb.mxu3 %v5857_v56  ;;  %v5886_v53 = vmul.f32 -1.442695, %v3548_v54 }
 0x37e   :  { %3831 = vmatpush.bf16.msrb.mxu1 %v5241_v63  ;;  %v2335_v63 = vperm.slane %v9229_v27, 2 }
 0x37f   :  { %6359 = vpow2.f32 %v5886_v53 }
 0x380   :  { %3817 = vmatpush.bf16.msrb.mxu0 %v5045_v3  ;;  %v3625_v31 = vpop.f32.mrf.mxu1 }
 0x381   :  { %3843 = vmatpush.bf16.msrb.mxu2 %v5493_v6  ;;  %3852 = vmatpush.bf16.msrb.mxu3 %v5829_v7 }
 0x382   :  { %3832 = vmatmul.bf16.vlgmr.msrb.gmra.mxu1 %v8320_v8  ;;  %v5744_v8 = vld [vmem:[%s9346_s8 + $0x5c8] sm:$0xf]  ;;  %v3549_v36 = vpop.f32.mrf.mxu3 }
 0x383   :  { %v5745_v34 = vor.u32 %v6317_v30, %v5744_v8  ;;  %v2336_v30 = vperm.slane %v9229_v27, 3 }
 0x384   :  { %3818 = vmatpush.bf16.msrb.mxu0 %v5017_v17  ;;  %v3612_v38 = vpop.f32.mrf.mxu0 }
 0x385   :  { %3844 = vmatpush.bf16.msrb.mxu2 %v5465_v19  ;;  %3853 = vmatpush.bf16.msrb.mxu3 %v5801_v20  ;;  %v6360_v40 = vpop.eup %6359  ;;  %v3613_v4 = vadd.f32 %v3612_v38, %v2335_v63 }
 0x386   :  { %v3884_v44 = vadd.f32 1.0, %v6360_v40 }
 0x387   :  { %3819 = vmatmul.bf16.vlgmr.msrb.gmra.mxu0 %v8347_v25  ;;  %v3588_v25 = vpop.f32.mrf.mxu2  ;;  %v3626_v7 = vadd.f32 %v3625_v31, %v3613_v4 }
 0x388   :  { %3845 = vmatmul.bf16.vlgmr.msrb.gmra.mxu2 %v8355_v29  ;;  %v5688_v29 = vld [vmem:[%s9346_s8 + $0x558] sm:$0xf]  ;;  %v3627_v42 = vpop.f32.mrf.mxu1  ;;  %6361 = vrcp.f32 %v3884_v44  ;;  %v3902_v15 = vand.u32 2147483648, %v3884_v44  ;;  %vm3896_vm4 = vweird.f32 %v3884_v44  ;;  %v3900_v17 = vand.u32 2147483647, %v3884_v44  ;;  %s6440_s8 = smov [#allocation4]  }
 0x389   :  { %3854 = vmatpush.bf16.msrb.mxu3 %v5773_v28  ;;  %v5689_v43 = vor.u32 %v6303_v37, %v5688_v29  ;;  %s4022_s1 = sshll.u32 %s6440_s8, 4  ;;  %s4023_s1 = int_to_ptr.vmem [resolvable:$true] %s4022_s1 }
 0x38a   :  { %v3599_v46 = vpop.f32.mrf.mxu3  ;;  %v3903_v22 = vor.u32 1.1754944e-38, %v3902_v15  ;;  %vm3901_vm9 = vcmp.eq.f32.partialorder %v3900_v17, 8.507059e+37  ;;  %4027 = dma.vmem_to_hbm [thread:$0]  %s4023_s1, 128, %s4025_s25, [#allocation5]  }
 0x38b   :  { %v3600_v47 = vadd.f32 %v3599_v46, %v3587_v45 }
 0x38c   :  { %v3614_v50 = vpop.f32.mrf.mxu0 }
 0x38d   :  { %3855 = vmatpush.bf16.msrb.mxu3 %v5745_v34  ;;  %v5887_v48 = vmul.f32 -1.442695, %v3600_v47 }
 0x38e   :  { %v6362_v55 = vpop.eup %6361 }
 0x38f   :  { %v3638_v49 = vpop.f32.mrf.mxu2  ;;  %6363 = vpow2.f32 %v5887_v48  ;;  %v3892_v51 = vmul.f32 %v6362_v55, %v3884_v44  ;;  %vm3897_vm2 = vweird.f32 %v6362_v55 }
 0x390   :  { %v3639_v58 = vadd.f32 %v3638_v49, %v3626_v7  ;;  %vm3898_vm5 = vmor %vm3896_vm4, %vm3897_vm2 }
 0x391   :  { %3856 = vmatpush.bf16.msrb.mxu3 %v5717_v39  ;;  %v3893_v62 = vsub.f32 1.0, %v3892_v51 }
 0x392   :  { %v3601_v52 = vpop.f32.mrf.mxu3 }
 0x393   :  { %v3894_v3 = vmul.f32 %v6362_v55, %v3893_v62 }
 0x395   :  { %3857 = vmatpush.bf16.msrb.mxu3 %v5689_v43  ;;  %v6364_v59 = vpop.eup %6363  ;;  %v3895_v11 = vadd.f32 %v6362_v55, %v3894_v3 }
 0x396   :  { %v3885_v61 = vadd.f32 1.0, %v6364_v59 }
 0x397   :  { %v3640_v56 = vpop.f32.mrf.mxu2  ;;  %v3899_v20 = vsel %vm3898_vm5, %v6362_v55, %v3895_v11 }
 0x398   :  { %3858 = vmatmul.bf16.vlgmr.msrb.gmra.mxu3 %v8433_v10  ;;  %6365 = vrcp.f32 %v3885_v61  ;;  %v3917_v12 = vand.u32 2147483648, %v3885_v61  ;;  %v3915_v57 = vand.u32 2147483647, %v3885_v61  ;;  %vm3911_vm6 = vweird.f32 %v3885_v61 }
 0x399   :  { %v3904_v26 = vsel %vm3901_vm9, %v3903_v22, %v3899_v20  ;;  %v2338_v20 = vperm.slane %v9229_v27, 5 }
 0x39a   :  { %v3918_v9 = vor.u32 1.1754944e-38, %v3917_v12  ;;  %vm3916_vm8 = vcmp.eq.f32.partialorder %v3915_v57, 8.507059e+37 }
 0x39b   :  { %v3651_v0 = vpop.f32.mrf.mxu3 }
 0x39c   :  { %v3652_v19 = vadd.f32 %v3651_v0, %v3639_v58 }
 0x39e   :  { %v6366_v2 = vpop.eup %6365  ;;  %v5888_v28 = vmul.f32 -1.442695, %v3652_v19 }
 0x39f   :  { %v3907_v5 = vmul.f32 %v6366_v2, %v3885_v61  ;;  %vm3912_vm3 = vweird.f32 %v6366_v2 }
 0x3a0   :  { %v3677_v1 = vpop.f32.mrf.mxu1  ;;  %vm3913_vm7 = vmor %vm3911_vm6, %vm3912_vm3  ;;  %6367 = vpow2.f32 %v5888_v28 }
 0x3a1   :  { %v3908_v6 = vsub.f32 1.0, %v3907_v5 }
 0x3a3   :  { %v3909_v13 = vmul.f32 %v6366_v2, %v3908_v6  ;;  %v3653_v14 = vpop.f32.mrf.mxu3 }
 0x3a4   :  { %v3664_v10 = vpop.f32.mrf.mxu0 }
 0x3a5   :  { %v3910_v18 = vadd.f32 %v6366_v2, %v3909_v13  ;;  %v3665_v60 = vadd.f32 %v3664_v10, %v2336_v30 }
 0x3a6   :  { %v6368_v31 = vpop.eup %6367 }
 0x3a7   :  { %v3914_v23 = vsel %vm3913_vm7, %v6366_v2, %v3910_v18  ;;  %v3678_v34 = vadd.f32 %v3677_v1, %v3665_v60  ;;  %v3886_v33 = vadd.f32 1.0, %v6368_v31  ;;  %v2337_v1 = vperm.slane %v9229_v27, 4 }
 0x3a8   :  { %v3679_v16 = vpop.f32.mrf.mxu1  ;;  %v3919_v54 = vsel %vm3916_vm8, %v3918_v9, %v3914_v23 }
 0x3a9   :  { %v3996_v8 = vpack.c.bf16 %v3919_v54, %v3904_v26  ;;  %6369 = vrcp.f32 %v3886_v33  ;;  %vm3926_vm11 = vweird.f32 %v3886_v33  ;;  %v3932_v56 = vand.u32 2147483648, %v3886_v33 }
 0x3aa   :  { %v3930_v61 = vand.u32 2147483647, %v3886_v33 }
 0x3ab   :  { %v3690_v24 = vpop.f32.mrf.mxu2  ;;  %4000 = vst [vmem:[#allocation2] sm:$0xff] %v3996_v8  ;;  %v3933_v2 = vor.u32 1.1754944e-38, %v3932_v56 }
 0x3ac   :  { %v3666_v21 = vpop.f32.mrf.mxu0  ;;  %v3691_v35 = vadd.f32 %v3690_v24, %v3678_v34  ;;  %vm3931_vm0 = vcmp.eq.f32.partialorder %v3930_v61, 8.507059e+37 }
 0x3af   :  { %v6370_v37 = vpop.eup %6369 }
 0x3b0   :  { %v3922_v42 = vmul.f32 %v6370_v37, %v3886_v33  ;;  %vm3927_vm10 = vweird.f32 %v6370_v37 }
 0x3b1   :  { %vm3928_vm13 = vmor %vm3926_vm11, %vm3927_vm10 }
 0x3b2   :  { %v3923_v46 = vsub.f32 1.0, %v3922_v42 }
 0x3b3   :  { %v3692_v53 = vpop.f32.mrf.mxu2 }
 0x3b4   :  { %v3924_v47 = vmul.f32 %v6370_v37, %v3923_v46 }
 0x3b6   :  { %v3925_v55 = vadd.f32 %v6370_v37, %v3924_v47 }
 0x3b8   :  { %v3929_v63 = vsel %vm3928_vm13, %v6370_v37, %v3925_v55 }
 0x3b9   :  { %v3934_v7 = vsel %vm3931_vm0, %v3933_v2, %v3929_v63 }
 0x3bb   :  { %v3703_v36 = vpop.f32.mrf.mxu3 }
 0x3bc   :  { %v3704_v32 = vadd.f32 %v3703_v36, %v3691_v35 }
 0x3be   :  { %v5889_v39 = vmul.f32 -1.442695, %v3704_v32 }
 0x3c0   :  { %v3729_v25 = vpop.f32.mrf.mxu1  ;;  %6371 = vpow2.f32 %v5889_v39 }
 0x3c3   :  { %v3705_v38 = vpop.f32.mrf.mxu3 }
 0x3c4   :  { %v3716_v29 = vpop.f32.mrf.mxu0 }
 0x3c5   :  { %v3717_v12 = vadd.f32 %v3716_v29, %v2337_v1  ;;  %v2339_v29 = vperm.slane %v9229_v27, 6 }
 0x3c6   :  { %v6372_v41 = vpop.eup %6371 }
 0x3c7   :  { %v3887_v43 = vadd.f32 1.0, %v6372_v41  ;;  %v3730_v13 = vadd.f32 %v3729_v25, %v3717_v12 }
 0x3c8   :  { %v3731_v40 = vpop.f32.mrf.mxu1 }
 0x3c9   :  { %6373 = vrcp.f32 %v3887_v43  ;;  %v3947_v59 = vand.u32 2147483648, %v3887_v43  ;;  %v3945_v62 = vand.u32 2147483647, %v3887_v43  ;;  %vm3941_vm14 = vweird.f32 %v3887_v43 }
 0x3cb   :  { %v3742_v44 = vpop.f32.mrf.mxu2  ;;  %v3948_v3 = vor.u32 1.1754944e-38, %v3947_v59  ;;  %vm3946_vm1 = vcmp.eq.f32.partialorder %v3945_v62, 8.507059e+37 }
 0x3cc   :  { %v3718_v45 = vpop.f32.mrf.mxu0  ;;  %v3743_v57 = vadd.f32 %v3742_v44, %v3730_v13 }
 0x3cf   :  { %v6374_v49 = vpop.eup %6373 }
 0x3d0   :  { %v3937_v48 = vmul.f32 %v6374_v49, %v3887_v43  ;;  %vm3942_vm12 = vweird.f32 %v6374_v49 }
 0x3d1   :  { %vm3943_vm15 = vmor %vm3941_vm14, %vm3942_vm12  ;;  %vm4003_vm14 = vcmask 125952  }
 0x3d2   :  { %v3938_v52 = vsub.f32 1.0, %v3937_v48 }
 0x3d3   :  { %v3744_v50 = vpop.f32.mrf.mxu2 }
 0x3d4   :  { %v3939_v51 = vmul.f32 %v6374_v49, %v3938_v52 }
 0x3d6   :  { %v3940_v0 = vadd.f32 %v6374_v49, %v3939_v51 }
 0x3d8   :  { %v3944_v5 = vsel %vm3943_vm15, %v6374_v49, %v3940_v0 }
 0x3d9   :  { %v3949_v10 = vsel %vm3946_vm1, %v3948_v3, %v3944_v5 }
 0x3da   :  { %v3997_v11 = vpack.c.bf16 %v3949_v10, %v3934_v7 }
 0x3db   :  { %v3755_v4 = vpop.f32.mrf.mxu3 }
 0x3dc   :  { %4001 = vst [vmem:[#allocation2 + $0x8] sm:$0xff] %v3997_v11  ;;  %v3756_v16 = vadd.f32 %v3755_v4, %v3743_v57 }
 0x3de   :  { %v5890_v18 = vmul.f32 -1.442695, %v3756_v16 }
 0x3e0   :  { %v3781_v6 = vpop.f32.mrf.mxu1  ;;  %6375 = vpow2.f32 %v5890_v18 }
 0x3e3   :  { %v3757_v15 = vpop.f32.mrf.mxu3 }
 0x3e4   :  { %v3768_v14 = vpop.f32.mrf.mxu0 }
 0x3e5   :  { %v3769_v22 = vadd.f32 %v3768_v14, %v2338_v20 }
 0x3e6   :  { %v6376_v23 = vpop.eup %6375 }
 0x3e7   :  { %v3782_v24 = vadd.f32 %v3781_v6, %v3769_v22  ;;  %v3888_v54 = vadd.f32 1.0, %v6376_v23 }
 0x3e8   :  { %v3783_v58 = vpop.f32.mrf.mxu1 }
 0x3e9   :  { %6377 = vrcp.f32 %v3888_v54  ;;  %vm3956_vm3 = vweird.f32 %v3888_v54  ;;  %v3962_v45 = vand.u32 2147483648, %v3888_v54  ;;  %v3960_v49 = vand.u32 2147483647, %v3888_v54 }
 0x3eb   :  { %v3794_v17 = vpop.f32.mrf.mxu2  ;;  %v3963_v56 = vor.u32 1.1754944e-38, %v3962_v45  ;;  %vm3961_vm8 = vcmp.eq.f32.partialorder %v3960_v49, 8.507059e+37 }
 0x3ec   :  { %v3770_v19 = vpop.f32.mrf.mxu0  ;;  %v3795_v26 = vadd.f32 %v3794_v17, %v3782_v24 }
 0x3ef   :  { %v6378_v60 = vpop.eup %6377 }
 0x3f0   :  { %v3952_v35 = vmul.f32 %v6378_v60, %v3888_v54  ;;  %vm3957_vm2 = vweird.f32 %v6378_v60 }
 0x3f1   :  { %vm3958_vm5 = vmor %vm3956_vm3, %vm3957_vm2 }
 0x3f2   :  { %v3953_v39 = vsub.f32 1.0, %v3952_v35 }
 0x3f3   :  { %v3796_v9 = vpop.f32.mrf.mxu2 }
 0x3f4   :  { %v3954_v37 = vmul.f32 %v6378_v60, %v3953_v39 }
 0x3f6   :  { %v3955_v44 = vadd.f32 %v6378_v60, %v3954_v37 }
 0x3f8   :  { %v3959_v52 = vsel %vm3958_vm5, %v6378_v60, %v3955_v44 }
 0x3f9   :  { %v3964_v63 = vsel %vm3961_vm8, %v3963_v56, %v3959_v52 }
 0x3fb   :  { %v3807_v28 = vpop.f32.mrf.mxu3 }
 0x3fc   :  { %v3808_v21 = vadd.f32 %v3807_v28, %v3795_v26 }
 0x3fe   :  { %v5891_v30 = vmul.f32 -1.442695, %v3808_v21 }
 0x3ff   :  { %v3833_v8 = vpop.f32.mrf.mxu1 }
 0x400   :  { %6379 = vpow2.f32 %v5891_v30 }
 0x403   :  { %v3809_v31 = vpop.f32.mrf.mxu3 }
 0x404   :  { %v3820_v53 = vpop.f32.mrf.mxu0 }
 0x405   :  { %v3821_v42 = vadd.f32 %v3820_v53, %v2339_v29 }
 0x406   :  { %v6380_v33 = vpop.eup %6379 }
 0x407   :  { %v3835_v34 = vpop.f32.mrf.mxu1  ;;  %v3889_v36 = vadd.f32 1.0, %v6380_v33  ;;  %v3834_v50 = vadd.f32 %v3833_v8, %v3821_v42 }
 0x409   :  { %6381 = vrcp.f32 %v3889_v36  ;;  %v3977_v46 = vand.u32 2147483648, %v3889_v36  ;;  %v3975_v48 = vand.u32 2147483647, %v3889_v36  ;;  %vm3971_vm6 = vweird.f32 %v3889_v36 }
 0x40b   :  { %v3846_v32 = vpop.f32.mrf.mxu2  ;;  %v3978_v59 = vor.u32 1.1754944e-38, %v3977_v46  ;;  %vm3976_vm9 = vcmp.eq.f32.partialorder %v3975_v48, 8.507059e+37 }
 0x40c   :  { %v3822_v25 = vpop.f32.mrf.mxu0  ;;  %v3847_v27 = vadd.f32 %v3846_v32, %v3834_v50 }
 0x40f   :  { %v6382_v38 = vpop.eup %6381 }
 0x410   :  { %v3967_v40 = vmul.f32 %v6382_v38, %v3889_v36  ;;  %vm3972_vm4 = vweird.f32 %v6382_v38 }
 0x411   :  { %vm3973_vm7 = vmor %vm3971_vm6, %vm3972_vm4 }
 0x412   :  { %v3968_v43 = vsub.f32 1.0, %v3967_v40 }
 0x413   :  { %v3848_v41 = vpop.f32.mrf.mxu2 }
 0x414   :  { %v3969_v47 = vmul.f32 %v6382_v38, %v3968_v43 }
 0x416   :  { %v3970_v55 = vadd.f32 %v6382_v38, %v3969_v47 }
 0x418   :  { %v3974_v61 = vsel %vm3973_vm7, %v6382_v38, %v3970_v55 }
 0x419   :  { %v3979_v0 = vsel %vm3976_vm9, %v3978_v59, %v3974_v61 }
 0x41a   :  { %v3998_v1 = vpack.c.bf16 %v3979_v0, %v3964_v63 }
 0x41b   :  { %v3859_v51 = vpop.f32.mrf.mxu3 }
 0x41c   :  { %v3860_v62 = vadd.f32 %v3859_v51, %v3847_v27  ;;  %4002 = vst [vmem:[#allocation2 + $0x10] sm:$0xff] %v3998_v1 }
 0x41e   :  { %v5892_v2 = vmul.f32 -1.442695, %v3860_v62 }
 0x420   :  { %6383 = vpow2.f32 %v5892_v2 }
 0x423   :  { %v3861_v3 = vpop.f32.mrf.mxu3 }
 0x426   :  { %v6384_v4 = vpop.eup %6383 }
 0x427   :  { %v3890_v5 = vadd.f32 1.0, %v6384_v4 }
 0x429   :  { %6385 = vrcp.f32 %v3890_v5  ;;  %v3992_v11 = vand.u32 2147483648, %v3890_v5  ;;  %v3990_v13 = vand.u32 2147483647, %v3890_v5  ;;  %vm3986_vm11 = vweird.f32 %v3890_v5 }
 0x42b   :  { %v3993_v15 = vor.u32 1.1754944e-38, %v3992_v11  ;;  %vm3991_vm13 = vcmp.eq.f32.partialorder %v3990_v13, 8.507059e+37 }
 0x42f   :  { %v6386_v6 = vpop.eup %6385 }
 0x430   :  { %v3982_v7 = vmul.f32 %v6386_v6, %v3890_v5  ;;  %vm3987_vm10 = vweird.f32 %v6386_v6 }
 0x431   :  { %vm3988_vm12 = vmor %vm3986_vm11, %vm3987_vm10 }
 0x432   :  { %v3983_v10 = vsub.f32 1.0, %v3982_v7 }
 0x434   :  { %v3984_v12 = vmul.f32 %v6386_v6, %v3983_v10 }
 0x436   :  { %v3985_v14 = vadd.f32 %v6386_v6, %v3984_v12 }
 0x438   :  { %v3989_v57 = vsel %vm3988_vm12, %v6386_v6, %v3985_v14 }
 0x439   :  { %v3994_v58 = vsel %vm3991_vm13, %v3993_v15, %v3989_v57 }
 0x43a   :  { %v3999_v16 = vpack.c.bf16 %v3994_v58, %v3994_v58 }
 0x43c   :  { %4004 = vst.msk [vmem:[#allocation2 + $0x18] sm:$0xf] %vm4003_vm14, %v3999_v16 }
 0x43d   :  { %4016 = dma.vmem_to_hbm [thread:$0]  %s4012_s26, 448, %s4014_s2, [#allocation3]  }
 0x43e   :  { %6435 = dma.done.wait [#allocation3], 448  }
 0x43f   :  { %6436 = vsyncadd [#allocation3], 4294966848 }
 0x440   :  { %6437 = dma.done.wait [#allocation5], 128  }
 0x441   :  { %6438 = vsyncadd [#allocation5], 4294967168 }
 0x442   :  { %4036 = vsyncpa [#allocation3], 1 }
 0x443   :  { %4037 = vsyncpa [#allocation5], 1 }

</bundles_post_ra>
